<compile_context>
chip_gen: v6e
topology: v6e:2x2x1
jax: 0.10.0
libtpu: 0.0.40
codegen_flags: <defaults>
</compile_context>

<pallas_src>
import functools

import jax
import jax.numpy as jnp
from jax.experimental import pallas as pl
from jax.experimental.pallas import tpu as pltpu

# 48 MiB: <= v7x's 64 MiB/TC physical VMEM, plenty for v5e/v6e's 128 MiB; all
# tile choices below keep the double-buffered working set well under this.
_VMEM_LIMIT = 48 * 1024 * 1024


def _round_up(x, m):
    return ((x + m - 1) // m) * m


def _pick_m_tile(m):
    """GEMM M tiling: tiny M -> one full-extent block padded to a sublane multiple."""
    if m <= 512:
        tm = _round_up(m, 8)
        return tm, tm
    tm = 512
    return _round_up(m, tm), tm


def _pick_bn_m_tile(m):
    """Streaming (BN/concat) passes: big tiles to approach the HBM roofline."""
    if m <= 1024:
        tm = _round_up(m, 8)
        return tm, tm
    tm = 1024
    return _round_up(m, tm), tm


def _pick_k_tile(kp):
    for tk in (2048, 1024, 512, 256, 128):
        if kp % tk == 0:
            return tk
    return kp


# ----------------------------- Pallas kernels -----------------------------

def _gemm_relu_kernel(a_ref, b_ref, o_ref, acc_ref):
    """o = relu(a @ b), bf16 out.  Grid (i, k); k is the reduction axis."""
    @pl.when(pl.program_id(1) == 0)
    def _init():
        acc_ref[...] = jnp.zeros_like(acc_ref)

    acc_ref[...] += jnp.dot(a_ref[...], b_ref[...],
                            preferred_element_type=jnp.float32)

    @pl.when(pl.program_id(1) == pl.num_programs(1) - 1)
    def _store():
        o_ref[...] = jnp.maximum(acc_ref[...], 0.0).astype(o_ref.dtype)


def _gemm_bnstats_kernel(a_ref, b_ref, mask_ref, t_ref, stats_ref, acc_ref, *, cp):
    """t = a @ b (bf16 out) with per-channel [sum; sumsq] fused in the epilogue.

    t's columns are 4 sub-pixel phase blocks of width cp that hold the same nf
    channels; mask_ref[:, blk] flags which rows of phase block `blk` land inside
    the valid (non-border, non-padded) output and so contribute to BN stats.
    """
    @pl.when(pl.program_id(1) == 0)
    def _init():
        acc_ref[...] = jnp.zeros_like(acc_ref)

    acc_ref[...] += jnp.dot(a_ref[...], b_ref[...],
                            preferred_element_type=jnp.float32)

    @pl.when(pl.program_id(1) == pl.num_programs(1) - 1)
    def _store():
        acc = acc_ref[...]
        t_ref[...] = acc.astype(t_ref.dtype)
        csum = jnp.zeros((1, cp), jnp.float32)
        csq = jnp.zeros((1, cp), jnp.float32)
        for blk in range(4):                       # static unroll; XLU column sums
            mb = mask_ref[:, blk:blk + 1]          # (tm, 1) f32
            vals = acc[:, blk * cp:(blk + 1) * cp] * mb
            csum = csum + jnp.sum(vals, axis=0, keepdims=True)
            csq = csq + jnp.sum(vals * vals, axis=0, keepdims=True)
        stats_ref[...] = jnp.concatenate([csum, csq], axis=0)[None, :, :]


def _bn_norm_concat_kernel(s_ref, g_ref, b_ref, x_ref, u_ref, o_ref, *, count, eps):
    """Normalize u with batch stats and write [x | BN(u)] in one streaming pass."""
    inv_n = 1.0 / count
    mean = s_ref[0:1, :] * inv_n
    var = jnp.maximum(s_ref[1:2, :] * inv_n - mean * mean, 0.0)
    scale = g_ref[...] * jax.lax.rsqrt(var + eps)
    shift = b_ref[...] - mean * scale
    cp = x_ref.shape[1]
    o_ref[:, :cp] = x_ref[...]
    o_ref[:, cp:] = u_ref[...].astype(jnp.float32) * scale + shift


# --------------------------- pallas_call wrappers ---------------------------

def _gemm_relu(a, b):
    """relu(a @ b) in bf16.  a: (M, K) bf16; b: (Kp, Np) bf16, pre-padded."""
    m, k = a.shape
    kp, np_ = b.shape
    mp, tm = _pick_m_tile(m)
    if mp > m or kp > k:
        a = jnp.pad(a, ((0, mp - m), (0, kp - k)))
    tk = _pick_k_tile(kp)
    return pl.pallas_call(
        _gemm_relu_kernel,
        out_shape=jax.ShapeDtypeStruct((mp, np_), jnp.bfloat16),
        grid=(mp // tm, kp // tk),
        in_specs=[pl.BlockSpec((tm, tk), lambda i, kk: (i, kk)),
                  pl.BlockSpec((tk, np_), lambda i, kk: (kk, 0))],
        out_specs=pl.BlockSpec((tm, np_), lambda i, kk: (i, 0)),
        scratch_shapes=[pltpu.VMEM((tm, np_), jnp.float32)],
        compiler_params=pltpu.CompilerParams(
            dimension_semantics=("parallel", "arbitrary"),
            vmem_limit_bytes=_VMEM_LIMIT),
    )(a, b)


def _phase_mask(mp, m_valid, hp1, wp1, ho, wo):
    """(mp, 4) f32: which rows of each sub-pixel phase block hit valid output."""
    rows = jnp.arange(mp, dtype=jnp.int32)
    pq = rows % (hp1 * wp1)
    p = pq // wp1
    q = pq % wp1
    valid = rows < m_valid
    cols = []
    for blk in range(4):
        r, s = 1 - blk // 2, 1 - blk % 2
        mb = (valid & (p >= r) & (p <= ho - 1 + r)
              & (q >= s) & (q <= wo - 1 + s))
        cols.append(mb)
    return jnp.stack(cols, axis=1).astype(jnp.float32)


def _gemm_bnstats(a, b, *, cp, hp1, wp1, ho, wo):
    """a @ b in bf16 plus per-i-tile masked BN [sum; sumsq] partials."""
    m, k = a.shape
    kp, np_ = b.shape
    mp, tm = _pick_m_tile(m)
    if mp > m or kp > k:
        a = jnp.pad(a, ((0, mp - m), (0, kp - k)))
    tk = _pick_k_tile(kp)
    gm = mp // tm
    mask = _phase_mask(mp, m, hp1, wp1, ho, wo)
    kern = functools.partial(_gemm_bnstats_kernel, cp=cp)
    return pl.pallas_call(
        kern,
        out_shape=(jax.ShapeDtypeStruct((mp, np_), jnp.bfloat16),
                   jax.ShapeDtypeStruct((gm, 2, cp), jnp.float32)),
        grid=(gm, kp // tk),
        in_specs=[pl.BlockSpec((tm, tk), lambda i, kk: (i, kk)),
                  pl.BlockSpec((tk, np_), lambda i, kk: (kk, 0)),
                  pl.BlockSpec((tm, 4), lambda i, kk: (i, 0))],
        out_specs=[pl.BlockSpec((tm, np_), lambda i, kk: (i, 0)),
                   pl.BlockSpec((1, 2, cp), lambda i, kk: (i, 0, 0))],
        scratch_shapes=[pltpu.VMEM((tm, np_), jnp.float32)],
        compiler_params=pltpu.CompilerParams(
            dimension_semantics=("parallel", "arbitrary"),
            vmem_limit_bytes=_VMEM_LIMIT),
    )(a, b, mask)


def _bn_norm_concat(stats, gamma, beta, xq, uq, *, count, tm, eps=1e-5):
    mp, cp = uq.shape
    kern = functools.partial(_bn_norm_concat_kernel, count=count, eps=eps)
    return pl.pallas_call(
        kern,
        out_shape=jax.ShapeDtypeStruct((mp, 2 * cp), jnp.float32),
        grid=(mp // tm,),
        in_specs=[pl.BlockSpec((2, cp), lambda i: (0, 0)),
                  pl.BlockSpec((1, cp), lambda i: (0, 0)),
                  pl.BlockSpec((1, cp), lambda i: (0, 0)),
                  pl.BlockSpec((tm, cp), lambda i: (i, 0)),
                  pl.BlockSpec((tm, cp), lambda i: (i, 0))],
        out_specs=pl.BlockSpec((tm, 2 * cp), lambda i: (i, 0)),
        compiler_params=pltpu.CompilerParams(
            dimension_semantics=("parallel",),
            vmem_limit_bytes=_VMEM_LIMIT),
    )(stats, gamma, beta, xq, uq)


# ------------------------------- JAX glue ----------------------------------

def _down_patches(x_nhwc):
    """Patches for Conv2d(k=4,s=2,p=1) via space-to-depth: (N*Ho*Wo, 16*C) bf16.

    Feature order is (di, dj, a, b, c) with kh = 2*di + a, kw = 2*dj + b."""
    n, h, w, c = x_nhwc.shape
    xp = jnp.pad(x_nhwc, ((0, 0), (1, 1), (1, 1), (0, 0)))
    hs, ws = (h + 2) // 2, (w + 2) // 2
    xs = xp.reshape(n, hs, 2, ws, 2, c).transpose(0, 1, 3, 2, 4, 5)  # (N,Hs,Ws,2,2,C)
    ho, wo = h // 2, w // 2
    cols = [xs[:, di:di + ho, dj:dj + wo] for di in range(2) for dj in range(2)]
    p = jnp.stack(cols, axis=3)                                       # (N,Ho,Wo,4,2,2,C)
    return p.reshape(n * ho * wo, 16 * c)


def _up_patches(d_nhwc):
    """2x2 windows of zero-padded d for the sub-pixel transposed conv.

    Returns (N*(Ho+1)*(Wo+1), 4*C) bf16 with feature order (di, dj, c)."""
    n, ho, wo, c = d_nhwc.shape
    dp = jnp.pad(d_nhwc, ((0, 0), (1, 1), (1, 1), (0, 0)))
    cols = [dp[:, di:di + ho + 1, dj:dj + wo + 1] for di in range(2) for dj in range(2)]
    p = jnp.concatenate(cols, axis=-1)                                # (N,Ho+1,Wo+1,4C)
    return p.reshape(n * (ho + 1) * (wo + 1), 4 * c)


def prepare_params(params):
    """One-time weight prep: matmul layouts, 128-padded lanes, bf16 cast."""
    wd = params["down_w"].astype(jnp.float32)     # (ni, cin, 4, 4) torch Conv2d layout
    ni_, cin = wd.shape[0], wd.shape[1]
    # rows ordered (di, dj, a, b, c) with kh = 2*di + a, kw = 2*dj + b
    wd_mat = wd.reshape(ni_, cin, 2, 2, 2, 2).transpose(2, 4, 3, 5, 1, 0)
    wd_mat = wd_mat.reshape(16 * cin, ni_)
    kdp = _round_up(16 * cin, 128)
    cpad_ni = _round_up(ni_, 128)
    wd_mat = jnp.pad(wd_mat, ((0, kdp - 16 * cin), (0, cpad_ni - ni_))).astype(jnp.bfloat16)

    wu = params["up_w"].astype(jnp.float32)       # (ni, nf, 4, 4) torch ConvTranspose2d
    nf_ = wu.shape[1]
    cp = _round_up(nf_, 128)
    # Sub-pixel decomposition; rows (di, dj, c[padded to cpad_ni]); columns are 4
    # phase blocks of width cp in (1-r, 1-s) order so the de-interleave downstream
    # is a pure pixel-shuffle:  B[(di,dj,c),(blk,o)] = wu[c,o,3-2di-r,3-2dj-s].
    wu_mat = jnp.zeros((4 * cpad_ni, 4 * cp), jnp.float32)
    for di in range(2):
        for dj in range(2):
            for r in range(2):
                for s in range(2):
                    blk = 2 * (1 - r) + (1 - s)
                    w_rs = wu[:, :, 3 - 2 * di - r, 3 - 2 * dj - s]   # (ni, nf)
                    row0 = (2 * di + dj) * cpad_ni
                    col0 = blk * cp
                    wu_mat = wu_mat.at[row0:row0 + ni_, col0:col0 + nf_].set(w_rs)
    wu_mat = wu_mat.astype(jnp.bfloat16)

    return {
        "wd": wd_mat,
        "wu": wu_mat,
        "bn_w": jnp.pad(params["bn_w"].astype(jnp.float32), (0, cp - nf_)).reshape(1, cp),
        "bn_b": jnp.pad(params["bn_b"].astype(jnp.float32), (0, cp - nf_)).reshape(1, cp),
    }


def unet_block_innermost_forward(x_nchw, prep, *, nf, ni):
    """Innermost UnetBlock forward. x: (N, nf, H, W) NCHW -> (N, 2*nf, H, W)."""
    n, cin, h, w = x_nchw.shape
    ho, wo = h // 2, w // 2
    hp1, wp1 = ho + 1, wo + 1
    cpad_ni = prep["wd"].shape[1]
    cp = prep["bn_w"].shape[1]
    assert cpad_ni == _round_up(ni, 128)
    assert prep["wu"].shape[1] == 4 * cp

    x = jnp.transpose(x_nchw, (0, 2, 3, 1))                  # NHWC, channels on lanes

    # ---- down: LeakyReLU(0.2) hoisted onto x (one pass, not 4x patches), bf16
    xa = jnp.where(x >= 0, x, 0.2 * x).astype(jnp.bfloat16)
    a1 = _down_patches(xa)                                   # (m1, 16*cin) bf16
    m1 = n * ho * wo
    d = _gemm_relu(a1, prep["wd"])[:m1]                      # ReLU + bf16 fused epilogue
    d = d.reshape(n, ho, wo, cpad_ni)

    # ---- up: sub-pixel transposed conv; BN sum/sumsq fused into the GEMM epilogue
    a2 = _up_patches(d)                                      # (m2, 4*cpad_ni) bf16
    m2 = n * hp1 * wp1
    t, stats_part = _gemm_bnstats(a2, prep["wu"], cp=cp,
                                  hp1=hp1, wp1=wp1, ho=ho, wo=wo)
    stats = jnp.sum(stats_part, axis=0)                      # (2, cp) f32

    # De-interleave: phase blocks were emitted in (1-r, 1-s) order, so this is a
    # pure pixel-shuffle reshape/transpose + 1-px crop (no zeros init / scatter).
    # TODO(synk): fuse this shuffle into the BN/concat kernel to save one HBM pass.
    v = t[:m2].reshape(n, hp1, wp1, 2, 2, cp).transpose(0, 1, 3, 2, 4, 5)
    u = v.reshape(n, 2 * hp1, 2 * wp1, cp)[:, 1:1 + h, 1:1 + w, :]   # (n,h,w,cp) bf16

    # ---- BatchNorm2d (training batch stats) fused with the channel concat
    m3 = n * h * w
    mp3, tm3 = _pick_bn_m_tile(m3)
    u2 = u.reshape(m3, cp)
    x2 = x.reshape(m3, cin)
    if cp > cin:
        x2 = jnp.pad(x2, ((0, 0), (0, cp - cin)))
    if mp3 > m3:
        u2 = jnp.pad(u2, ((0, mp3 - m3), (0, 0)))
        x2 = jnp.pad(x2, ((0, mp3 - m3), (0, 0)))
    cat = _bn_norm_concat(stats, prep["bn_w"], prep["bn_b"], x2, u2,
                          count=float(m3), tm=tm3)
    out = cat[:m3].reshape(n, h, w, 2, cp)[..., :nf]          # (N,H,W,2,nf): [x | BN(u)]
    # TODO(synk): emit NHWC (or channel-major tiles from the BN kernel) to skip this.
    return jnp.transpose(out, (0, 3, 4, 1, 2)).reshape(n, 2 * nf, h, w)


# --------------------------- pure-JAX reference -----------------------------

def _reference_forward(x_nchw, params, eps=1e-5):
    hp = jax.lax.Precision.HIGHEST
    n, _, h, w = x_nchw.shape
    x = jnp.transpose(x_nchw, (0, 2, 3, 1))
    wd, wu = params["down_w"], params["up_w"]
    ni_, nf_ = wd.shape[0], wu.shape[1]
    ho, wo = h // 2, w // 2
    a = jnp.where(x >= 0, x, 0.2 * x)
    ap = jnp.pad(a, ((0, 0), (1, 1), (1, 1), (0, 0)))
    d = jnp.zeros((n, ho, wo, ni_), jnp.float32)
    for kh in range(4):
        for kw in range(4):
            d = d + jnp.einsum("nijc,oc->nijo",
                               ap[:, kh:kh + 2 * ho:2, kw:kw + 2 * wo:2, :],
                               wd[:, :, kh, kw], precision=hp)
    rd = jnp.maximum(d, 0.0)
    y = jnp.zeros((n, 2 * ho + 2, 2 * wo + 2, nf_), jnp.float32)
    for kh in range(4):
        for kw in range(4):
            contrib = jnp.einsum("nijc,cf->nijf", rd, wu[:, :, kh, kw], precision=hp)
            y = y.at[:, kh:kh + 2 * ho:2, kw:kw + 2 * wo:2, :].add(contrib)
    y = y[:, 1:1 + 2 * ho, 1:1 + 2 * wo, :]
    mean = jnp.mean(y, axis=(0, 1, 2))
    var = jnp.mean((y - mean) ** 2, axis=(0, 1, 2))
    yn = (y - mean) * jax.lax.rsqrt(var + eps) * params["bn_w"] + params["bn_b"]
    return jnp.concatenate([x_nchw, jnp.transpose(yn, (0, 3, 1, 2))], axis=1)


# --------------------------------- main -------------------------------------

if __name__ == "__main__":
    nf = ni = 8          # innermost block has nf == ni (512 in the real model)
    N, H, W = 2, 16, 16

    key = jax.random.PRNGKey(0)
    kx, k1, k2, k3 = jax.random.split(key, 4)

    # init_weights(init='norm', gain=0.02): conv ~ N(0, 0.02); BN w ~ N(1, 0.02), b = 0
    params = {
        "down_w": 0.02 * jax.random.normal(k1, (ni, nf, 4, 4), jnp.float32),
        "up_w":   0.02 * jax.random.normal(k2, (ni, nf, 4, 4), jnp.float32),
        "bn_w":   1.0 + 0.02 * jax.random.normal(k3, (nf,), jnp.float32),
        "bn_b":   jnp.zeros((nf,), jnp.float32),
    }
    x = jax.random.normal(kx, (N, nf, H, W), jnp.float32)     # NCHW like PyTorch

    prep = prepare_params(params)                             # weights prepped once
    fwd = jax.jit(functools.partial(unet_block_innermost_forward, nf=nf, ni=ni))
    out = jax.block_until_ready(fwd(x, prep))

    assert out.shape == (N, 2 * nf, H, W), out.shape
    assert out.dtype == jnp.float32

    ref = jax.block_until_ready(_reference_forward(x, params))
    max_err = float(jnp.max(jnp.abs(out - ref)))
    assert bool(jnp.allclose(out, ref, atol=1e-1, rtol=1e-1)), f"max abs err {max_err}"
    print("KERNEL_OK")
</pallas_src>

<mosaic_0001>
module attributes {stable_mosaic.version = 11 : i64} {
  func.func @_gemm_relu_kernel(%arg0: i32, %arg1: i32, %arg2: memref<128x128xbf16, #tpu.memory_space<vmem>>, %arg3: memref<128x128xbf16, #tpu.memory_space<vmem>>, %arg4: memref<128x128xbf16, #tpu.memory_space<vmem>>, %arg5: memref<128x128xf32, #tpu.memory_space<vmem>>) attributes {dimension_semantics = [#tpu.dimension_semantics<parallel>, #tpu.dimension_semantics<arbitrary>], iteration_bounds = array<i64: 1, 1>, scalar_prefetch = 0 : i64, scratch_operands = 1 : i64, tpu.core_type = #tpu.core_type<tc>, window_params = [{transform_indices = @transform_0, window_bounds = array<i64: 128, 128>}, {transform_indices = @transform_1, window_bounds = array<i64: 128, 128>}, {transform_indices = @transform_2, window_bounds = array<i64: 128, 128>}]} {
    %c0_i32 = arith.constant 0 : i32
    %0 = arith.cmpi eq, %arg1, %c0_i32 : i32
    %1 = arith.extui %0 : i1 to i32
    %c0_i32_0 = arith.constant 0 : i32
    %2 = arith.cmpi ne, %1, %c0_i32_0 : i32
    scf.if %2 {
      %cst_10 = arith.constant 0.000000e+00 : f32
      %12 = vector.broadcast %cst_10 : f32 to vector<128x128xf32>
      %c0_11 = arith.constant 0 : index
      %c0_12 = arith.constant 0 : index
      %13 = vector.load %arg5[%c0_11, %c0_12] : memref<128x128xf32, #tpu.memory_space<vmem>>, vector<128x128xf32>
      tpu.vector_store %arg5[%c0_11, %c0_12], %12 {strides = array<i32>} : memref<128x128xf32, #tpu.memory_space<vmem>>, vector<128x128xf32>,
    } else {
    }
    %c0 = arith.constant 0 : index
    %c0_1 = arith.constant 0 : index
    %3 = vector.load %arg5[%c0, %c0_1] : memref<128x128xf32, #tpu.memory_space<vmem>>, vector<128x128xf32>
    %c0_2 = arith.constant 0 : index
    %c0_3 = arith.constant 0 : index
    %4 = vector.load %arg2[%c0_2, %c0_3] : memref<128x128xbf16, #tpu.memory_space<vmem>>, vector<128x128xbf16>
    %c0_4 = arith.constant 0 : index
    %c0_5 = arith.constant 0 : index
    %5 = vector.load %arg3[%c0_4, %c0_5] : memref<128x128xbf16, #tpu.memory_space<vmem>>, vector<128x128xbf16>
    %cst = arith.constant dense<0.000000e+00> : vector<128x128xf32>
    %6 = tpu.matmul %4, %5, %cst {dimension_numbers = #tpu.dot_dimension_numbers<[1], [0], [0], [1], [0, 0, 1, 1], [], []>} : vector<128x128xbf16>, vector<128x128xbf16>, vector<128x128xf32> -> vector<128x128xf32>
    %7 = arith.addf %3, %6 : vector<128x128xf32>
    %c0_6 = arith.constant 0 : index
    %c0_7 = arith.constant 0 : index
    %8 = vector.load %arg5[%c0_6, %c0_7] : memref<128x128xf32, #tpu.memory_space<vmem>>, vector<128x128xf32>
    tpu.vector_store %arg5[%c0_6, %c0_7], %7 {strides = array<i32>} : memref<128x128xf32, #tpu.memory_space<vmem>>, vector<128x128xf32>,
    %c0_i32_8 = arith.constant 0 : i32
    %9 = arith.cmpi eq, %arg1, %c0_i32_8 : i32
    %10 = arith.extui %9 : i1 to i32
    %c0_i32_9 = arith.constant 0 : i32
    %11 = arith.cmpi ne, %10, %c0_i32_9 : i32
    scf.if %11 {
      %c0_10 = arith.constant 0 : index
      %c0_11 = arith.constant 0 : index
      %12 = vector.load %arg5[%c0_10, %c0_11] : memref<128x128xf32, #tpu.memory_space<vmem>>, vector<128x128xf32>
      %cst_12 = arith.constant 0.000000e+00 : f32
      %13 = vector.broadcast %cst_12 : f32 to vector<128x128xf32>
      %14 = arith.maximumf %12, %13 : vector<128x128xf32>
      %15 = arith.truncf %14 : vector<128x128xf32> to vector<128x128xbf16>
      %c0_13 = arith.constant 0 : index
      %c0_14 = arith.constant 0 : index
      %16 = vector.load %arg4[%c0_13, %c0_14] : memref<128x128xbf16, #tpu.memory_space<vmem>>, vector<128x128xbf16>
      tpu.vector_store %arg4[%c0_13, %c0_14], %15 {strides = array<i32>} : memref<128x128xbf16, #tpu.memory_space<vmem>>, vector<128x128xbf16>,
    } else {
    }
    return
  }
  func.func @transform_0(%arg0: i32, %arg1: i32) -> (i32, i32) {
    %c0_i32 = arith.constant 0 : i32
    return %arg0, %arg1 : i32, i32
  }
  func.func @transform_1(%arg0: i32, %arg1: i32) -> (i32, i32) {
    %c0_i32 = arith.constant 0 : i32
    %c0_i32_0 = arith.constant 0 : i32
    return %arg1, %c0_i32 : i32, i32
  }
  func.func @transform_2(%arg0: i32, %arg1: i32) -> (i32, i32) {
    %c0_i32 = arith.constant 0 : i32
    %c0_i32_0 = arith.constant 0 : i32
    return %arg0, %c0_i32 : i32, i32
  }
}

module attributes {stable_mosaic.version = 11 : i64} {
  func.func @_gemm_bnstats_kernel(%arg0: i32, %arg1: i32, %arg2: memref<168x512xbf16, #tpu.memory_space<vmem>>, %arg3: memref<512x512xbf16, #tpu.memory_space<vmem>>, %arg4: memref<168x4xf32, #tpu.memory_space<vmem>>, %arg5: memref<168x512xbf16, #tpu.memory_space<vmem>>, %arg6: memref<1x2x128xf32, #tpu.memory_space<vmem>>, %arg7: memref<168x512xf32, #tpu.memory_space<vmem>>) attributes {dimension_semantics = [#tpu.dimension_semantics<parallel>, #tpu.dimension_semantics<arbitrary>], iteration_bounds = array<i64: 1, 1>, scalar_prefetch = 0 : i64, scratch_operands = 1 : i64, tpu.core_type = #tpu.core_type<tc>, window_params = [{transform_indices = @transform_0, window_bounds = array<i64: 168, 512>}, {transform_indices = @transform_1, window_bounds = array<i64: 512, 512>}, {transform_indices = @transform_2, window_bounds = array<i64: 168, 4>}, {transform_indices = @transform_3, window_bounds = array<i64: 168, 512>}, {transform_indices = @transform_4, window_bounds = array<i64: 1, 2, 128>}]} {
    %c0_i32 = arith.constant 0 : i32
    %0 = arith.cmpi eq, %arg1, %c0_i32 : i32
    %1 = arith.extui %0 : i1 to i32
    %c0_i32_0 = arith.constant 0 : i32
    %2 = arith.cmpi ne, %1, %c0_i32_0 : i32
    scf.if %2 {
      %cst_10 = arith.constant 0.000000e+00 : f32
      %12 = vector.broadcast %cst_10 : f32 to vector<168x512xf32>
      %c0_11 = arith.constant 0 : index
      %c0_12 = arith.constant 0 : index
      %13 = vector.load %arg7[%c0_11, %c0_12] : memref<168x512xf32, #tpu.memory_space<vmem>>, vector<168x512xf32>
      tpu.vector_store %arg7[%c0_11, %c0_12], %12 {strides = array<i32>} : memref<168x512xf32, #tpu.memory_space<vmem>>, vector<168x512xf32>,
    } else {
    }
    %c0 = arith.constant 0 : index
    %c0_1 = arith.constant 0 : index
    %3 = vector.load %arg7[%c0, %c0_1] : memref<168x512xf32, #tpu.memory_space<vmem>>, vector<168x512xf32>
    %c0_2 = arith.constant 0 : index
    %c0_3 = arith.constant 0 : index
    %4 = vector.load %arg2[%c0_2, %c0_3] : memref<168x512xbf16, #tpu.memory_space<vmem>>, vector<168x512xbf16>
    %c0_4 = arith.constant 0 : index
    %c0_5 = arith.constant 0 : index
    %5 = vector.load %arg3[%c0_4, %c0_5] : memref<512x512xbf16, #tpu.memory_space<vmem>>, vector<512x512xbf16>
    %cst = arith.constant dense<0.000000e+00> : vector<168x512xf32>
    %6 = tpu.matmul %4, %5, %cst {dimension_numbers = #tpu.dot_dimension_numbers<[1], [0], [0], [1], [0, 0, 1, 1], [], []>} : vector<168x512xbf16>, vector<512x512xbf16>, vector<168x512xf32> -> vector<168x512xf32>
    %7 = arith.addf %3, %6 : vector<168x512xf32>
    %c0_6 = arith.constant 0 : index
    %c0_7 = arith.constant 0 : index
    %8 = vector.load %arg7[%c0_6, %c0_7] : memref<168x512xf32, #tpu.memory_space<vmem>>, vector<168x512xf32>
    tpu.vector_store %arg7[%c0_6, %c0_7], %7 {strides = array<i32>} : memref<168x512xf32, #tpu.memory_space<vmem>>, vector<168x512xf32>,
    %c0_i32_8 = arith.constant 0 : i32
    %9 = arith.cmpi eq, %arg1, %c0_i32_8 : i32
    %10 = arith.extui %9 : i1 to i32
    %c0_i32_9 = arith.constant 0 : i32
    %11 = arith.cmpi ne, %10, %c0_i32_9 : i32
    scf.if %11 {
      %c0_10 = arith.constant 0 : index
      %c0_11 = arith.constant 0 : index
      %12 = vector.load %arg7[%c0_10, %c0_11] : memref<168x512xf32, #tpu.memory_space<vmem>>, vector<168x512xf32>
      %13 = arith.truncf %12 : vector<168x512xf32> to vector<168x512xbf16>
      %c0_12 = arith.constant 0 : index
      %c0_13 = arith.constant 0 : index
      %14 = vector.load %arg5[%c0_12, %c0_13] : memref<168x512xbf16, #tpu.memory_space<vmem>>, vector<168x512xbf16>
      tpu.vector_store %arg5[%c0_12, %c0_13], %13 {strides = array<i32>} : memref<168x512xbf16, #tpu.memory_space<vmem>>, vector<168x512xbf16>,
      %cst_14 = arith.constant 0.000000e+00 : f32
      %15 = vector.broadcast %cst_14 : f32 to vector<1x128xf32>
      %cst_15 = arith.constant 0.000000e+00 : f32
      %16 = vector.broadcast %cst_15 : f32 to vector<1x128xf32>
      %c0_16 = arith.constant 0 : index
      %c0_17 = arith.constant 0 : index
      %17 = vector.load %arg4[%c0_16, %c0_17] : memref<168x4xf32, #tpu.memory_space<vmem>>, vector<168x1xf32>
      %18 = vector.extract_strided_slice %12 {offsets = [0, 0], sizes = [168, 128], strides = [1, 1]} : vector<168x512xf32> to vector<168x128xf32>
      %19 = vector.broadcast %17 : vector<168x1xf32> to vector<168x128xf32>
      %20 = arith.mulf %18, %19 : vector<168x128xf32>
      %cst_18 = arith.constant dense<0.000000e+00> : vector<128xf32>
      %21 = vector.multi_reduction <add>, %20, %cst_18 [0] : vector<168x128xf32> to vector<128xf32>
      %22 = vector.shape_cast %21 : vector<128xf32> to vector<1x128xf32>
      %23 = arith.addf %15, %22 : vector<1x128xf32>
      %24 = arith.mulf %20, %20 : vector<168x128xf32>
      %cst_19 = arith.constant dense<0.000000e+00> : vector<128xf32>
      %25 = vector.multi_reduction <add>, %24, %cst_19 [0] : vector<168x128xf32> to vector<128xf32>
      %26 = vector.shape_cast %25 : vector<128xf32> to vector<1x128xf32>
      %27 = arith.addf %16, %26 : vector<1x128xf32>
      %c0_20 = arith.constant 0 : index
      %c1 = arith.constant 1 : index
      %28 = vector.load %arg4[%c0_20, %c1] : memref<168x4xf32, #tpu.memory_space<vmem>>, vector<168x1xf32>
      %29 = vector.extract_strided_slice %12 {offsets = [0, 128], sizes = [168, 128], strides = [1, 1]} : vector<168x512xf32> to vector<168x128xf32>
      %30 = vector.broadcast %28 : vector<168x1xf32> to vector<168x128xf32>
      %31 = arith.mulf %29, %30 : vector<168x128xf32>
      %cst_21 = arith.constant dense<0.000000e+00> : vector<128xf32>
      %32 = vector.multi_reduction <add>, %31, %cst_21 [0] : vector<168x128xf32> to vector<128xf32>
      %33 = vector.shape_cast %32 : vector<128xf32> to vector<1x128xf32>
      %34 = arith.addf %23, %33 : vector<1x128xf32>
      %35 = arith.mulf %31, %31 : vector<168x128xf32>
      %cst_22 = arith.constant dense<0.000000e+00> : vector<128xf32>
      %36 = vector.multi_reduction <add>, %35, %cst_22 [0] : vector<168x128xf32> to vector<128xf32>
      %37 = vector.shape_cast %36 : vector<128xf32> to vector<1x128xf32>
      %38 = arith.addf %27, %37 : vector<1x128xf32>
      %c0_23 = arith.constant 0 : index
      %c2 = arith.constant 2 : index
      %39 = vector.load %arg4[%c0_23, %c2] : memref<168x4xf32, #tpu.memory_space<vmem>>, vector<168x1xf32>
      %40 = vector.extract_strided_slice %12 {offsets = [0, 256], sizes = [168, 128], strides = [1, 1]} : vector<168x512xf32> to vector<168x128xf32>
      %41 = vector.broadcast %39 : vector<168x1xf32> to vector<168x128xf32>
      %42 = arith.mulf %40, %41 : vector<168x128xf32>
      %cst_24 = arith.constant dense<0.000000e+00> : vector<128xf32>
      %43 = vector.multi_reduction <add>, %42, %cst_24 [0] : vector<168x128xf32> to vector<128xf32>
      %44 = vector.shape_cast %43 : vector<128xf32> to vector<1x128xf32>
      %45 = arith.addf %34, %44 : vector<1x128xf32>
      %46 = arith.mulf %42, %42 : vector<168x128xf32>
      %cst_25 = arith.constant dense<0.000000e+00> : vector<128xf32>
      %47 = vector.multi_reduction <add>, %46, %cst_25 [0] : vector<168x128xf32> to vector<128xf32>
      %48 = vector.shape_cast %47 : vector<128xf32> to vector<1x128xf32>
      %49 = arith.addf %38, %48 : vector<1x128xf32>
      %c0_26 = arith.constant 0 : index
      %c3 = arith.constant 3 : index
      %50 = vector.load %arg4[%c0_26, %c3] : memref<168x4xf32, #tpu.memory_space<vmem>>, vector<168x1xf32>
      %51 = vector.extract_strided_slice %12 {offsets = [0, 384], sizes = [168, 128], strides = [1, 1]} : vector<168x512xf32> to vector<168x128xf32>
      %52 = vector.broadcast %50 : vector<168x1xf32> to vector<168x128xf32>
      %53 = arith.mulf %51, %52 : vector<168x128xf32>
      %cst_27 = arith.constant dense<0.000000e+00> : vector<128xf32>
      %54 = vector.multi_reduction <add>, %53, %cst_27 [0] : vector<168x128xf32> to vector<128xf32>
      %55 = vector.shape_cast %54 : vector<128xf32> to vector<1x128xf32>
      %56 = arith.addf %45, %55 : vector<1x128xf32>
      %57 = arith.mulf %53, %53 : vector<168x128xf32>
      %cst_28 = arith.constant dense<0.000000e+00> : vector<128xf32>
      %58 = vector.multi_reduction <add>, %57, %cst_28 [0] : vector<168x128xf32> to vector<128xf32>
      %59 = vector.shape_cast %58 : vector<128xf32> to vector<1x128xf32>
      %60 = arith.addf %49, %59 : vector<1x128xf32>
      %61 = tpu.concatenate %56, %60 in 0 : vector<1x128xf32>, vector<1x128xf32> -> vector<2x128xf32>
      %62 = vector.shape_cast %61 : vector<2x128xf32> to vector<1x2x128xf32>
      %c0_29 = arith.constant 0 : index
      %c0_30 = arith.constant 0 : index
      %c0_31 = arith.constant 0 : index
      %63 = vector.load %arg6[%c0_29, %c0_30, %c0_31] : memref<1x2x128xf32, #tpu.memory_space<vmem>>, vector<1x2x128xf32>
      tpu.vector_store %arg6[%c0_29, %c0_30, %c0_31], %62 {strides = array<i32>} : memref<1x2x128xf32, #tpu.memory_space<vmem>>, vector<1x2x128xf32>,
    } else {
    }
    return
  }
  func.func @transform_0(%arg0: i32, %arg1: i32) -> (i32, i32) {
    %c0_i32 = arith.constant 0 : i32
    return %arg0, %arg1 : i32, i32
  }
  func.func @transform_1(%arg0: i32, %arg1: i32) -> (i32, i32) {
    %c0_i32 = arith.constant 0 : i32
    %c0_i32_0 = arith.constant 0 : i32
    return %arg1, %c0_i32 : i32, i32
  }
  func.func @transform_2(%arg0: i32, %arg1: i32) -> (i32, i32) {
    %c0_i32 = arith.constant 0 : i32
    %c0_i32_0 = arith.constant 0 : i32
    return %arg0, %c0_i32 : i32, i32
  }
  func.func @transform_3(%arg0: i32, %arg1: i32) -> (i32, i32) {
    %c0_i32 = arith.constant 0 : i32
    %c0_i32_0 = arith.constant 0 : i32
    return %arg0, %c0_i32 : i32, i32
  }
  func.func @transform_4(%arg0: i32, %arg1: i32) -> (i32, i32, i32) {
    %c0_i32 = arith.constant 0 : i32
    %c0_i32_0 = arith.constant 0 : i32
    %c0_i32_1 = arith.constant 0 : i32
    return %arg0, %c0_i32, %c0_i32_0 : i32, i32, i32
  }
}

module attributes {stable_mosaic.version = 11 : i64} {
  func.func @_bn_norm_concat_kernel(%arg0: i32, %arg1: memref<2x128xf32, #tpu.memory_space<vmem>>, %arg2: memref<1x128xf32, #tpu.memory_space<vmem>>, %arg3: memref<1x128xf32, #tpu.memory_space<vmem>>, %arg4: memref<512x128xf32, #tpu.memory_space<vmem>>, %arg5: memref<512x128xbf16, #tpu.memory_space<vmem>>, %arg6: memref<512x256xf32, #tpu.memory_space<vmem>>) attributes {dimension_semantics = [#tpu.dimension_semantics<parallel>], iteration_bounds = array<i64: 1>, scalar_prefetch = 0 : i64, scratch_operands = 0 : i64, tpu.core_type = #tpu.core_type<tc>, window_params = [{pipeline_mode = #tpu.pipeline_mode<synchronous>, transform_indices = @transform_0, window_bounds = array<i64: 2, 128>}, {pipeline_mode = #tpu.pipeline_mode<synchronous>, transform_indices = @transform_1, window_bounds = array<i64: 1, 128>}, {pipeline_mode = #tpu.pipeline_mode<synchronous>, transform_indices = @transform_2, window_bounds = array<i64: 1, 128>}, {transform_indices = @transform_3, window_bounds = array<i64: 512, 128>}, {transform_indices = @transform_4, window_bounds = array<i64: 512, 128>}, {transform_indices = @transform_5, window_bounds = array<i64: 512, 256>}]} {
    %c0 = arith.constant 0 : index
    %c0_0 = arith.constant 0 : index
    %0 = vector.load %arg1[%c0, %c0_0] : memref<2x128xf32, #tpu.memory_space<vmem>>, vector<1x128xf32>
    %cst = arith.constant 0.001953125 : f32
    %1 = vector.broadcast %cst : f32 to vector<1x128xf32>
    %2 = arith.mulf %0, %1 : vector<1x128xf32>
    %c1 = arith.constant 1 : index
    %c0_1 = arith.constant 0 : index
    %3 = vector.load %arg1[%c1, %c0_1] : memref<2x128xf32, #tpu.memory_space<vmem>>, vector<1x128xf32>
    %cst_2 = arith.constant 0.001953125 : f32
    %4 = vector.broadcast %cst_2 : f32 to vector<1x128xf32>
    %5 = arith.mulf %3, %4 : vector<1x128xf32>
    %6 = arith.mulf %2, %2 : vector<1x128xf32>
    %7 = arith.subf %5, %6 : vector<1x128xf32>
    %cst_3 = arith.constant 0.000000e+00 : f32
    %8 = vector.broadcast %cst_3 : f32 to vector<1x128xf32>
    %9 = arith.maximumf %7, %8 : vector<1x128xf32>
    %c0_4 = arith.constant 0 : index
    %c0_5 = arith.constant 0 : index
    %10 = vector.load %arg2[%c0_4, %c0_5] : memref<1x128xf32, #tpu.memory_space<vmem>>, vector<1x128xf32>
    %cst_6 = arith.constant 9.99999974E-6 : f32
    %11 = vector.broadcast %cst_6 : f32 to vector<1x128xf32>
    %12 = arith.addf %9, %11 : vector<1x128xf32>
    %13 = math.rsqrt %12 : vector<1x128xf32>
    %14 = arith.mulf %10, %13 : vector<1x128xf32>
    %c0_7 = arith.constant 0 : index
    %c0_8 = arith.constant 0 : index
    %15 = vector.load %arg3[%c0_7, %c0_8] : memref<1x128xf32, #tpu.memory_space<vmem>>, vector<1x128xf32>
    %16 = arith.mulf %2, %14 : vector<1x128xf32>
    %17 = arith.subf %15, %16 : vector<1x128xf32>
    %c0_9 = arith.constant 0 : index
    %c0_10 = arith.constant 0 : index
    %18 = vector.load %arg4[%c0_9, %c0_10] : memref<512x128xf32, #tpu.memory_space<vmem>>, vector<512x128xf32>
    %c0_11 = arith.constant 0 : index
    %c0_12 = arith.constant 0 : index
    %19 = vector.load %arg6[%c0_11, %c0_12] : memref<512x256xf32, #tpu.memory_space<vmem>>, vector<512x128xf32>
    tpu.vector_store %arg6[%c0_11, %c0_12], %18 {strides = array<i32>} : memref<512x256xf32, #tpu.memory_space<vmem>>, vector<512x128xf32>,
    %c0_13 = arith.constant 0 : index
    %c0_14 = arith.constant 0 : index
    %20 = vector.load %arg5[%c0_13, %c0_14] : memref<512x128xbf16, #tpu.memory_space<vmem>>, vector<512x128xbf16>
    %21 = arith.extf %20 : vector<512x128xbf16> to vector<512x128xf32>
    %22 = vector.broadcast %14 : vector<1x128xf32> to vector<512x128xf32>
    %23 = arith.mulf %21, %22 : vector<512x128xf32>
    %24 = vector.broadcast %17 : vector<1x128xf32> to vector<512x128xf32>
    %25 = arith.addf %23, %24 : vector<512x128xf32>
    %c0_15 = arith.constant 0 : index
    %c128 = arith.constant 128 : index
    %26 = vector.load %arg6[%c0_15, %c128] : memref<512x256xf32, #tpu.memory_space<vmem>>, vector<512x128xf32>
    tpu.vector_store %arg6[%c0_15, %c128], %25 {strides = array<i32>} : memref<512x256xf32, #tpu.memory_space<vmem>>, vector<512x128xf32>,
    return
  }
  func.func @transform_0(%arg0: i32) -> (i32, i32) {
    %c0_i32 = arith.constant 0 : i32
    %c0_i32_0 = arith.constant 0 : i32
    %c0_i32_1 = arith.constant 0 : i32
    return %c0_i32, %c0_i32_0 : i32, i32
  }
  func.func @transform_1(%arg0: i32) -> (i32, i32) {
    %c0_i32 = arith.constant 0 : i32
    %c0_i32_0 = arith.constant 0 : i32
    %c0_i32_1 = arith.constant 0 : i32
    return %c0_i32, %c0_i32_0 : i32, i32
  }
  func.func @transform_2(%arg0: i32) -> (i32, i32) {
    %c0_i32 = arith.constant 0 : i32
    %c0_i32_0 = arith.constant 0 : i32
    %c0_i32_1 = arith.constant 0 : i32
    return %c0_i32, %c0_i32_0 : i32, i32
  }
  func.func @transform_3(%arg0: i32) -> (i32, i32) {
    %c0_i32 = arith.constant 0 : i32
    %c0_i32_0 = arith.constant 0 : i32
    return %arg0, %c0_i32 : i32, i32
  }
  func.func @transform_4(%arg0: i32) -> (i32, i32) {
    %c0_i32 = arith.constant 0 : i32
    %c0_i32_0 = arith.constant 0 : i32
    return %arg0, %c0_i32 : i32, i32
  }
  func.func @transform_5(%arg0: i32) -> (i32, i32) {
    %c0_i32 = arith.constant 0 : i32
    %c0_i32_0 = arith.constant 0 : i32
    return %arg0, %c0_i32 : i32, i32
  }
}

</mosaic_0001>

<bundles_post_ra>
// kernel: unet_block_innermost_forward.3
= control target key start
LH: loop header
LB: loop body
LE: loop exit
PB: predicated region body
PF: predicated region fallthrough
CT: control target
= control target key end

     0   :  { %s686_s1 = inlined_call_operand.vmem [shape: bf16[128,128], index: 1, kind: input, shape index: {}]   ;;  %s687_s0 = inlined_call_operand.vmem [shape: bf16[128,128], index: 0, kind: input, shape index: {}]   ;;  %s688_s2 = inlined_call_operand.vmem [shape: bf16[128,128], index: 2, kind: output, shape index: {}]  }
   0x1   :  { %v583_v0 = vld [vmem:[%s686_s1 + $0x38] sm:$0xff]   ;;  %v584_v1 = vld [vmem:[%s686_s1 + $0x30] sm:$0xff]   ;;  %v585_v2 = vld [vmem:[%s686_s1 + $0x28] sm:$0xff]  }
   0x2   :  { %535 = vmatprep.subr.bf16.mxu0 %v583_v0  ;;  %567 = vmatprep.subr.bf16.mxu1 %v583_v0  ;;  %v586_v3 = vld [vmem:[%s686_s1 + $0x20] sm:$0xff]   ;;  %v587_v6 = vld [vmem:[%s686_s1 + $0x18] sm:$0xff]   ;;  %v588_v7 = vld [vmem:[%s686_s1 + $0x10] sm:$0xff]  }
   0x3   :  { %536 = vmatpush3.bf16.msra.mxu0 %v583_v0  ;;  %575 = vmatpush3.bf16.msra.mxu1 %v583_v0  ;;  %v591_v4 = vld [vmem:[%s687_s0] sm:$0xff]   ;;  %v589_v8 = vld [vmem:[%s686_s1 + $0x8] sm:$0xff]   ;;  %v595_v12 = vld [vmem:[%s687_s0 + $0x10] sm:$0xff]  }
   0x4   :  { %537 = vmatprep.subr.bf16.mxu0 %v584_v1  ;;  %568 = vmatprep.subr.bf16.mxu1 %v584_v1  ;;  %v592_v5 = vld [vmem:[%s687_s0 + $0x20] sm:$0xff]   ;;  %v593_v10 = vld [vmem:[%s687_s0 + $0x8] sm:$0xff]   ;;  %v596_v13 = vld [vmem:[%s687_s0 + $0x30] sm:$0xff]  }
   0x5   :  { %551 = vmatprep.mubr.bf16.mxu0 %v591_v4  ;;  %559 = vmatprep.mubr.bf16.mxu1 %v592_v5  ;;  %v590_v9 = vld [vmem:[%s686_s1] sm:$0xff]   ;;  %v594_v11 = vld [vmem:[%s687_s0 + $0x28] sm:$0xff]   ;;  %v597_v14 = vld [vmem:[%s687_s0 + $0x18] sm:$0xff]  }
   0x6   :  { %v598_v15 = vld [vmem:[%s687_s0 + $0x38] sm:$0xff]  }
   0x7   :  { %538 = vmatpush3.bf16.msra.mxu0 %v584_v1  ;;  %576 = vmatpush3.bf16.msra.mxu1 %v584_v1 }
   0x8   :  { %539 = vmatprep.subr.bf16.mxu0 %v585_v2  ;;  %569 = vmatprep.subr.bf16.mxu1 %v585_v2 }
   0xb   :  { %540 = vmatpush3.bf16.msra.mxu0 %v585_v2  ;;  %577 = vmatpush3.bf16.msra.mxu1 %v585_v2 }
   0xc   :  { %541 = vmatprep.subr.bf16.mxu0 %v586_v3  ;;  %570 = vmatprep.subr.bf16.mxu1 %v586_v3 }
   0xf   :  { %542 = vmatpush3.bf16.msra.mxu0 %v586_v3  ;;  %578 = vmatpush3.bf16.msra.mxu1 %v586_v3 }
  0x10   :  { %543 = vmatprep.subr.bf16.mxu0 %v587_v6  ;;  %571 = vmatprep.subr.bf16.mxu1 %v587_v6 }
  0x13   :  { %544 = vmatpush3.bf16.msra.mxu0 %v587_v6  ;;  %579 = vmatpush3.bf16.msra.mxu1 %v587_v6 }
  0x14   :  { %545 = vmatprep.subr.bf16.mxu0 %v588_v7  ;;  %572 = vmatprep.subr.bf16.mxu1 %v588_v7 }
  0x17   :  { %546 = vmatpush3.bf16.msra.mxu0 %v588_v7  ;;  %580 = vmatpush3.bf16.msra.mxu1 %v588_v7 }
  0x18   :  { %547 = vmatprep.subr.bf16.mxu0 %v589_v8  ;;  %573 = vmatprep.subr.bf16.mxu1 %v589_v8 }
  0x1b   :  { %548 = vmatpush3.bf16.msra.mxu0 %v589_v8  ;;  %581 = vmatpush3.bf16.msra.mxu1 %v589_v8 }
  0x1c   :  { %549 = vmatprep.subr.bf16.mxu0 %v590_v9  ;;  %574 = vmatprep.subr.bf16.mxu1 %v590_v9 }
  0x1f   :  { %550 = vmatpush3.bf16.msra.mxu0 %v590_v9  ;;  %582 = vmatpush3.bf16.msra.mxu1 %v590_v9 }
  0x22   :  { %552 = vmatmul.mubr.bf16.vlgmr.msra.gmra.mxu0 %v593_v10  ;;  %560 = vmatmul.mubr.bf16.vlgmr.msra.gmra.mxu1 %v594_v11 }
  0x23   :  { %555 = vmatprep.mubr.bf16.mxu0 %v595_v12  ;;  %563 = vmatprep.mubr.bf16.mxu1 %v596_v13 }
  0x2a   :  { %556 = vmatmul.mubr.bf16.gmra.mxu0 %v597_v14  ;;  %564 = vmatmul.mubr.bf16.gmra.mxu1 %v598_v15 }
  0xe2   :  { %v553_v16 = vpop.f32.mrf.mxu0  ;;  %v561_v17 = vpop.f32.mrf.mxu1 }
  0xe3   :  { %v326_v22 = vmax.f32 %v553_v16, 0.0  ;;  %v334_v23 = vmax.f32 %v561_v17, 0.0 }
  0xe4   :  { %v210_v18 = vpop.f32.mrf.mxu0  ;;  %v242_v19 = vpop.f32.mrf.mxu1 }
  0xe5   :  { %v324_v26 = vmax.f32 %v210_v18, 0.0  ;;  %v332_v27 = vmax.f32 %v242_v19, 0.0 }
  0xe6   :  { %v554_v20 = vpop.f32.mrf.mxu0  ;;  %v562_v21 = vpop.f32.mrf.mxu1 }
  0xe7   :  { %v327_v24 = vmax.f32 %v554_v20, 0.0  ;;  %v335_v25 = vmax.f32 %v562_v21, 0.0 }
  0xe8   :  { %v213_v28 = vpop.f32.mrf.mxu0  ;;  %v245_v29 = vpop.f32.mrf.mxu1 }
  0xe9   :  { %v480_v30 = vpack.c.bf16 %v327_v24, %v326_v22  ;;  %v500_v31 = vpack.c.bf16 %v335_v25, %v334_v23  ;;  %v325_v32 = vmax.f32 %v213_v28, 0.0  ;;  %v333_v33 = vmax.f32 %v245_v29, 0.0 }
  0xea   :  { %v557_v34 = vpop.f32.mrf.mxu0  ;;  %v565_v35 = vpop.f32.mrf.mxu1 }
  0xeb   :  { %512 = vst [vmem:[%s688_s2 + $0x8] sm:$0xff] %v480_v30   ;;  %516 = vst [vmem:[%s688_s2 + $0x28] sm:$0xff] %v500_v31   ;;  %v475_v36 = vpack.c.bf16 %v325_v32, %v324_v26  ;;  %v495_v37 = vpack.c.bf16 %v333_v33, %v332_v27  ;;  %v330_v42 = vmax.f32 %v557_v34, 0.0  ;;  %v338_v43 = vmax.f32 %v565_v35, 0.0 }
  0xec   :  { %v226_v38 = vpop.f32.mrf.mxu0  ;;  %v258_v39 = vpop.f32.mrf.mxu1 }
  0xed   :  { %476 = vst [vmem:[%s688_s2] sm:$0xff] %v475_v36   ;;  %515 = vst [vmem:[%s688_s2 + $0x20] sm:$0xff] %v495_v37   ;;  %v328_v46 = vmax.f32 %v226_v38, 0.0  ;;  %v336_v47 = vmax.f32 %v258_v39, 0.0 }
  0xee   :  { %v558_v40 = vpop.f32.mrf.mxu0  ;;  %v566_v41 = vpop.f32.mrf.mxu1 }
  0xef   :  { %v331_v44 = vmax.f32 %v558_v40, 0.0  ;;  %v339_v45 = vmax.f32 %v566_v41, 0.0 }
  0xf0   :  { %v229_v48 = vpop.f32.mrf.mxu0  ;;  %v261_v49 = vpop.f32.mrf.mxu1 }
  0xf1   :  { %v490_v50 = vpack.c.bf16 %v331_v44, %v330_v42  ;;  %v510_v51 = vpack.c.bf16 %v339_v45, %v338_v43  ;;  %v329_v52 = vmax.f32 %v229_v48, 0.0  ;;  %v337_v53 = vmax.f32 %v261_v49, 0.0 }
  0xf3   :  { %514 = vst [vmem:[%s688_s2 + $0x18] sm:$0xff] %v490_v50   ;;  %518 = vst [vmem:[%s688_s2 + $0x38] sm:$0xff] %v510_v51   ;;  %v485_v54 = vpack.c.bf16 %v329_v52, %v328_v46  ;;  %v505_v55 = vpack.c.bf16 %v337_v53, %v336_v47 }
  0xf5   :  { %513 = vst [vmem:[%s688_s2 + $0x10] sm:$0xff] %v485_v54   ;;  %517 = vst [vmem:[%s688_s2 + $0x30] sm:$0xff] %v505_v55  }

// kernel: unet_block_innermost_forward.4
= control target key start
LH: loop header
LB: loop body
LE: loop exit
PB: predicated region body
PF: predicated region fallthrough
CT: control target
= control target key end

     0   :  { %v3633_v1 = vmov 0   ;;  %vm3091_vm0 = vcmask 1040384   ;;  %s4961_s1 = inlined_call_operand.vmem [shape: bf16[512,512], index: 1, kind: input, shape index: {}]   ;;  %s4962_s0 = inlined_call_operand.vmem [shape: bf16[168,512], index: 0, kind: input, shape index: {}]   ;;  %s4963_s2 = inlined_call_operand.vmem [shape: f32[168,4], index: 2, kind: input, shape index: {}]   ;;  %s4964_s3 = inlined_call_operand.vmem [shape: bf16[168,512], index: 3, kind: output, shape index: {0}]   ;;  %s4965_s4 = inlined_call_operand.vmem [shape: f32[1,2,128], index: 4, kind: output, shape index: {1}]  }
   0x1   :  { %v3377_v0 = vld [vmem:[%s4961_s1 + $0xe4] ss:$16 sps:$4 sm:$0xff]   ;;  %3363 = vset.pattern.permute.xlu1 %v3633_v1  ;;  %3362 = vset.pattern.permute.xlu0 %v3633_v1  ;;  %v3381_v3 = vld [vmem:[%s4961_s1 + $0xe0] ss:$16 sps:$4 sm:$0xff]   ;;  %v3820_v52 = vld [vmem:[%s4962_s0 + $0xc] ss:$16 sps:$4 sm:$0xff]  }
   0x2   :  { %v3379_v2 = vld [vmem:[%s4961_s1 + $0x2e4] ss:$16 sps:$4 sm:$0xff]   ;;  %1212 = vmatprep.subr.bf16.mxu0 %v3377_v0  ;;  %v3382_v4 = vld [vmem:[%s4961_s1 + $0x2e0] ss:$16 sps:$4 sm:$0xff]   ;;  %1385 = vmatprep.mubr.bf16.mxu1 %v3820_v52  ;;  %v3866_v1 = vld [vmem:[%s4963_s2 + $0x18] sm:$0xff] }
   0x3   :  { %1353 = vmatprep.subr.bf16.mxu1 %v3379_v2  ;;  %v3383_v5 = vld [vmem:[%s4961_s1 + $0xc4] ss:$16 sps:$4 sm:$0xff]   ;;  %1213 = vmatpush1.bf16.msra.mxu0 %v3381_v3  ;;  %v3387_v7 = vld [vmem:[%s4961_s1 + $0xc0] ss:$16 sps:$4 sm:$0xff]  }
   0x4   :  { %1354 = vmatpush1.bf16.msra.mxu1 %v3382_v4  ;;  %v3385_v6 = vld [vmem:[%s4961_s1 + $0x2c4] ss:$16 sps:$4 sm:$0xff]   ;;  %1214 = vmatprep.subr.bf16.mxu0 %v3383_v5  ;;  %v3388_v8 = vld [vmem:[%s4961_s1 + $0x2c0] ss:$16 sps:$4 sm:$0xff]  }
   0x5   :  { %1355 = vmatprep.subr.bf16.mxu1 %v3385_v6  ;;  %v3389_v9 = vld [vmem:[%s4961_s1 + $0xa4] ss:$16 sps:$4 sm:$0xff]   ;;  %v3393_v11 = vld [vmem:[%s4961_s1 + $0xa0] ss:$16 sps:$4 sm:$0xff]   ;;  %v3886_v6 = vld [vmem:[%s4962_s0 + $0x8] ss:$16 sps:$4 sm:$0xff]  }
   0x6   :  { %v3391_v10 = vld [vmem:[%s4961_s1 + $0x2a4] ss:$16 sps:$4 sm:$0xff]   ;;  %v3394_v12 = vld [vmem:[%s4961_s1 + $0x2a0] ss:$16 sps:$4 sm:$0xff]  }
   0x7   :  { %1215 = vmatpush1.bf16.msra.mxu0 %v3387_v7  ;;  %v3395_v13 = vld [vmem:[%s4961_s1 + $0x84] ss:$16 sps:$4 sm:$0xff]   ;;  %v3399_v15 = vld [vmem:[%s4961_s1 + $0x80] ss:$16 sps:$4 sm:$0xff]   ;;  %v3481_v7 = vld [vmem:[%s4961_s1 + $0xec] ss:$16 sps:$4 sm:$0xff]  }
   0x8   :  { %1356 = vmatpush1.bf16.msra.mxu1 %v3388_v8  ;;  %1216 = vmatprep.subr.bf16.mxu0 %v3389_v9  ;;  %v3397_v14 = vld [vmem:[%s4961_s1 + $0x284] ss:$16 sps:$4 sm:$0xff]   ;;  %v3400_v16 = vld [vmem:[%s4961_s1 + $0x280] ss:$16 sps:$4 sm:$0xff]   ;;  %v3484_v8 = vld [vmem:[%s4961_s1 + $0x2ec] ss:$16 sps:$4 sm:$0xff]  }
   0x9   :  { %1357 = vmatprep.subr.bf16.mxu1 %v3391_v10  ;;  %v3401_v17 = vld [vmem:[%s4961_s1 + $0x64] ss:$16 sps:$4 sm:$0xff]   ;;  %v3405_v19 = vld [vmem:[%s4961_s1 + $0x60] ss:$16 sps:$4 sm:$0xff]   ;;  %v3897_v9 = vld [vmem:[%s4963_s2 + $0x28] sm:$0xff] }
   0xa   :  { %v3403_v18 = vld [vmem:[%s4961_s1 + $0x264] ss:$16 sps:$4 sm:$0xff]   ;;  %v3406_v20 = vld [vmem:[%s4961_s1 + $0x260] ss:$16 sps:$4 sm:$0xff]   ;;  %v3479_v10 = vld [vmem:[%s4961_s1 + $0xe8] ss:$16 sps:$4 sm:$0xff]  }
   0xb   :  { %1217 = vmatpush1.bf16.msra.mxu0 %v3393_v11  ;;  %v3407_v21 = vld [vmem:[%s4961_s1 + $0x44] ss:$16 sps:$4 sm:$0xff]   ;;  %v3411_v23 = vld [vmem:[%s4961_s1 + $0x40] ss:$16 sps:$4 sm:$0xff]   ;;  %v3482_v11 = vld [vmem:[%s4961_s1 + $0x2e8] ss:$16 sps:$4 sm:$0xff]  }
   0xc   :  { %1358 = vmatpush1.bf16.msra.mxu1 %v3394_v12  ;;  %1218 = vmatprep.subr.bf16.mxu0 %v3395_v13  ;;  %v3409_v22 = vld [vmem:[%s4961_s1 + $0x244] ss:$16 sps:$4 sm:$0xff]   ;;  %v3412_v24 = vld [vmem:[%s4961_s1 + $0x240] ss:$16 sps:$4 sm:$0xff]   ;;  %v3487_v12 = vld [vmem:[%s4961_s1 + $0xcc] ss:$16 sps:$4 sm:$0xff]  }
   0xd   :  { %1359 = vmatprep.subr.bf16.mxu1 %v3397_v14  ;;  %v3413_v25 = vld [vmem:[%s4961_s1 + $0x24] ss:$16 sps:$4 sm:$0xff]   ;;  %v3417_v27 = vld [vmem:[%s4961_s1 + $0x20] ss:$16 sps:$4 sm:$0xff]   ;;  %v3490_v13 = vld [vmem:[%s4961_s1 + $0x2cc] ss:$16 sps:$4 sm:$0xff]  }
   0xe   :  { %v3415_v26 = vld [vmem:[%s4961_s1 + $0x224] ss:$16 sps:$4 sm:$0xff]   ;;  %v3418_v28 = vld [vmem:[%s4961_s1 + $0x220] ss:$16 sps:$4 sm:$0xff]  }
   0xf   :  { %1219 = vmatpush1.bf16.msra.mxu0 %v3399_v15  ;;  %v3419_v29 = vld [vmem:[%s4961_s1 + $0x4] ss:$16 sps:$4 sm:$0xff]   ;;  %v3423_v31 = vld [vmem:[%s4961_s1] ss:$16 sps:$4 sm:$0xff]   ;;  %v3920_v15 = vld [vmem:[%s4962_s0 + $0x2c] ss:$16 sps:$4 sm:$0xff]  }
  0x10   :  { %1360 = vmatpush1.bf16.msra.mxu1 %v3400_v16  ;;  %1220 = vmatprep.subr.bf16.mxu0 %v3401_v17  ;;  %v3421_v30 = vld [vmem:[%s4961_s1 + $0x204] ss:$16 sps:$4 sm:$0xff]   ;;  %v3424_v32 = vld [vmem:[%s4961_s1 + $0x200] ss:$16 sps:$4 sm:$0xff]   ;;  %v3485_v16 = vld [vmem:[%s4961_s1 + $0xc8] ss:$16 sps:$4 sm:$0xff]  }
  0x11   :  { %1361 = vmatprep.subr.bf16.mxu1 %v3403_v18  ;;  %v3425_v33 = vld [vmem:[%s4961_s1 + $0x1e4] ss:$16 sps:$4 sm:$0xff]   ;;  %v3429_v35 = vld [vmem:[%s4961_s1 + $0x1e0] ss:$16 sps:$4 sm:$0xff]   ;;  %v3488_v17 = vld [vmem:[%s4961_s1 + $0x2c8] ss:$16 sps:$4 sm:$0xff]  }
  0x12   :  { %v3427_v34 = vld [vmem:[%s4961_s1 + $0x3e4] ss:$16 sps:$4 sm:$0xff]   ;;  %v3430_v36 = vld [vmem:[%s4961_s1 + $0x3e0] ss:$16 sps:$4 sm:$0xff]   ;;  %v3933_v18 = vld [vmem:[%s4963_s2 + $0x38] sm:$0xff] }
  0x13   :  { %1221 = vmatpush1.bf16.msra.mxu0 %v3405_v19  ;;  %v3431_v37 = vld [vmem:[%s4961_s1 + $0x1c4] ss:$16 sps:$4 sm:$0xff]   ;;  %v3435_v39 = vld [vmem:[%s4961_s1 + $0x1c0] ss:$16 sps:$4 sm:$0xff]  }
  0x14   :  { %1362 = vmatpush1.bf16.msra.mxu1 %v3406_v20  ;;  %1222 = vmatprep.subr.bf16.mxu0 %v3407_v21  ;;  %v3433_v38 = vld [vmem:[%s4961_s1 + $0x3c4] ss:$16 sps:$4 sm:$0xff]   ;;  %v3436_v40 = vld [vmem:[%s4961_s1 + $0x3c0] ss:$16 sps:$4 sm:$0xff]   ;;  %v3499_v20 = vld [vmem:[%s4961_s1 + $0xac] ss:$16 sps:$4 sm:$0xff]  }
  0x15   :  { %1363 = vmatprep.subr.bf16.mxu1 %v3409_v22  ;;  %v3437_v41 = vld [vmem:[%s4961_s1 + $0x1a4] ss:$16 sps:$4 sm:$0xff]   ;;  %v3441_v43 = vld [vmem:[%s4961_s1 + $0x1a0] ss:$16 sps:$4 sm:$0xff]   ;;  %v3502_v21 = vld [vmem:[%s4961_s1 + $0x2ac] ss:$16 sps:$4 sm:$0xff]  }
  0x16   :  { %v3439_v42 = vld [vmem:[%s4961_s1 + $0x3a4] ss:$16 sps:$4 sm:$0xff]   ;;  %v3442_v44 = vld [vmem:[%s4961_s1 + $0x3a0] ss:$16 sps:$4 sm:$0xff]   ;;  %v3951_v22 = vld [vmem:[%s4962_s0 + $0x28] ss:$16 sps:$4 sm:$0xff]  }
  0x17   :  { %1223 = vmatpush1.bf16.msra.mxu0 %v3411_v23  ;;  %v3443_v45 = vld [vmem:[%s4961_s1 + $0x184] ss:$16 sps:$4 sm:$0xff]   ;;  %v3447_v47 = vld [vmem:[%s4961_s1 + $0x180] ss:$16 sps:$4 sm:$0xff]   ;;  %v3497_v23 = vld [vmem:[%s4961_s1 + $0xa8] ss:$16 sps:$4 sm:$0xff]  }
  0x18   :  { %1364 = vmatpush1.bf16.msra.mxu1 %v3412_v24  ;;  %1224 = vmatprep.subr.bf16.mxu0 %v3413_v25  ;;  %v3445_v46 = vld [vmem:[%s4961_s1 + $0x384] ss:$16 sps:$4 sm:$0xff]   ;;  %v3448_v48 = vld [vmem:[%s4961_s1 + $0x380] ss:$16 sps:$4 sm:$0xff]   ;;  %v3500_v24 = vld [vmem:[%s4961_s1 + $0x2a8] ss:$16 sps:$4 sm:$0xff]  }
  0x19   :  { %1365 = vmatprep.subr.bf16.mxu1 %v3415_v26  ;;  %v3449_v49 = vld [vmem:[%s4961_s1 + $0x164] ss:$16 sps:$4 sm:$0xff]   ;;  %v3453_v53 = vld [vmem:[%s4961_s1 + $0x160] ss:$16 sps:$4 sm:$0xff]   ;;  %v3968_v26 = vld [vmem:[%s4962_s0 + $0x4c] ss:$16 sps:$4 sm:$0xff]  }
  0x1a   :  { %v3812_v50 = vld [vmem:[%s4962_s0 + $0x4] ss:$16 sps:$4 sm:$0xff]   ;;  %v3454_v54 = vld [vmem:[%s4961_s1 + $0x360] ss:$16 sps:$4 sm:$0xff]  }
  0x1b   :  { %1225 = vmatpush1.bf16.msra.mxu0 %v3417_v27  ;;  %v3451_v51 = vld [vmem:[%s4961_s1 + $0x364] ss:$16 sps:$4 sm:$0xff]   ;;  %1244 = vmatprep.mubr.bf16.mxu0 %v3812_v50  ;;  %v3459_v57 = vld [vmem:[%s4961_s1 + $0x140] ss:$16 sps:$4 sm:$0xff]   ;;  %v3511_v27 = vld [vmem:[%s4961_s1 + $0x8c] ss:$16 sps:$4 sm:$0xff]  }
  0x1c   :  { %1366 = vmatpush1.bf16.msra.mxu1 %v3418_v28  ;;  %1226 = vmatprep.subr.bf16.mxu0 %v3419_v29  ;;  %v3455_v55 = vld [vmem:[%s4961_s1 + $0x144] ss:$16 sps:$4 sm:$0xff]   ;;  %v3460_v58 = vld [vmem:[%s4961_s1 + $0x340] ss:$16 sps:$4 sm:$0xff]   ;;  %v3514_v29 = vld [vmem:[%s4961_s1 + $0x28c] ss:$16 sps:$4 sm:$0xff]  }
  0x1d   :  { %1367 = vmatprep.subr.bf16.mxu1 %v3421_v30  ;;  %v3457_v56 = vld [vmem:[%s4961_s1 + $0x344] ss:$16 sps:$4 sm:$0xff]   ;;  %v3465_v62 = vld [vmem:[%s4961_s1 + $0x120] ss:$16 sps:$4 sm:$0xff]   ;;  %v3509_v30 = vld [vmem:[%s4961_s1 + $0x88] ss:$16 sps:$4 sm:$0xff]  }
  0x1e   :  { %v3461_v59 = vld [vmem:[%s4961_s1 + $0x124] ss:$16 sps:$4 sm:$0xff]   ;;  %v3466_v63 = vld [vmem:[%s4961_s1 + $0x320] ss:$16 sps:$4 sm:$0xff]  }
  0x1f   :  { %1227 = vmatpush1.bf16.msra.mxu0 %v3423_v31  ;;  %v3463_v60 = vld [vmem:[%s4961_s1 + $0x324] ss:$16 sps:$4 sm:$0xff]   ;;  %v3471_v3 = vld [vmem:[%s4961_s1 + $0x100] ss:$16 sps:$4 sm:$0xff]   ;;  %v3512_v31 = vld [vmem:[%s4961_s1 + $0x288] ss:$16 sps:$4 sm:$0xff]  }
  0x20   :  { %1368 = vmatpush1.bf16.msra.mxu1 %v3424_v32  ;;  %1228 = vmatprep.subr.bf16.mxu0 %v3425_v33  ;;  %v3851_v61 = vld [vmem:[%s4963_s2 + $0x10] sm:$0xff]  ;;  %v3976_v28 = vld [vmem:[%s4963_s2] sm:$0xff]  ;;  %v3993_v32 = vld [vmem:[%s4963_s2 + $0x48] sm:$0xff] }
  0x21   :  { %1369 = vmatprep.subr.bf16.mxu1 %v3427_v34  ;;  %2362 = vperm.xlu1 %3363, %v3851_v61   ;;  %v3467_v0 = vld [vmem:[%s4961_s1 + $0x104] ss:$16 sps:$4 sm:$0xff]   ;;  %v3472_v4 = vld [vmem:[%s4961_s1 + $0x300] ss:$16 sps:$4 sm:$0xff]   ;;  %v3517_v34 = vld [vmem:[%s4961_s1 + $0x6c] ss:$16 sps:$4 sm:$0xff]  }
  0x22   :  { %v3469_v2 = vld [vmem:[%s4961_s1 + $0x304] ss:$16 sps:$4 sm:$0xff]   ;;  %v3881_v5 = vld [vmem:[%s4962_s0] ss:$16 sps:$4 sm:$0xff]   ;;  %2352 = vperm.xlu0 %3362, %v3976_v28  }
  0x23   :  { %1229 = vmatpush2.bf16.msra.mxu0 %v3429_v35  ;;  %v3915_v14 = vld [vmem:[%s4962_s0 + $0x24] ss:$16 sps:$4 sm:$0xff]   ;;  %v3938_v19 = vld [vmem:[%s4962_s0 + $0x20] ss:$16 sps:$4 sm:$0xff]   ;;  %v3520_v35 = vld [vmem:[%s4961_s1 + $0x26c] ss:$16 sps:$4 sm:$0xff]  }
  0x24   :  { %1370 = vmatpush2.bf16.msra.mxu1 %v3430_v36  ;;  %1230 = vmatprep.subr.bf16.mxu0 %v3431_v37  ;;  %v3963_v25 = vld [vmem:[%s4962_s0 + $0x44] ss:$16 sps:$4 sm:$0xff]   ;;  %v4000_v33 = vld [vmem:[%s4962_s0 + $0x40] ss:$16 sps:$4 sm:$0xff]   ;;  %v4011_v36 = vld [vmem:[%s4963_s2 + $0x8] sm:$0xff] }
  0x25   :  { %1371 = vmatprep.subr.bf16.mxu1 %v3433_v38  ;;  %2367 = vperm.xlu1 %3363, %v3866_v1   ;;  %v4016_v37 = vld [vmem:[%s4962_s0 + $0x48] ss:$16 sps:$4 sm:$0xff]  }
  0x26   :  { %v3515_v38 = vld [vmem:[%s4961_s1 + $0x68] ss:$16 sps:$4 sm:$0xff]   ;;  %2357 = vperm.xlu0 %3362, %v4011_v36  }
  0x27   :  { %1231 = vmatpush2.bf16.msra.mxu0 %v3435_v39  ;;  %v4024_v39 = vld [vmem:[%s4962_s0 + $0x64] ss:$16 sps:$4 sm:$0xff]  }
  0x28   :  { %1372 = vmatpush2.bf16.msra.mxu1 %v3436_v40  ;;  %1232 = vmatprep.subr.bf16.mxu0 %v3437_v41  ;;  %v4031_v40 = vld [vmem:[%s4962_s0 + $0x6c] ss:$16 sps:$4 sm:$0xff]   ;;  %v3518_v41 = vld [vmem:[%s4961_s1 + $0x268] ss:$16 sps:$4 sm:$0xff]  }
  0x29   :  { %1373 = vmatprep.subr.bf16.mxu1 %v3439_v42  ;;  %2377 = vperm.xlu1 %3363, %v3897_v9   ;;  %v3529_v42 = vld [vmem:[%s4961_s1 + $0x4c] ss:$16 sps:$4 sm:$0xff]  }
  0x2b   :  { %1233 = vmatpush2.bf16.msra.mxu0 %v3441_v43  ;;  %v3532_v43 = vld [vmem:[%s4961_s1 + $0x24c] ss:$16 sps:$4 sm:$0xff]  }
  0x2c   :  { %1374 = vmatpush2.bf16.msra.mxu1 %v3442_v44  ;;  %1234 = vmatprep.subr.bf16.mxu0 %v3443_v45  ;;  %v4047_v44 = vld [vmem:[%s4963_s2 + $0x58] sm:$0xff]  ;;  %v4054_v45 = vld [vmem:[%s4963_s2 + $0x20] sm:$0xff] }
  0x2d   :  { %1375 = vmatprep.subr.bf16.mxu1 %v3445_v46  ;;  %2387 = vperm.xlu1 %3363, %v3933_v18   ;;  %v4059_v46 = vld [vmem:[%s4962_s0 + $0x60] ss:$16 sps:$4 sm:$0xff]  }
  0x2e   :  { %2372 = vperm.xlu0 %3362, %v4054_v45  }
  0x2f   :  { %1235 = vmatpush2.bf16.msra.mxu0 %v3447_v47  ;;  %v4064_v47 = vld [vmem:[%s4962_s0 + $0x68] ss:$16 sps:$4 sm:$0xff]  }
  0x30   :  { %1376 = vmatpush2.bf16.msra.mxu1 %v3448_v48  ;;  %1236 = vmatprep.subr.bf16.mxu0 %v3449_v49  ;;  %v3527_v48 = vld [vmem:[%s4961_s1 + $0x48] ss:$16 sps:$4 sm:$0xff]  }
  0x31   :  { %1377 = vmatprep.subr.bf16.mxu1 %v3451_v51  ;;  %2397 = vperm.xlu1 %3363, %v3993_v32   ;;  %v3530_v49 = vld [vmem:[%s4961_s1 + $0x248] ss:$16 sps:$4 sm:$0xff]   ;;  %v3541_v51 = vld [vmem:[%s4961_s1 + $0x2c] ss:$16 sps:$4 sm:$0xff]  }
  0x33   :  { %1237 = vmatpush2.bf16.msra.mxu0 %v3453_v53  ;;  %v3544_v53 = vld [vmem:[%s4961_s1 + $0x22c] ss:$16 sps:$4 sm:$0xff]  }
  0x34   :  { %1378 = vmatpush2.bf16.msra.mxu1 %v3454_v54  ;;  %1238 = vmatprep.subr.bf16.mxu0 %v3455_v55  ;;  %v4082_v54 = vld [vmem:[%s4962_s0 + $0x84] ss:$16 sps:$4 sm:$0xff]   ;;  %v4088_v55 = vld [vmem:[%s4962_s0 + $0x8c] ss:$16 sps:$4 sm:$0xff]  }
  0x35   :  { %1379 = vmatprep.subr.bf16.mxu1 %v3457_v56  ;;  %2407 = vperm.xlu1 %3363, %v4047_v44   ;;  %v3539_v56 = vld [vmem:[%s4961_s1 + $0x28] ss:$16 sps:$4 sm:$0xff]  }
  0x37   :  { %1239 = vmatpush2.bf16.msra.mxu0 %v3459_v57  ;;  %v3542_v57 = vld [vmem:[%s4961_s1 + $0x228] ss:$16 sps:$4 sm:$0xff]  }
  0x38   :  { %1380 = vmatpush2.bf16.msra.mxu1 %v3460_v58  ;;  %1240 = vmatprep.subr.bf16.mxu0 %v3461_v59  ;;  %v3551_v58 = vld [vmem:[%s4961_s1 + $0xc] ss:$16 sps:$4 sm:$0xff]  }
  0x39   :  { %1381 = vmatprep.subr.bf16.mxu1 %v3463_v60  ;;  %v4104_v59 = vld [vmem:[%s4963_s2 + $0x68] sm:$0xff] }
  0x3a   :  { %v3554_v60 = vld [vmem:[%s4961_s1 + $0x20c] ss:$16 sps:$4 sm:$0xff]   ;;  %2417 = vperm.xlu1 %3363, %v4104_v59  }
  0x3b   :  { %1241 = vmatpush2.bf16.msra.mxu0 %v3465_v62  ;;  %v3549_v62 = vld [vmem:[%s4961_s1 + $0x8] ss:$16 sps:$4 sm:$0xff]  }
  0x3c   :  { %1382 = vmatpush2.bf16.msra.mxu1 %v3466_v63  ;;  %1242 = vmatprep.subr.bf16.mxu0 %v3467_v0  ;;  %v4117_v63 = vld [vmem:[%s4963_s2 + $0x30] sm:$0xff] }
  0x3d   :  { %1383 = vmatprep.subr.bf16.mxu1 %v3469_v2  ;;  %v4122_v0 = vld [vmem:[%s4962_s0 + $0x80] ss:$16 sps:$4 sm:$0xff]   ;;  %v4127_v2 = vld [vmem:[%s4962_s0 + $0x88] ss:$16 sps:$4 sm:$0xff]   ;;  %2382 = vperm.xlu0 %3362, %v4117_v63  }
  0x3f   :  { %1243 = vmatpush2.bf16.msra.mxu0 %v3471_v3  ;;  %v3552_v3 = vld [vmem:[%s4961_s1 + $0x208] ss:$16 sps:$4 sm:$0xff]  }
  0x40   :  { %1384 = vmatpush2.bf16.msra.mxu1 %v3472_v4  ;;  %1494 = vmatprep.subr.bf16.mxu0 %v3481_v7  ;;  %v3559_v4 = vld [vmem:[%s4961_s1 + $0x1ec] ss:$16 sps:$4 sm:$0xff]  }
  0x41   :  { %1635 = vmatprep.subr.bf16.mxu1 %v3484_v8  ;;  %v4139_v7 = vld [vmem:[%s4963_s2 + $0x78] sm:$0xff]  ;;  %v4145_v8 = vld [vmem:[%s4962_s0 + $0xa4] ss:$16 sps:$4 sm:$0xff]  }
  0x42   :  { %1245 = vmatmul.mubr.bf16.vlgmr.msra.gmra.mxu0 %v3881_v5  ;;  %2427 = vperm.xlu1 %3363, %v4139_v7  }
  0x43   :  { %1386 = vmatmul.mubr.bf16.vlgmr.msra.gmra.mxu1 %v3886_v6  ;;  %1495 = vmatpush1.bf16.msra.mxu0 %v3479_v10  ;;  %v4150_v10 = vld [vmem:[%s4962_s0 + $0xac] ss:$16 sps:$4 sm:$0xff]  }
  0x44   :  { %1636 = vmatpush1.bf16.msra.mxu1 %v3482_v11  ;;  %1496 = vmatprep.subr.bf16.mxu0 %v3487_v12  ;;  %v3557_v11 = vld [vmem:[%s4961_s1 + $0x1e8] ss:$16 sps:$4 sm:$0xff]   ;;  %v3562_v12 = vld [vmem:[%s4961_s1 + $0x3ec] ss:$16 sps:$4 sm:$0xff]  }
  0x45   :  { %1637 = vmatprep.subr.bf16.mxu1 %v3490_v13  ;;  %1254 = vmatprep.mubr.bf16.mxu0 %v3915_v14  ;;  %v4162_v13 = vld [vmem:[%s4963_s2 + $0x88] sm:$0xff] }
  0x46   :  { %1395 = vmatprep.mubr.bf16.mxu1 %v3920_v15  ;;  %2437 = vperm.xlu1 %3363, %v4162_v13  }
  0x47   :  { %1497 = vmatpush1.bf16.msra.mxu0 %v3485_v16  ;;  %v3560_v16 = vld [vmem:[%s4961_s1 + $0x3e8] ss:$16 sps:$4 sm:$0xff]  }
  0x48   :  { %1638 = vmatpush1.bf16.msra.mxu1 %v3488_v17  ;;  %1498 = vmatprep.subr.bf16.mxu0 %v3499_v20  ;;  %v3571_v17 = vld [vmem:[%s4961_s1 + $0x1cc] ss:$16 sps:$4 sm:$0xff]   ;;  %v4177_v20 = vld [vmem:[%s4963_s2 + $0x40] sm:$0xff] }
  0x49   :  { %1639 = vmatprep.subr.bf16.mxu1 %v3502_v21  ;;  %v3574_v21 = vld [vmem:[%s4961_s1 + $0x3cc] ss:$16 sps:$4 sm:$0xff]   ;;  %2392 = vperm.xlu0 %3362, %v4177_v20  }
  0x4a   :  { %1255 = vmatmul.mubr.bf16.gmra.mxu0 %v3938_v19 }
  0x4b   :  { %1396 = vmatmul.mubr.bf16.gmra.mxu1 %v3951_v22  ;;  %1499 = vmatpush1.bf16.msra.mxu0 %v3497_v23  ;;  %v4185_v23 = vld [vmem:[%s4962_s0 + $0xa0] ss:$16 sps:$4 sm:$0xff]  }
  0x4c   :  { %1640 = vmatpush1.bf16.msra.mxu1 %v3500_v24  ;;  %1264 = vmatprep.mubr.bf16.mxu0 %v3963_v25  ;;  %v4190_v24 = vld [vmem:[%s4962_s0 + $0xa8] ss:$16 sps:$4 sm:$0xff]  }
  0x4d   :  { %1405 = vmatprep.mubr.bf16.mxu1 %v3968_v26  ;;  %1500 = vmatprep.subr.bf16.mxu0 %v3511_v27  ;;  %v3569_v27 = vld [vmem:[%s4961_s1 + $0x1c8] ss:$16 sps:$4 sm:$0xff]  }
  0x4e   :  { %1641 = vmatprep.subr.bf16.mxu1 %v3514_v29  ;;  %v3572_v29 = vld [vmem:[%s4961_s1 + $0x3c8] ss:$16 sps:$4 sm:$0xff]  }
  0x4f   :  { %1501 = vmatpush1.bf16.msra.mxu0 %v3509_v30  ;;  %v4202_v30 = vld [vmem:[%s4963_s2 + $0x98] sm:$0xff] }
  0x50   :  { %1642 = vmatpush1.bf16.msra.mxu1 %v3512_v31  ;;  %1502 = vmatprep.subr.bf16.mxu0 %v3517_v34  ;;  %v4208_v31 = vld [vmem:[%s4962_s0 + $0xc4] ss:$16 sps:$4 sm:$0xff]   ;;  %v4213_v34 = vld [vmem:[%s4962_s0 + $0xcc] ss:$16 sps:$4 sm:$0xff]  }
  0x51   :  { %1643 = vmatprep.subr.bf16.mxu1 %v3520_v35  ;;  %v4218_v35 = vld [vmem:[%s4963_s2 + $0x50] sm:$0xff]  ;;  %2447 = vperm.xlu1 %3363, %v4202_v30  }
  0x52   :  { %1265 = vmatmul.mubr.bf16.gmra.mxu0 %v4000_v33  ;;  %2402 = vperm.xlu0 %3362, %v4218_v35  }
  0x53   :  { %1406 = vmatmul.mubr.bf16.gmra.mxu1 %v4016_v37  ;;  %1274 = vmatprep.mubr.bf16.mxu0 %v4024_v39 }
  0x54   :  { %1415 = vmatprep.mubr.bf16.mxu1 %v4031_v40  ;;  %1503 = vmatpush1.bf16.msra.mxu0 %v3515_v38  ;;  %v3581_v38 = vld [vmem:[%s4961_s1 + $0x1ac] ss:$16 sps:$4 sm:$0xff]  }
  0x55   :  { %1644 = vmatpush1.bf16.msra.mxu1 %v3518_v41  ;;  %1504 = vmatprep.subr.bf16.mxu0 %v3529_v42  ;;  %v3584_v41 = vld [vmem:[%s4961_s1 + $0x3ac] ss:$16 sps:$4 sm:$0xff]   ;;  %v3579_v42 = vld [vmem:[%s4961_s1 + $0x1a8] ss:$16 sps:$4 sm:$0xff]  }
  0x56   :  { %1645 = vmatprep.subr.bf16.mxu1 %v3532_v43  ;;  %v3582_v43 = vld [vmem:[%s4961_s1 + $0x3a8] ss:$16 sps:$4 sm:$0xff]  }
  0x58   :  { %1505 = vmatpush1.bf16.msra.mxu0 %v3527_v48  ;;  %v3589_v48 = vld [vmem:[%s4961_s1 + $0x18c] ss:$16 sps:$4 sm:$0xff]  }
  0x59   :  { %1646 = vmatpush1.bf16.msra.mxu1 %v3530_v49  ;;  %1506 = vmatprep.subr.bf16.mxu0 %v3541_v51  ;;  %v3592_v49 = vld [vmem:[%s4961_s1 + $0x38c] ss:$16 sps:$4 sm:$0xff]   ;;  %v4247_v51 = vld [vmem:[%s4962_s0 + $0xc0] ss:$16 sps:$4 sm:$0xff]  }
  0x5a   :  { %1647 = vmatprep.subr.bf16.mxu1 %v3544_v53  ;;  %1275 = vmatmul.mubr.bf16.gmra.mxu0 %v4059_v46  ;;  %v4252_v53 = vld [vmem:[%s4962_s0 + $0xc8] ss:$16 sps:$4 sm:$0xff]  }
  0x5b   :  { %1416 = vmatmul.mubr.bf16.gmra.mxu1 %v4064_v47  ;;  %1284 = vmatprep.mubr.bf16.mxu0 %v4082_v54 }
  0x5c   :  { %1425 = vmatprep.mubr.bf16.mxu1 %v4088_v55  ;;  %1507 = vmatpush1.bf16.msra.mxu0 %v3539_v56  ;;  %v4966_v56 = vmov 1  }
  0x5d   :  { %1648 = vmatpush1.bf16.msra.mxu1 %v3542_v57  ;;  %1508 = vmatprep.subr.bf16.mxu0 %v3551_v58  ;;  %v4258_v57 = vld [vmem:[%s4963_s2 + $0x60] sm:$0xff] }
  0x5e   :  { %1649 = vmatprep.subr.bf16.mxu1 %v3554_v60  ;;  %3364 = vset.pattern.permute.xlu1 %v4966_v56  ;;  %v4264_v58 = vld [vmem:[%s4962_s0 + $0xe4] ss:$16 sps:$4 sm:$0xff]   ;;  %v4269_v60 = vld [vmem:[%s4962_s0 + $0xec] ss:$16 sps:$4 sm:$0xff]  }
  0x5f   :  { %2552 = vperm.xlu1 %3364, %v3976_v28   ;;  %2412 = vperm.xlu0 %3362, %v4258_v57   ;;  %v4375_v56 = vld [vmem:[%s4962_s0 + $0x124] ss:$16 sps:$4 sm:$0xff]  }
  0x60   :  { %1509 = vmatpush1.bf16.msra.mxu0 %v3549_v62  ;;  %v4275_v62 = vld [vmem:[%s4963_s2 + $0x70] sm:$0xff]  ;;  %4977 = vst [vmem:[#allocation7_spill] sm:$0xff] %v4375_v56 }
  0x61   :  { %1650 = vmatpush1.bf16.msra.mxu1 %v3552_v3  ;;  %1510 = vmatprep.subr.bf16.mxu0 %v3559_v4  ;;  %v3587_v3 = vld [vmem:[%s4961_s1 + $0x188] ss:$16 sps:$4 sm:$0xff]  }
  0x62   :  { %1285 = vmatmul.mubr.bf16.gmra.mxu0 %v4122_v0  ;;  %1651 = vmatprep.subr.bf16.mxu1 %v3562_v12  ;;  %v3590_v4 = vld [vmem:[%s4961_s1 + $0x388] ss:$16 sps:$4 sm:$0xff]   ;;  %v3604_v12 = vld [vmem:[%s4961_s1 + $0x36c] ss:$16 sps:$4 sm:$0xff]  }
  0x63   :  { %1426 = vmatmul.mubr.bf16.gmra.mxu1 %v4127_v2  ;;  %1294 = vmatprep.mubr.bf16.mxu0 %v4145_v8 }
  0x64   :  { %1435 = vmatprep.mubr.bf16.mxu1 %v4150_v10  ;;  %1511 = vmatpush2.bf16.msra.mxu0 %v3557_v11  ;;  %v3601_v11 = vld [vmem:[%s4961_s1 + $0x16c] ss:$16 sps:$4 sm:$0xff]  }
  0x65   :  { %1652 = vmatpush2.bf16.msra.mxu1 %v3560_v16  ;;  %1512 = vmatprep.subr.bf16.mxu0 %v3571_v17  ;;  %v4296_v16 = vld [vmem:[%s4963_s2 + $0x80] sm:$0xff]  ;;  %v3599_v17 = vld [vmem:[%s4961_s1 + $0x168] ss:$16 sps:$4 sm:$0xff]  }
  0x66   :  { %1653 = vmatprep.subr.bf16.mxu1 %v3574_v21  ;;  %2560 = vperm.xlu1 %3364, %v3851_v61   ;;  %v3602_v21 = vld [vmem:[%s4961_s1 + $0x368] ss:$16 sps:$4 sm:$0xff]  }
  0x67   :  { %2422 = vperm.xlu0 %3362, %v4275_v62  }
  0x68   :  { %1513 = vmatpush2.bf16.msra.mxu0 %v3569_v27  ;;  %v4309_v27 = vld [vmem:[%s4962_s0 + $0xe0] ss:$16 sps:$4 sm:$0xff]  }
  0x69   :  { %1654 = vmatpush2.bf16.msra.mxu1 %v3572_v29  ;;  %1514 = vmatprep.subr.bf16.mxu0 %v3581_v38  ;;  %v4314_v29 = vld [vmem:[%s4962_s0 + $0xe8] ss:$16 sps:$4 sm:$0xff]   ;;  %v4319_v38 = vld [vmem:[%s4962_s0 + $0x104] ss:$16 sps:$4 sm:$0xff]  }
  0x6a   :  { %1295 = vmatmul.mubr.bf16.gmra.mxu0 %v4185_v23  ;;  %1655 = vmatprep.subr.bf16.mxu1 %v3584_v41  ;;  %4973 = vst [vmem:[#allocation3_spill] sm:$0xff] %v4319_v38  ;;  %v4324_v41 = vld [vmem:[%s4962_s0 + $0x10c] ss:$16 sps:$4 sm:$0xff]  }
  0x6b   :  { %1436 = vmatmul.mubr.bf16.gmra.mxu1 %v4190_v24  ;;  %1304 = vmatprep.mubr.bf16.mxu0 %v4208_v31  ;;  %4974 = vst [vmem:[#allocation4_spill] sm:$0xff] %v4324_v41 }
  0x6c   :  { %1445 = vmatprep.mubr.bf16.mxu1 %v4213_v34  ;;  %1515 = vmatpush2.bf16.msra.mxu0 %v3579_v42  ;;  %v4331_v42 = vld [vmem:[%s4963_s2 + $0x90] sm:$0xff] }
  0x6d   :  { %1656 = vmatpush2.bf16.msra.mxu1 %v3582_v43  ;;  %1516 = vmatprep.subr.bf16.mxu0 %v3589_v48  ;;  %v3613_v43 = vld [vmem:[%s4961_s1 + $0x14c] ss:$16 sps:$4 sm:$0xff]  }
  0x6e   :  { %1657 = vmatprep.subr.bf16.mxu1 %v3592_v49  ;;  %2564 = vperm.xlu1 %3364, %v3866_v1   ;;  %v3616_v48 = vld [vmem:[%s4961_s1 + $0x34c] ss:$16 sps:$4 sm:$0xff]   ;;  %v3611_v49 = vld [vmem:[%s4961_s1 + $0x148] ss:$16 sps:$4 sm:$0xff]  }
  0x6f   :  { %2432 = vperm.xlu0 %3362, %v4296_v16  }
  0x70   :  { %1517 = vmatpush2.bf16.msra.mxu0 %v3587_v3  ;;  %v3614_v3 = vld [vmem:[%s4961_s1 + $0x348] ss:$16 sps:$4 sm:$0xff]  }
  0x71   :  { %1658 = vmatpush2.bf16.msra.mxu1 %v3590_v4  ;;  %1518 = vmatprep.subr.bf16.mxu0 %v3601_v11  ;;  %v3619_v4 = vld [vmem:[%s4961_s1 + $0x12c] ss:$16 sps:$4 sm:$0xff]  }
  0x72   :  { %1305 = vmatmul.mubr.bf16.gmra.mxu0 %v4247_v51  ;;  %1659 = vmatprep.subr.bf16.mxu1 %v3604_v12  ;;  %v3622_v11 = vld [vmem:[%s4961_s1 + $0x32c] ss:$16 sps:$4 sm:$0xff]   ;;  %v4360_v12 = vld [vmem:[%s4963_s2 + $0xa0] sm:$0xff] }
  0x73   :  { %1446 = vmatmul.mubr.bf16.gmra.mxu1 %v4252_v53  ;;  %1314 = vmatprep.mubr.bf16.mxu0 %v4264_v58 }
  0x74   :  { %1455 = vmatprep.mubr.bf16.mxu1 %v4269_v60  ;;  %1519 = vmatpush2.bf16.msra.mxu0 %v3599_v17  ;;  %v4365_v17 = vld [vmem:[%s4962_s0 + $0x100] ss:$16 sps:$4 sm:$0xff]  }
  0x75   :  { %1660 = vmatpush2.bf16.msra.mxu1 %v3602_v21  ;;  %2572 = vperm.xlu1 %3364, %v3897_v9   ;;  %4975 = vst [vmem:[#allocation5_spill] sm:$0xff] %v4365_v17  ;;  %v4370_v21 = vld [vmem:[%s4962_s0 + $0x108] ss:$16 sps:$4 sm:$0xff]  }
  0x76   :  { %2442 = vperm.xlu0 %3362, %v4331_v42   ;;  %1520 = vmatprep.subr.bf16.mxu0 %v3613_v43  ;;  %4976 = vst [vmem:[#allocation6_spill] sm:$0xff] %v4370_v21  ;;  %v4380_v43 = vld [vmem:[%s4962_s0 + $0x12c] ss:$16 sps:$4 sm:$0xff]  }
  0x77   :  { %1661 = vmatprep.subr.bf16.mxu1 %v3616_v48  ;;  %4978 = vst [vmem:[#allocation8_spill] sm:$0xff] %v4380_v43  ;;  %v3617_v48 = vld [vmem:[%s4961_s1 + $0x128] ss:$16 sps:$4 sm:$0xff]  }
  0x78   :  { %1521 = vmatpush2.bf16.msra.mxu0 %v3611_v49  ;;  %v3620_v49 = vld [vmem:[%s4961_s1 + $0x328] ss:$16 sps:$4 sm:$0xff]  }
  0x79   :  { %1662 = vmatpush2.bf16.msra.mxu1 %v3614_v3  ;;  %1522 = vmatprep.subr.bf16.mxu0 %v3619_v4  ;;  %v3629_v3 = vld [vmem:[%s4961_s1 + $0x10c] ss:$16 sps:$4 sm:$0xff]  }
  0x7a   :  { %1315 = vmatmul.mubr.bf16.gmra.mxu0 %v4309_v27  ;;  %1663 = vmatprep.subr.bf16.mxu1 %v3622_v11  ;;  %v3632_v4 = vld [vmem:[%s4961_s1 + $0x30c] ss:$16 sps:$4 sm:$0xff]   ;;  %v4979_v11 = vmov 1  }
  0x7b   :  { %1456 = vmatmul.mubr.bf16.gmra.mxu1 %v4314_v29  ;;  %1324 = vmatprep.mubr.bf16.mxu0 %v4319_v38 }
  0x7c   :  { %1465 = vmatprep.mubr.bf16.mxu1 %v4324_v41  ;;  %2580 = vperm.xlu1 %3364, %v3933_v18  }
  0x7d   :  { %2452 = vperm.xlu0 %3362, %v4360_v12   ;;  %1523 = vmatpush2.bf16.msra.mxu0 %v3617_v48  ;;  %v3630_v48 = vld [vmem:[%s4961_s1 + $0x308] ss:$16 sps:$4 sm:$0xff]  }
  0x7e   :  { %1664 = vmatpush2.bf16.msra.mxu1 %v3620_v49  ;;  %1524 = vmatprep.subr.bf16.mxu0 %v3629_v3 }
  0x7f   :  { %1665 = vmatprep.subr.bf16.mxu1 %v3632_v4 }
  0x80   :  { %2588 = vperm.xlu1 %3364, %v3993_v32  }
  0x81   :  { %3365 = vset.pattern.permute.xlu0 %v4979_v11  ;;  %v4420_v11 = vld [vmem:[%s4962_s0 + $0x128] ss:$16 sps:$4 sm:$0xff]  }
  0x82   :  { %1325 = vmatmul.mubr.bf16.gmra.mxu0 %v4365_v17  ;;  %v229_v17 = vld [vmem:[%s4962_s0 + $0x148] sm:$0xff]  ;;  %2556 = vperm.xlu0 %3365, %v4011_v36  }
  0x83   :  { %1466 = vmatmul.mubr.bf16.gmra.mxu1 %v4370_v21  ;;  %1334 = vmatprep.mubr.bf16.mxu0 %v4375_v56  ;;  %v228_v21 = vld [vmem:[%s4962_s0 + $0x140] sm:$0xff]  ;;  %v4424_v38 = vcombine.high %v229_v17, %v229_v17  ;;  %v4439_v3 = vcombine.low %v229_v17, %v229_v17  ;;  %v3635_v17 = vmov 2  }
  0x84   :  { %1475 = vmatprep.mubr.bf16.mxu1 %v4380_v43  ;;  %v3627_v43 = vld [vmem:[%s4961_s1 + $0x108] ss:$16 sps:$4 sm:$0xff]   ;;  %v4415_v56 = vld [vmem:[%s4962_s0 + $0x120] ss:$16 sps:$4 sm:$0xff]   ;;  %v4422_v41 = vcombine.high %v228_v21, %v228_v21  ;;  %2596 = vperm.xlu1 %3364, %v4047_v44   ;;  %v4437_v49 = vcombine.low %v228_v21, %v228_v21 }
  0x85   :  { %1525 = vmatpush2.bf16.msra.mxu0 %v3627_v43  ;;  %1666 = vmatpush2.bf16.msra.mxu1 %v3630_v48 }
  0x86   :  { %2568 = vperm.xlu0 %3365, %v4054_v45  }
  0x88   :  { %2604 = vperm.xlu1 %3364, %v4104_v59  }
  0x8a   :  { %1335 = vmatmul.mubr.bf16.gmra.mxu0 %v4415_v56  ;;  %2576 = vperm.xlu0 %3365, %v4117_v63  }
  0x8b   :  { %1476 = vmatmul.mubr.bf16.gmra.mxu1 %v4420_v11  ;;  %1344 = vmatprep.mubr.bf16.mxu0 %v4422_v41 }
  0x8c   :  { %1485 = vmatprep.mubr.bf16.mxu1 %v4424_v38  ;;  %2612 = vperm.xlu1 %3364, %v4139_v7  }
  0x8e   :  { %2584 = vperm.xlu0 %3365, %v4177_v20  }
  0x90   :  { %2620 = vperm.xlu1 %3364, %v4162_v13  }
  0x92   :  { %1345 = vmatmul.mubr.bf16.gmra.mxu0 %v4437_v49  ;;  %2592 = vperm.xlu0 %3365, %v4218_v35  }
  0x93   :  { %1486 = vmatmul.mubr.bf16.gmra.mxu1 %v4439_v3  ;;  %1526 = vmatprep.mubr.bf16.mxu0 %v3812_v50  ;;  %v3636_v50 = vmov 3  }
  0x94   :  { %1667 = vmatprep.mubr.bf16.mxu1 %v3820_v52  ;;  %2628 = vperm.xlu1 %3364, %v4202_v30  }
  0x96   :  { %2600 = vperm.xlu0 %3365, %v4258_v57  }
  0x98   :  { %3366 = vset.pattern.permute.xlu1 %v3635_v17 }
  0x99   :  { %2732 = vperm.xlu1 %3366, %v3976_v28  }
  0x9a   :  { %1527 = vmatmul.mubr.bf16.vlgmr.msra.gmra.mxu0 %v3881_v5  ;;  %2608 = vperm.xlu0 %3365, %v4275_v62  }
  0x9b   :  { %1668 = vmatmul.mubr.bf16.vlgmr.msra.gmra.mxu1 %v3886_v6  ;;  %1536 = vmatprep.mubr.bf16.mxu0 %v3915_v14 }
  0x9c   :  { %1677 = vmatprep.mubr.bf16.mxu1 %v3920_v15  ;;  %v4480_v52 = vpop.permute.xlu1 %2362 }
  0x9d   :  { %2740 = vperm.xlu1 %3366, %v3851_v61  }
  0x9e   :  { %2616 = vperm.xlu0 %3365, %v4296_v16  }
  0xa0   :  { %v4488_v5 = vpop.permute.xlu1 %2367 }
  0xa1   :  { %2744 = vperm.xlu1 %3366, %v3866_v1  }
  0xa2   :  { %1537 = vmatmul.mubr.bf16.gmra.mxu0 %v3938_v19  ;;  %2624 = vperm.xlu0 %3365, %v4331_v42   ;;  %v4981_v19 = vld [vmem:[#allocation4_spill] sm:$0xff] }
  0xa3   :  { %1678 = vmatmul.mubr.bf16.gmra.mxu1 %v3951_v22  ;;  %1546 = vmatprep.mubr.bf16.mxu0 %v3963_v25 }
  0xa4   :  { %1687 = vmatprep.mubr.bf16.mxu1 %v3968_v26  ;;  %v4982_v26 = vld [vmem:[#allocation5_spill] sm:$0xff] }
  0xa5   :  { %2752 = vperm.xlu1 %3366, %v3897_v9  }
  0xa6   :  { %2632 = vperm.xlu0 %3365, %v4360_v12  }
  0xa9   :  { %2760 = vperm.xlu1 %3366, %v3933_v18  }
  0xaa   :  { %1547 = vmatmul.mubr.bf16.gmra.mxu0 %v4000_v33  ;;  %3367 = vset.pattern.permute.xlu0 %v3636_v50  ;;  %v4985_v33 = vld [vmem:[#allocation8_spill] sm:$0xff] }
  0xab   :  { %1688 = vmatmul.mubr.bf16.gmra.mxu1 %v4016_v37  ;;  %1556 = vmatprep.mubr.bf16.mxu0 %v4024_v39 }
  0xac   :  { %1697 = vmatprep.mubr.bf16.mxu1 %v4031_v40  ;;  %2912 = vperm.xlu0 %3367, %v3976_v28   ;;  %v4983_v28 = vld [vmem:[#allocation6_spill] sm:$0xff] }
  0xad   :  { %2768 = vperm.xlu1 %3366, %v3993_v32  }
  0xb0   :  { %2924 = vperm.xlu0 %3367, %v3866_v1   ;;  %v4494_v1 = vpop.permute.xlu1 %2377 }
  0xb1   :  { %2776 = vperm.xlu1 %3366, %v4047_v44  }
  0xb2   :  { %1557 = vmatmul.mubr.bf16.gmra.mxu0 %v4059_v46 }
  0xb3   :  { %1698 = vmatmul.mubr.bf16.gmra.mxu1 %v4064_v47  ;;  %1566 = vmatprep.mubr.bf16.mxu0 %v4082_v54 }
  0xb4   :  { %1707 = vmatprep.mubr.bf16.mxu1 %v4088_v55  ;;  %2932 = vperm.xlu0 %3367, %v3897_v9   ;;  %v4504_v6 = vpop.permute.xlu1 %2387 }
  0xb5   :  { %3368 = vset.pattern.permute.xlu1 %v3636_v50 }
  0xb6   :  { %2916 = vperm.xlu1 %3368, %v4011_v36  }
  0xb8   :  { %2940 = vperm.xlu0 %3367, %v3933_v18   ;;  %v4514_v9 = vpop.permute.xlu1 %2397  ;;  %v4980_v18 = vld [vmem:[#allocation3_spill] sm:$0xff] }
  0xba   :  { %1567 = vmatmul.mubr.bf16.gmra.mxu0 %v4122_v0  ;;  %2920 = vperm.xlu1 %3368, %v3851_v61   ;;  %v4508_v61 = vpop.permute.xlu0 %2352 }
  0xbb   :  { %1708 = vmatmul.mubr.bf16.gmra.mxu1 %v4127_v2  ;;  %1576 = vmatprep.mubr.bf16.mxu0 %v4145_v8 }
  0xbc   :  { %1717 = vmatprep.mubr.bf16.mxu1 %v4150_v10  ;;  %2948 = vperm.xlu0 %3367, %v3993_v32   ;;  %v4525_v15 = vpop.permute.xlu1 %2407  ;;  %v4984_v32 = vld [vmem:[#allocation7_spill] sm:$0xff] }
  0xbe   :  { %2928 = vperm.xlu1 %3368, %v4054_v45   ;;  %v4519_v14 = vpop.permute.xlu0 %2357 }
  0xc0   :  { %2960 = vperm.xlu0 %3367, %v4258_v57   ;;  %v4533_v25 = vpop.permute.xlu1 %2417 }
  0xc2   :  { %1577 = vmatmul.mubr.bf16.gmra.mxu0 %v4185_v23  ;;  %2936 = vperm.xlu1 %3368, %v4117_v63   ;;  %v4530_v22 = vpop.permute.xlu0 %2372 }
  0xc3   :  { %1718 = vmatmul.mubr.bf16.gmra.mxu1 %v4190_v24  ;;  %1586 = vmatprep.mubr.bf16.mxu0 %v4208_v31 }
  0xc4   :  { %1727 = vmatprep.mubr.bf16.mxu1 %v4213_v34  ;;  %2972 = vperm.xlu0 %3367, %v4139_v7   ;;  %v4544_v37 = vpop.permute.xlu1 %2427 }
  0xc6   :  { %2944 = vperm.xlu1 %3368, %v4177_v20  }
  0xc8   :  { %3372 = vset.pattern.permute.xlu0 %v3635_v17  ;;  %v4548_v39 = vpop.permute.xlu1 %2437 }
  0xc9   :  { %2736 = vperm.xlu0 %3372, %v4011_v36   ;;  %v4542_v36 = vpop.permute.xlu0 %2382 }
  0xca   :  { %1587 = vmatmul.mubr.bf16.gmra.mxu0 %v4247_v51  ;;  %2952 = vperm.xlu1 %3368, %v4218_v35  }
  0xcb   :  { %1728 = vmatmul.mubr.bf16.gmra.mxu1 %v4252_v53  ;;  %1596 = vmatprep.mubr.bf16.mxu0 %v4264_v58 }
  0xcc   :  { %1737 = vmatprep.mubr.bf16.mxu1 %v4269_v60 }
  0xcd   :  { %2748 = vperm.xlu0 %3372, %v4054_v45   ;;  %v4550_v40 = vpop.permute.xlu0 %2392 }
  0xce   :  { %2956 = vperm.xlu1 %3368, %v4047_v44   ;;  %v4558_v44 = vpop.permute.xlu1 %2447 }
  0xd1   :  { %2756 = vperm.xlu0 %3372, %v4117_v63   ;;  %v4562_v45 = vpop.permute.xlu0 %2402 }
  0xd2   :  { %1597 = vmatmul.mubr.bf16.gmra.mxu0 %v4309_v27  ;;  %3369 = vset.pattern.permute.xlu1 %v3635_v17 }
  0xd3   :  { %1738 = vmatmul.mubr.bf16.gmra.mxu1 %v4314_v29  ;;  %1606 = vmatprep.mubr.bf16.mxu0 %v4980_v18 }
  0xd4   :  { %1747 = vmatprep.mubr.bf16.mxu1 %v4981_v19  ;;  %2784 = vperm.xlu1 %3369, %v4104_v59  }
  0xd5   :  { %2764 = vperm.xlu0 %3372, %v4177_v20  }
  0xd8   :  { %2788 = vperm.xlu1 %3369, %v4275_v62  }
  0xd9   :  { %2772 = vperm.xlu0 %3372, %v4218_v35  }
  0xda   :  { %1607 = vmatmul.mubr.bf16.gmra.mxu0 %v4982_v26  ;;  %v2553_v46 = vpop.permute.xlu1 %2552  ;;  %v4568_v47 = vpop.permute.xlu0 %2412 }
  0xdb   :  { %1748 = vmatmul.mubr.bf16.gmra.mxu1 %v4983_v28  ;;  %1616 = vmatprep.mubr.bf16.mxu0 %v4984_v32 }
  0xdc   :  { %1757 = vmatprep.mubr.bf16.mxu1 %v4985_v33  ;;  %3370 = vset.pattern.permute.xlu1 %v3636_v50 }
  0xdd   :  { %2780 = vperm.xlu0 %3372, %v4258_v57   ;;  %2964 = vperm.xlu1 %3370, %v4104_v59  }
  0xe1   :  { %2792 = vperm.xlu0 %3372, %v4139_v7   ;;  %2968 = vperm.xlu1 %3370, %v4275_v62   ;;  %v2561_v54 = vpop.permute.xlu1 %2560 }
  0xe2   :  { %1617 = vmatmul.mubr.bf16.gmra.mxu0 %v4415_v56  ;;  %v4574_v55 = vpop.permute.xlu0 %2422 }
  0xe3   :  { %1758 = vmatmul.mubr.bf16.gmra.mxu1 %v4420_v11  ;;  %1626 = vmatprep.mubr.bf16.mxu0 %v4422_v41 }
  0xe4   :  { %1767 = vmatprep.mubr.bf16.mxu1 %v4424_v38 }
  0xe5   :  { %2804 = vperm.xlu0 %3372, %v4331_v42   ;;  %3371 = vset.pattern.permute.xlu1 %v3635_v17 }
  0xe6   :  { %2796 = vperm.xlu1 %3371, %v4296_v16  }
  0xe9   :  { %3375 = vset.pattern.permute.xlu0 %v3636_v50  ;;  %v4578_v59 = vpop.permute.xlu1 %2564 }
  0xea   :  { %1627 = vmatmul.mubr.bf16.gmra.mxu0 %v4437_v49  ;;  %2984 = vperm.xlu0 %3375, %v4331_v42   ;;  %v4580_v63 = vpop.permute.xlu0 %2432 }
  0xeb   :  { %1768 = vmatmul.mubr.bf16.gmra.mxu1 %v4439_v3  ;;  %2800 = vperm.xlu1 %3371, %v4162_v13  }
  0xee   :  { %2992 = vperm.xlu0 %3375, %v4360_v12  }
  0xef   :  { %3373 = vset.pattern.permute.xlu1 %v3636_v50 }
  0xf0   :  { %2976 = vperm.xlu1 %3373, %v4296_v16   ;;  %v4584_v0 = vpop.permute.xlu1 %2572 }
  0xf1   :  { %v4589_v7 = vpop.permute.xlu0 %2442 }
  0xf4   :  { %2980 = vperm.xlu1 %3373, %v4162_v13  }
  0xf7   :  { %v4587_v2 = vpop.permute.xlu1 %2580 }
  0xf8   :  { %3374 = vset.pattern.permute.xlu1 %v3635_v17  ;;  %v4595_v10 = vpop.permute.xlu0 %2452 }
  0xf9   :  { %2808 = vperm.xlu1 %3374, %v4202_v30  }
  0xfb   :  { %v4592_v8 = vpop.permute.xlu1 %2588 }
  0xfd   :  { %2812 = vperm.xlu1 %3374, %v4360_v12   ;;  %v2557_v62 = vpop.permute.xlu0 %2556 }
  0xff   :  { %v4597_v31 = vpop.permute.xlu1 %2596 }
 0x101   :  { %3376 = vset.pattern.permute.xlu1 %v3636_v50 }
 0x102   :  { %v1246_v20 = vpop.f32.mrf.mxu0  ;;  %2988 = vperm.xlu1 %3376, %v4202_v30  }
 0x103   :  { %v1387_v23 = vpop.f32.mrf.mxu1  ;;  %v4601_v16 = vpop.permute.xlu1 %2604 }
 0x104   :  { %v1388_v24 = vadd.f32 %v1387_v23, %v1246_v20  ;;  %v1248_v13 = vpop.f32.mrf.mxu0 }
 0x105   :  { %v1389_v34 = vpop.f32.mrf.mxu1 }
 0x106   :  { %v2455_v35 = vmul.f32 %v4508_v61, %v1388_v24  ;;  %v1390_v51 = vadd.f32 %v1389_v34, %v1248_v13  ;;  %v1250_v53 = vpop.f32.mrf.mxu0 }
 0x107   :  { %v1391_v56 = vpop.f32.mrf.mxu1  ;;  %v4609_v49 = vpop.permute.xlu1 %2612 }
 0x108   :  { %v3316_v57 = vpack.c.bf16 %v1390_v51, %v1388_v24  ;;  %v2635_v58 = vmul.f32 %v2553_v46, %v1390_v51  ;;  %v1392_v60 = vadd.f32 %v1391_v56, %v1250_v53  ;;  %v1252_v27 = vpop.f32.mrf.mxu0  ;;  %v2503_v42 = vmul.f32 %v2455_v35, %v2455_v35 }
 0x109   :  { %v1393_v29 = vpop.f32.mrf.mxu1 }
 0x10a   :  { %2287 = vst [vmem:[%s4964_s3] sm:$0xff] %v3316_v57  ;;  %v2456_v38 = vmul.f32 %v4519_v14, %v1392_v60  ;;  %v1394_v41 = vadd.f32 %v1393_v29, %v1252_v27  ;;  %v1256_v12 = vpop.f32.mrf.mxu0  ;;  %v2683_v3 = vmul.f32 %v2635_v58, %v2635_v58 }
 0x10b   :  { %v1397_v21 = vpop.f32.mrf.mxu1 }
 0x10c   :  { %v2476_v43 = vadd.f32 %v2456_v38, %v2455_v35  ;;  %v2504_v4 = vmul.f32 %v2456_v38, %v2456_v38  ;;  %v3318_v11 = vpack.c.bf16 %v1394_v41, %v1392_v60  ;;  %v2636_v48 = vmul.f32 %v2557_v62, %v1394_v41  ;;  %v1258_v50 = vpop.f32.mrf.mxu0  ;;  %v2569_v41 = vpop.permute.xlu0 %2568 }
 0x10d   :  { %v1398_v17 = vadd.f32 %v1397_v21, %v1256_v12  ;;  %v1399_v30 = vpop.f32.mrf.mxu1 }
 0x10e   :  { %v2524_v61 = vadd.f32 %v2504_v4, %v2503_v42  ;;  %2289 = vst [vmem:[%s4964_s3 + $0x10] sm:$0xff] %v3318_v11  ;;  %v2656_v14 = vadd.f32 %v2636_v48, %v2635_v58  ;;  %v2684_v18 = vmul.f32 %v2636_v48, %v2636_v48  ;;  %v1400_v19 = vadd.f32 %v1399_v30, %v1258_v50  ;;  %v1260_v28 = vpop.f32.mrf.mxu0 }
 0x10f   :  { %v2457_v26 = vmul.f32 %v4480_v52, %v1398_v17  ;;  %v1401_v32 = vpop.f32.mrf.mxu1  ;;  %v4619_v52 = vpop.permute.xlu1 %2620 }
 0x110   :  { %v2704_v33 = vadd.f32 %v2684_v18, %v2683_v3  ;;  %v3320_v46 = vpack.c.bf16 %v1400_v19, %v1398_v17  ;;  %v2637_v20 = vmul.f32 %v2561_v54, %v1400_v19  ;;  %v1402_v23 = vadd.f32 %v1401_v32, %v1260_v28  ;;  %v1262_v34 = vpop.f32.mrf.mxu0 }
 0x111   :  { %v2477_v24 = vadd.f32 %v2476_v43, %v2457_v26  ;;  %v2505_v13 = vmul.f32 %v2457_v26, %v2457_v26  ;;  %v1403_v35 = vpop.f32.mrf.mxu1 }
 0x112   :  { %2291 = vst [vmem:[%s4964_s3 + $0x20] sm:$0xff] %v3320_v46  ;;  %v2657_v51 = vadd.f32 %v2656_v14, %v2637_v20  ;;  %v2685_v53 = vmul.f32 %v2637_v20, %v2637_v20  ;;  %v2458_v56 = vmul.f32 %v4488_v5, %v1402_v23  ;;  %v1404_v57 = vadd.f32 %v1403_v35, %v1262_v34  ;;  %v1266_v60 = vpop.f32.mrf.mxu0 }
 0x113   :  { %v2525_v58 = vadd.f32 %v2524_v61, %v2505_v13  ;;  %v1407_v62 = vpop.f32.mrf.mxu1  ;;  %v4626_v18 = vpop.permute.xlu1 %2628 }
 0x114   :  { %v2705_v54 = vadd.f32 %v2704_v33, %v2685_v53  ;;  %v2478_v27 = vadd.f32 %v2477_v24, %v2458_v56  ;;  %v2506_v29 = vmul.f32 %v2458_v56, %v2458_v56  ;;  %v3322_v38 = vpack.c.bf16 %v1404_v57, %v1402_v23  ;;  %v1268_v21 = vpop.f32.mrf.mxu0  ;;  %v2577_v56 = vpop.permute.xlu0 %2576 }
 0x115   :  { %v2638_v42 = vmul.f32 %v4578_v59, %v1404_v57  ;;  %v1408_v12 = vadd.f32 %v1407_v62, %v1266_v60  ;;  %v1409_v43 = vpop.f32.mrf.mxu1 }
 0x116   :  { %v2526_v4 = vadd.f32 %v2525_v58, %v2506_v29  ;;  %2293 = vst [vmem:[%s4964_s3 + $0x30] sm:$0xff] %v3322_v38  ;;  %v1410_v5 = vadd.f32 %v1409_v43, %v1268_v21  ;;  %v1270_v17 = vpop.f32.mrf.mxu0 }
 0x117   :  { %v2686_v11 = vmul.f32 %v2638_v42, %v2638_v42  ;;  %v2459_v48 = vmul.f32 %v4530_v22, %v1408_v12  ;;  %v2658_v3 = vadd.f32 %v2657_v51, %v2638_v42  ;;  %v1411_v50 = vpop.f32.mrf.mxu1  ;;  %v4632_v57 = vpop.permute.xlu1 %2732 }
 0x118   :  { %v3324_v30 = vpack.c.bf16 %v1410_v5, %v1408_v12  ;;  %v2639_v61 = vmul.f32 %v2569_v41, %v1410_v5  ;;  %v1412_v14 = vadd.f32 %v1411_v50, %v1270_v17  ;;  %v1272_v28 = vpop.f32.mrf.mxu0 }
 0x119   :  { %v2479_v59 = vadd.f32 %v2478_v27, %v2459_v48  ;;  %v2507_v19 = vmul.f32 %v2459_v48, %v2459_v48  ;;  %v2706_v26 = vadd.f32 %v2705_v54, %v2686_v11  ;;  %v1413_v32 = vpop.f32.mrf.mxu1 }
 0x11a   :  { %2295 = vst [vmem:[%s4964_s3 + $0x40] sm:$0xff] %v3324_v30  ;;  %v2659_v33 = vadd.f32 %v2658_v3, %v2639_v61  ;;  %v2687_v46 = vmul.f32 %v2639_v61, %v2639_v61  ;;  %v2460_v22 = vmul.f32 %v4494_v1, %v1412_v14  ;;  %v1414_v20 = vadd.f32 %v1413_v32, %v1272_v28  ;;  %v1276_v24 = vpop.f32.mrf.mxu0 }
 0x11b   :  { %v2527_v23 = vadd.f32 %v2526_v4, %v2507_v19  ;;  %v1417_v13 = vpop.f32.mrf.mxu1  ;;  %v4643_v61 = vpop.permute.xlu1 %2740 }
 0x11c   :  { %v2707_v34 = vadd.f32 %v2706_v26, %v2687_v46  ;;  %v2480_v35 = vadd.f32 %v2479_v59, %v2460_v22  ;;  %v2508_v51 = vmul.f32 %v2460_v22, %v2460_v22  ;;  %v3326_v53 = vpack.c.bf16 %v1414_v20, %v1412_v14  ;;  %v1278_v62 = vpop.f32.mrf.mxu0  ;;  %v2585_v46 = vpop.permute.xlu0 %2584 }
 0x11d   :  { %v2640_v58 = vmul.f32 %v4584_v0, %v1414_v20  ;;  %v1418_v60 = vadd.f32 %v1417_v13, %v1276_v24  ;;  %v1419_v54 = vpop.f32.mrf.mxu1 }
 0x11e   :  { %v2528_v27 = vadd.f32 %v2527_v23, %v2508_v51  ;;  %2297 = vst [vmem:[%s4964_s3 + $0x50] sm:$0xff] %v3326_v53  ;;  %v1420_v1 = vadd.f32 %v1419_v54, %v1278_v62  ;;  %v1280_v42 = vpop.f32.mrf.mxu0 }
 0x11f   :  { %v2688_v29 = vmul.f32 %v2640_v58, %v2640_v58  ;;  %v2461_v38 = vmul.f32 %v4542_v36, %v1418_v60  ;;  %v2660_v41 = vadd.f32 %v2659_v33, %v2640_v58  ;;  %v1421_v12 = vpop.f32.mrf.mxu1  ;;  %v4650_v54 = vpop.permute.xlu1 %2744 }
 0x120   :  { %v3328_v21 = vpack.c.bf16 %v1420_v1, %v1418_v60  ;;  %v2641_v43 = vmul.f32 %v2577_v56, %v1420_v1  ;;  %v1422_v4 = vadd.f32 %v1421_v12, %v1280_v42  ;;  %v1282_v48 = vpop.f32.mrf.mxu0 }
 0x121   :  { %v2481_v5 = vadd.f32 %v2480_v35, %v2461_v38  ;;  %v2509_v0 = vmul.f32 %v2461_v38, %v2461_v38  ;;  %v2708_v11 = vadd.f32 %v2707_v34, %v2688_v29  ;;  %v1423_v3 = vpop.f32.mrf.mxu1 }
 0x122   :  { %2299 = vst [vmem:[%s4964_s3 + $0x60] sm:$0xff] %v3328_v21  ;;  %v2661_v17 = vadd.f32 %v2660_v41, %v2641_v43  ;;  %v2689_v50 = vmul.f32 %v2641_v43, %v2641_v43  ;;  %v2462_v30 = vmul.f32 %v4504_v6, %v1422_v4  ;;  %v1424_v36 = vadd.f32 %v1423_v3, %v1282_v48  ;;  %v1286_v59 = vpop.f32.mrf.mxu0  ;;  %v2593_v3 = vpop.permute.xlu0 %2592 }
 0x123   :  { %v2529_v14 = vadd.f32 %v2528_v27, %v2509_v0  ;;  %v1427_v19 = vpop.f32.mrf.mxu1 }
 0x124   :  { %v2709_v26 = vadd.f32 %v2708_v11, %v2689_v50  ;;  %v2482_v28 = vadd.f32 %v2481_v5, %v2462_v30  ;;  %v2510_v32 = vmul.f32 %v2462_v30, %v2462_v30  ;;  %v3330_v33 = vpack.c.bf16 %v1424_v36, %v1422_v4  ;;  %v1288_v23 = vpop.f32.mrf.mxu0 }
 0x125   :  { %v2642_v22 = vmul.f32 %v4587_v2, %v1424_v36  ;;  %v1428_v20 = vadd.f32 %v1427_v19, %v1286_v59  ;;  %v1429_v24 = vpop.f32.mrf.mxu1  ;;  %v4660_v59 = vpop.permute.xlu1 %2752 }
 0x126   :  { %v2530_v13 = vadd.f32 %v2529_v14, %v2510_v32  ;;  %2301 = vst [vmem:[%s4964_s3 + $0x70] sm:$0xff] %v3330_v33  ;;  %v1430_v6 = vadd.f32 %v1429_v24, %v1288_v23  ;;  %v1290_v53 = vpop.f32.mrf.mxu0 }
 0x127   :  { %v2690_v34 = vmul.f32 %v2642_v22, %v2642_v22  ;;  %v2463_v35 = vmul.f32 %v4550_v40, %v1428_v20  ;;  %v2662_v51 = vadd.f32 %v2661_v17, %v2642_v22  ;;  %v1431_v56 = vpop.f32.mrf.mxu1 }
 0x128   :  { %v3332_v58 = vpack.c.bf16 %v1430_v6, %v1428_v20  ;;  %v2643_v60 = vmul.f32 %v2585_v46, %v1430_v6  ;;  %v1432_v62 = vadd.f32 %v1431_v56, %v1290_v53  ;;  %v1292_v29 = vpop.f32.mrf.mxu0  ;;  %v2601_v53 = vpop.permute.xlu0 %2600 }
 0x129   :  { %v2483_v2 = vadd.f32 %v2482_v28, %v2463_v35  ;;  %v2511_v27 = vmul.f32 %v2463_v35, %v2463_v35  ;;  %v2710_v1 = vadd.f32 %v2709_v26, %v2690_v34  ;;  %v1433_v38 = vpop.f32.mrf.mxu1 }
 0x12a   :  { %2303 = vst [vmem:[%s4964_s3 + $0x80] sm:$0xff] %v3332_v58  ;;  %v2663_v41 = vadd.f32 %v2662_v51, %v2643_v60  ;;  %v2691_v42 = vmul.f32 %v2643_v60, %v2643_v60  ;;  %v2464_v40 = vmul.f32 %v4514_v9, %v1432_v62  ;;  %v1434_v12 = vadd.f32 %v1433_v38, %v1292_v29  ;;  %v1296_v43 = vpop.f32.mrf.mxu0  ;;  %v4667_v29 = vpop.permute.xlu1 %2760 }
 0x12b   :  { %v2531_v21 = vadd.f32 %v2530_v13, %v2511_v27  ;;  %v1437_v4 = vpop.f32.mrf.mxu1 }
 0x12c   :  { %v2711_v5 = vadd.f32 %v2710_v1, %v2691_v42  ;;  %v2484_v0 = vadd.f32 %v2483_v2, %v2464_v40  ;;  %v2512_v11 = vmul.f32 %v2464_v40, %v2464_v40  ;;  %v3334_v48 = vpack.c.bf16 %v1434_v12, %v1432_v62  ;;  %v1298_v30 = vpop.f32.mrf.mxu0 }
 0x12d   :  { %v2644_v17 = vmul.f32 %v4592_v8, %v1434_v12  ;;  %v1438_v50 = vadd.f32 %v1437_v4, %v1296_v43  ;;  %v1439_v36 = vpop.f32.mrf.mxu1 }
 0x12e   :  { %v2532_v14 = vadd.f32 %v2531_v21, %v2512_v11  ;;  %2305 = vst [vmem:[%s4964_s3 + $0x90] sm:$0xff] %v3334_v48  ;;  %v1440_v9 = vadd.f32 %v1439_v36, %v1298_v30  ;;  %v1300_v32 = vpop.f32.mrf.mxu0  ;;  %v2609_v11 = vpop.permute.xlu0 %2608 }
 0x12f   :  { %v2664_v19 = vadd.f32 %v2663_v41, %v2644_v17  ;;  %v2692_v26 = vmul.f32 %v2644_v17, %v2644_v17  ;;  %v2465_v28 = vmul.f32 %v4562_v45, %v1438_v50  ;;  %v1441_v33 = vpop.f32.mrf.mxu1 }
 0x130   :  { %v3336_v46 = vpack.c.bf16 %v1440_v9, %v1438_v50  ;;  %v2645_v22 = vmul.f32 %v2593_v3, %v1440_v9  ;;  %v1442_v8 = vadd.f32 %v1441_v33, %v1300_v32  ;;  %v1302_v13 = vpop.f32.mrf.mxu0 }
 0x131   :  { %v2712_v20 = vadd.f32 %v2711_v5, %v2692_v26  ;;  %v2485_v23 = vadd.f32 %v2484_v0, %v2465_v28  ;;  %v2513_v24 = vmul.f32 %v2465_v28, %v2465_v28  ;;  %v1443_v6 = vpop.f32.mrf.mxu1  ;;  %v4678_v28 = vpop.permute.xlu1 %2768 }
 0x132   :  { %2307 = vst [vmem:[%s4964_s3 + $0xa0] sm:$0xff] %v3336_v46  ;;  %v2665_v34 = vadd.f32 %v2664_v19, %v2645_v22  ;;  %v2693_v35 = vmul.f32 %v2645_v22, %v2645_v22  ;;  %v2466_v51 = vmul.f32 %v4525_v15, %v1442_v8  ;;  %v1444_v45 = vadd.f32 %v1443_v6, %v1302_v13  ;;  %v1306_v58 = vpop.f32.mrf.mxu0 }
 0x133   :  { %v2533_v56 = vadd.f32 %v2532_v14, %v2513_v24  ;;  %v1447_v60 = vpop.f32.mrf.mxu1 }
 0x134   :  { %v2713_v62 = vadd.f32 %v2712_v20, %v2693_v35  ;;  %v2486_v2 = vadd.f32 %v2485_v23, %v2466_v51  ;;  %v2514_v27 = vmul.f32 %v2466_v51, %v2466_v51  ;;  %v3338_v1 = vpack.c.bf16 %v1444_v45, %v1442_v8  ;;  %v1308_v42 = vpop.f32.mrf.mxu0  ;;  %v2617_v51 = vpop.permute.xlu0 %2616 }
 0x135   :  { %v2646_v38 = vmul.f32 %v4597_v31, %v1444_v45  ;;  %v1448_v41 = vadd.f32 %v1447_v60, %v1306_v58  ;;  %v1449_v40 = vpop.f32.mrf.mxu1 }
 0x136   :  { %v2534_v12 = vadd.f32 %v2533_v56, %v2514_v27  ;;  %2309 = vst [vmem:[%s4964_s3 + $0xb0] sm:$0xff] %v3338_v1  ;;  %v1450_v15 = vadd.f32 %v1449_v40, %v1308_v42  ;;  %v1310_v5 = vpop.f32.mrf.mxu0 }
 0x137   :  { %v2666_v21 = vadd.f32 %v2665_v34, %v2646_v38  ;;  %v2694_v43 = vmul.f32 %v2646_v38, %v2646_v38  ;;  %v2467_v4 = vmul.f32 %v4568_v47, %v1448_v41  ;;  %v1451_v0 = vpop.f32.mrf.mxu1 }
 0x138   :  { %v3340_v48 = vpack.c.bf16 %v1450_v15, %v1448_v41  ;;  %v2647_v3 = vmul.f32 %v2601_v53, %v1450_v15  ;;  %v1452_v17 = vadd.f32 %v1451_v0, %v1310_v5  ;;  %v1312_v36 = vpop.f32.mrf.mxu0  ;;  %v2625_v0 = vpop.permute.xlu0 %2624 }
 0x139   :  { %v2714_v31 = vadd.f32 %v2713_v62, %v2694_v43  ;;  %v2487_v50 = vadd.f32 %v2486_v2, %v2467_v4  ;;  %v2515_v30 = vmul.f32 %v2467_v4, %v2467_v4  ;;  %v1453_v14 = vpop.f32.mrf.mxu1 }
 0x13a   :  { %2311 = vst [vmem:[%s4964_s3 + $0xc0] sm:$0xff] %v3340_v48  ;;  %v2667_v9 = vadd.f32 %v2666_v21, %v2647_v3  ;;  %v2695_v19 = vmul.f32 %v2647_v3, %v2647_v3  ;;  %v2468_v26 = vmul.f32 %v4533_v25, %v1452_v17  ;;  %v1454_v47 = vadd.f32 %v1453_v14, %v1312_v36  ;;  %v1316_v33 = vpop.f32.mrf.mxu0 }
 0x13b   :  { %v2535_v32 = vadd.f32 %v2534_v12, %v2515_v30  ;;  %v1457_v46 = vpop.f32.mrf.mxu1 }
 0x13c   :  { %v2715_v22 = vadd.f32 %v2714_v31, %v2695_v19  ;;  %v2488_v8 = vadd.f32 %v2487_v50, %v2468_v26  ;;  %v2516_v20 = vmul.f32 %v2468_v26, %v2468_v26  ;;  %v3342_v23 = vpack.c.bf16 %v1454_v47, %v1452_v17  ;;  %v1318_v6 = vpop.f32.mrf.mxu0 }
 0x13d   :  { %v2648_v24 = vmul.f32 %v4601_v16, %v1454_v47  ;;  %v1458_v13 = vadd.f32 %v1457_v46, %v1316_v33  ;;  %v1459_v34 = vpop.f32.mrf.mxu1  ;;  %v4685_v16 = vpop.permute.xlu1 %2776 }
 0x13e   :  { %v2536_v35 = vadd.f32 %v2535_v32, %v2516_v20  ;;  %2313 = vst [vmem:[%s4964_s3 + $0xd0] sm:$0xff] %v3342_v23  ;;  %v1460_v25 = vadd.f32 %v1459_v34, %v1318_v6  ;;  %v1320_v58 = vpop.f32.mrf.mxu0  ;;  %v2633_v6 = vpop.permute.xlu0 %2632 }
 0x13f   :  { %v2668_v53 = vadd.f32 %v2667_v9, %v2648_v24  ;;  %v2696_v45 = vmul.f32 %v2648_v24, %v2648_v24  ;;  %v2469_v56 = vmul.f32 %v4574_v55, %v1458_v13  ;;  %v1461_v60 = vpop.f32.mrf.mxu1 }
 0x140   :  { %v3344_v62 = vpack.c.bf16 %v1460_v25, %v1458_v13  ;;  %v2649_v2 = vmul.f32 %v2609_v11, %v1460_v25  ;;  %v1462_v27 = vadd.f32 %v1461_v60, %v1320_v58  ;;  %v1322_v42 = vpop.f32.mrf.mxu0 }
 0x141   :  { %v2716_v1 = vadd.f32 %v2715_v22, %v2696_v45  ;;  %v2489_v38 = vadd.f32 %v2488_v8, %v2469_v56  ;;  %v2517_v41 = vmul.f32 %v2469_v56, %v2469_v56  ;;  %v1463_v40 = vpop.f32.mrf.mxu1  ;;  %v4695_v9 = vpop.permute.xlu1 %2916 }
 0x142   :  { %2315 = vst [vmem:[%s4964_s3 + $0xe0] sm:$0xff] %v3344_v62  ;;  %v2669_v12 = vadd.f32 %v2668_v53, %v2649_v2  ;;  %v2697_v15 = vmul.f32 %v2649_v2, %v2649_v2  ;;  %v2470_v55 = vmul.f32 %v4544_v37, %v1462_v27  ;;  %v1464_v21 = vadd.f32 %v1463_v40, %v1322_v42  ;;  %v1326_v4 = vpop.f32.mrf.mxu0 }
 0x143   :  { %v2537_v43 = vadd.f32 %v2536_v35, %v2517_v41  ;;  %v1467_v5 = vpop.f32.mrf.mxu1 }
 0x144   :  { %v2717_v11 = vadd.f32 %v2716_v1, %v2697_v15  ;;  %v2490_v48 = vadd.f32 %v2489_v38, %v2470_v55  ;;  %v2518_v3 = vmul.f32 %v2470_v55, %v2470_v55  ;;  %v3346_v17 = vpack.c.bf16 %v1464_v21, %v1462_v27  ;;  %v1328_v30 = vpop.f32.mrf.mxu0 }
 0x145   :  { %v2650_v31 = vmul.f32 %v4609_v49, %v1464_v21  ;;  %v1468_v50 = vadd.f32 %v1467_v5, %v1326_v4  ;;  %v1469_v36 = vpop.f32.mrf.mxu1  ;;  %v4702_v2 = vpop.permute.xlu1 %2920 }
 0x146   :  { %v2538_v14 = vadd.f32 %v2537_v43, %v2518_v3  ;;  %2317 = vst [vmem:[%s4964_s3 + $0xf0] sm:$0xff] %v3346_v17  ;;  %v1470_v37 = vadd.f32 %v1469_v36, %v1328_v30  ;;  %v1330_v32 = vpop.f32.mrf.mxu0  ;;  %v4709_v43 = vpop.permute.xlu0 %2912 }
 0x147   :  { %v2670_v19 = vadd.f32 %v2669_v12, %v2650_v31  ;;  %v2698_v26 = vmul.f32 %v2650_v31, %v2650_v31  ;;  %v2471_v47 = vmul.f32 %v4580_v63, %v1468_v50  ;;  %v1471_v33 = vpop.f32.mrf.mxu1 }
 0x148   :  { %v3348_v46 = vpack.c.bf16 %v1470_v37, %v1468_v50  ;;  %v2651_v22 = vmul.f32 %v2617_v51, %v1470_v37  ;;  %v1472_v49 = vadd.f32 %v1471_v33, %v1330_v32  ;;  %v1332_v24 = vpop.f32.mrf.mxu0 }
 0x149   :  { %v2718_v8 = vadd.f32 %v2717_v11, %v2698_v26  ;;  %v2491_v20 = vadd.f32 %v2490_v48, %v2471_v47  ;;  %v2519_v23 = vmul.f32 %v2471_v47, %v2471_v47  ;;  %v1473_v13 = vpop.f32.mrf.mxu1 }
 0x14a   :  { %2319 = vst [vmem:[%s4964_s3 + $0x100] sm:$0xff] %v3348_v46  ;;  %v2671_v34 = vadd.f32 %v2670_v19, %v2651_v22  ;;  %v2699_v35 = vmul.f32 %v2651_v22, %v2651_v22  ;;  %v2472_v25 = vmul.f32 %v4548_v39, %v1472_v49  ;;  %v1474_v63 = vadd.f32 %v1473_v13, %v1332_v24  ;;  %v1336_v45 = vpop.f32.mrf.mxu0 }
 0x14b   :  { %v2539_v53 = vadd.f32 %v2538_v14, %v2519_v23  ;;  %v1477_v56 = vpop.f32.mrf.mxu1  ;;  %v4715_v14 = vpop.permute.xlu1 %2928 }
 0x14c   :  { %v2719_v51 = vadd.f32 %v2718_v8, %v2699_v35  ;;  %v2492_v58 = vadd.f32 %v2491_v20, %v2472_v25  ;;  %v2520_v60 = vmul.f32 %v2472_v25, %v2472_v25  ;;  %v3350_v62 = vpack.c.bf16 %v1474_v63, %v1472_v49  ;;  %v1338_v38 = vpop.f32.mrf.mxu0  ;;  %v4718_v20 = vpop.permute.xlu0 %2924 }
 0x14d   :  { %v2652_v27 = vmul.f32 %v4619_v52, %v1474_v63  ;;  %v1478_v1 = vadd.f32 %v1477_v56, %v1336_v45  ;;  %v1479_v41 = vpop.f32.mrf.mxu1 }
 0x14e   :  { %v2540_v42 = vadd.f32 %v2539_v53, %v2520_v60  ;;  %2321 = vst [vmem:[%s4964_s3 + $0x110] sm:$0xff] %v3350_v62  ;;  %v1480_v39 = vadd.f32 %v1479_v41, %v1338_v38  ;;  %v1340_v55 = vpop.f32.mrf.mxu0 }
 0x14f   :  { %v2672_v40 = vadd.f32 %v2671_v34, %v2652_v27  ;;  %v2700_v12 = vmul.f32 %v2652_v27, %v2652_v27  ;;  %v2473_v15 = vmul.f32 %v4589_v7, %v1478_v1  ;;  %v1481_v21 = vpop.f32.mrf.mxu1 }
 0x150   :  { %v3352_v4 = vpack.c.bf16 %v1480_v39, %v1478_v1  ;;  %v2653_v5 = vmul.f32 %v2625_v0, %v1480_v39  ;;  %v1482_v52 = vadd.f32 %v1481_v21, %v1340_v55  ;;  %v1342_v17 = vpop.f32.mrf.mxu0 }
 0x151   :  { %v2720_v11 = vadd.f32 %v2719_v51, %v2700_v12  ;;  %v2493_v48 = vadd.f32 %v2492_v58, %v2473_v15  ;;  %v2521_v3 = vmul.f32 %v2473_v15, %v2473_v15  ;;  %v1483_v31 = vpop.f32.mrf.mxu1 }
 0x152   :  { %2323 = vst [vmem:[%s4964_s3 + $0x120] sm:$0xff] %v3352_v4  ;;  %v2673_v50 = vadd.f32 %v2672_v40, %v2653_v5  ;;  %v2701_v30 = vmul.f32 %v2653_v5, %v2653_v5  ;;  %v2474_v7 = vmul.f32 %v4558_v44, %v1482_v52  ;;  %v1484_v36 = vadd.f32 %v1483_v31, %v1342_v17  ;;  %v1346_v19 = vpop.f32.mrf.mxu0 }
 0x153   :  { %v2541_v37 = vadd.f32 %v2540_v42, %v2521_v3  ;;  %v1487_v0 = vpop.f32.mrf.mxu1  ;;  %v4729_v42 = vpop.permute.xlu0 %2932 }
 0x154   :  { %v2721_v26 = vadd.f32 %v2720_v11, %v2701_v30  ;;  %v2494_v47 = vadd.f32 %v2493_v48, %v2474_v7  ;;  %v2522_v32 = vmul.f32 %v2474_v7, %v2474_v7  ;;  %v3354_v33 = vpack.c.bf16 %v1484_v36, %v1482_v52  ;;  %v1348_v49 = vpop.f32.mrf.mxu0 }
 0x155   :  { %v2654_v46 = vmul.f32 %v4626_v18, %v1484_v36  ;;  %v1488_v22 = vadd.f32 %v1487_v0, %v1346_v19  ;;  %v1489_v8 = vpop.f32.mrf.mxu1  ;;  %v4724_v18 = vpop.permute.xlu1 %2936 }
 0x156   :  { %v2542_v23 = vadd.f32 %v2541_v37, %v2522_v32  ;;  %2325 = vst [vmem:[%s4964_s3 + $0x130] sm:$0xff] %v3354_v33  ;;  %v1490_v44 = vadd.f32 %v1489_v8, %v1348_v49  ;;  %v1350_v35 = vpop.f32.mrf.mxu0 }
 0x157   :  { %v2674_v24 = vadd.f32 %v2673_v50, %v2654_v46  ;;  %v2702_v13 = vmul.f32 %v2654_v46, %v2654_v46  ;;  %v2475_v34 = vmul.f32 %v4595_v10, %v1488_v22  ;;  %v1491_v25 = vpop.f32.mrf.mxu1 }
 0x158   :  { %v3356_v63 = vpack.c.bf16 %v1490_v44, %v1488_v22  ;;  %v2655_v53 = vmul.f32 %v2633_v6, %v1490_v44  ;;  %v1351_v58 = vpop.f32.mrf.mxu0 }
 0x159   :  { %v2722_v45 = vadd.f32 %v2721_v26, %v2702_v13  ;;  %v2495_v56 = vadd.f32 %v2494_v47, %v2475_v34  ;;  %v2523_v51 = vmul.f32 %v2475_v34, %v2475_v34  ;;  %v1492_v60 = vpop.f32.mrf.mxu1  ;;  %v4733_v52 = vpop.permute.xlu1 %2944 }
 0x15a   :  { %2327 = vst [vmem:[%s4964_s3 + $0x140] sm:$0xff] %v3356_v63  ;;  %v2675_v62 = vadd.f32 %v2674_v24, %v2655_v53  ;;  %v2703_v27 = vmul.f32 %v2655_v53, %v2655_v53  ;;  %v1528_v10 = vpop.f32.mrf.mxu0  ;;  %v4739_v26 = vpop.permute.xlu0 %2940 }
 0x15b   :  { %v2496_v1 = vrot.slane %v2495_v56, 4  ;;  %v2543_v38 = vadd.f32 %v2542_v23, %v2523_v51  ;;  %v1669_v41 = vpop.f32.mrf.mxu1 }
 0x15c   :  { %v2676_v6 = vrot.slane %v2675_v62, 4  ;;  %v2723_v39 = vadd.f32 %v2722_v45, %v2703_v27  ;;  %v1530_v15 = vpop.f32.mrf.mxu0  ;;  %v4731_v5 = vadd.f32 %v1669_v41, %v1528_v10 }
 0x15d   :  { %v2497_v40 = vadd.f32 %v2496_v1, %v2495_v56  ;;  %v2544_v12 = vrot.slane %v2543_v38, 4  ;;  %v1671_v55 = vpop.f32.mrf.mxu1  ;;  %v4748_v13 = vpop.permute.xlu1 %2952 }
 0x15e   :  { %v2677_v21 = vadd.f32 %v2676_v6, %v2675_v62  ;;  %v2724_v4 = vrot.slane %v2723_v39, 4  ;;  %v4735_v11 = vadd.f32 %v1671_v55, %v1530_v15  ;;  %v1532_v17 = vpop.f32.mrf.mxu0  ;;  %v4759_v1 = vpop.permute.xlu0 %2948 }
 0x15f   :  { %v2498_v48 = vrot.slane %v2497_v40, 2  ;;  %v2545_v3 = vadd.f32 %v2544_v12, %v2543_v38  ;;  %v1673_v31 = vpop.f32.mrf.mxu1 }
 0x160   :  { %v2678_v50 = vrot.slane %v2677_v21, 2  ;;  %v2725_v30 = vadd.f32 %v2724_v4, %v2723_v39  ;;  %v3317_v7 = vpack.c.bf16 %v4735_v11, %v4731_v5  ;;  %v1534_v19 = vpop.f32.mrf.mxu0  ;;  %v4744_v33 = vadd.f32 %v1673_v31, %v1532_v17 }
 0x161   :  { %v2499_v36 = vadd.f32 %v2498_v48, %v2497_v40  ;;  %v2546_v37 = vrot.slane %v2545_v3, 2  ;;  %v1675_v0 = vpop.f32.mrf.mxu1  ;;  %v4767_v12 = vpop.permute.xlu1 %2956 }
 0x162   :  { %v2679_v47 = vadd.f32 %v2678_v50, %v2677_v21  ;;  %v2726_v32 = vrot.slane %v2725_v30, 2  ;;  %2288 = vst [vmem:[%s4964_s3 + $0x8] sm:$0xff] %v3317_v7  ;;  %v4746_v46 = vadd.f32 %v1675_v0, %v1534_v19  ;;  %v1538_v8 = vpop.f32.mrf.mxu0  ;;  %v4778_v31 = vpop.permute.xlu0 %2960 }
 0x163   :  { %v2500_v22 = vrot.slane %v2499_v36, 1  ;;  %v2547_v49 = vadd.f32 %v2546_v37, %v2545_v3  ;;  %v1679_v23 = vpop.f32.mrf.mxu1 }
 0x164   :  { %v2680_v44 = vrot.slane %v2679_v47, 1  ;;  %v2727_v24 = vadd.f32 %v2726_v32, %v2725_v30  ;;  %v3319_v34 = vpack.c.bf16 %v4746_v46, %v4744_v33  ;;  %v1540_v25 = vpop.f32.mrf.mxu0  ;;  %v4755_v51 = vadd.f32 %v1679_v23, %v1538_v8 }
 0x165   :  { %v2548_v35 = vrot.slane %v2547_v49, 1  ;;  %v1681_v63 = vpop.f32.mrf.mxu1  ;;  %v2501_v53 = vadd.f32 %v2500_v22, %v2499_v36  ;;  %v4787_v7 = vpop.permute.xlu1 %2784 }
 0x166   :  { %v2681_v45 = vadd.f32 %v2680_v44, %v2679_v47  ;;  %v2728_v56 = vrot.slane %v2727_v24, 1  ;;  %2290 = vst [vmem:[%s4964_s3 + $0x18] sm:$0xff] %v3319_v34  ;;  %v4757_v58 = vadd.f32 %v1681_v63, %v1540_v25  ;;  %v1542_v60 = vpop.f32.mrf.mxu0  ;;  %v4798_v23 = vpop.permute.xlu0 %2972 }
 0x167   :  { %v1683_v62 = vpop.f32.mrf.mxu1  ;;  %v2549_v27 = vadd.f32 %v2548_v35, %v2547_v49 }
 0x168   :  { %v4761_v38 = vadd.f32 %v2681_v45, %v2501_v53  ;;  %v2729_v10 = vadd.f32 %v2728_v56, %v2727_v24  ;;  %v3321_v41 = vpack.c.bf16 %v4757_v58, %v4755_v51  ;;  %v1544_v6 = vpop.f32.mrf.mxu0  ;;  %v4769_v15 = vadd.f32 %v1683_v62, %v1542_v60 }
 0x169   :  { %v1685_v39 = vpop.f32.mrf.mxu1  ;;  %v4802_v24 = vpop.permute.xlu1 %2788 }
 0x16a   :  { %v4765_v40 = vadd.f32 %v2729_v10, %v2549_v27  ;;  %v4771_v55 = vadd.f32 %v1685_v39, %v1544_v6  ;;  %2292 = vst [vmem:[%s4964_s3 + $0x28] sm:$0xff] %v3321_v41  ;;  %v1548_v21 = vpop.f32.mrf.mxu0  ;;  %v2737_v27 = vpop.permute.xlu0 %2736 }
 0x16b   :  { %v1689_v4 = vpop.f32.mrf.mxu1 }
 0x16c   :  { %v3323_v48 = vpack.c.bf16 %v4771_v55, %v4769_v15  ;;  %v1550_v3 = vpop.f32.mrf.mxu0  ;;  %v4783_v50 = vadd.f32 %v1689_v4, %v1548_v21 }
 0x16d   :  { %v1691_v17 = vpop.f32.mrf.mxu1  ;;  %v4820_v6 = vpop.permute.xlu1 %2964 }
 0x16e   :  { %2294 = vst [vmem:[%s4964_s3 + $0x38] sm:$0xff] %v3323_v48  ;;  %v4785_v30 = vadd.f32 %v1691_v17, %v1550_v3  ;;  %v1552_v36 = vpop.f32.mrf.mxu0  ;;  %v2816_v48 = vmul.f32 %v2737_v27, %v4744_v33 }
 0x16f   :  { %v1693_v37 = vpop.f32.mrf.mxu1 }
 0x170   :  { %v3325_v19 = vpack.c.bf16 %v4785_v30, %v4783_v50  ;;  %v1554_v0 = vpop.f32.mrf.mxu0  ;;  %v4794_v32 = vadd.f32 %v1693_v37, %v1552_v36  ;;  %v2996_v36 = vmul.f32 %v4695_v9, %v4746_v46  ;;  %v2749_v9 = vpop.permute.xlu0 %2748 }
 0x171   :  { %v1695_v47 = vpop.f32.mrf.mxu1  ;;  %v2819_v27 = vmul.f32 %v2749_v9, %v4783_v50 }
 0x172   :  { %2296 = vst [vmem:[%s4964_s3 + $0x48] sm:$0xff] %v3325_v19  ;;  %v4796_v22 = vadd.f32 %v1695_v47, %v1554_v0  ;;  %v1558_v49 = vpop.f32.mrf.mxu0  ;;  %v2815_v0 = vmul.f32 %v4632_v57, %v4731_v5  ;;  %v2995_v47 = vmul.f32 %v4709_v43, %v4735_v11  ;;  %v3044_v5 = vmul.f32 %v2996_v36, %v2996_v36 }
 0x173   :  { %v1699_v8 = vpop.f32.mrf.mxu1  ;;  %v2818_v43 = vmul.f32 %v4650_v54, %v4769_v15 }
 0x174   :  { %v3327_v44 = vpack.c.bf16 %v4796_v22, %v4794_v32  ;;  %v1560_v34 = vpop.f32.mrf.mxu0  ;;  %v4807_v25 = vadd.f32 %v1699_v8, %v1558_v49  ;;  %v2817_v8 = vmul.f32 %v4643_v61, %v4755_v51  ;;  %v2863_v51 = vmul.f32 %v2815_v0, %v2815_v0  ;;  %v2757_v54 = vpop.permute.xlu0 %2756 }
 0x175   :  { %v1701_v35 = vpop.f32.mrf.mxu1 }
 0x176   :  { %2298 = vst [vmem:[%s4964_s3 + $0x58] sm:$0xff] %v3327_v44  ;;  %v4809_v63 = vadd.f32 %v1701_v35, %v1560_v34  ;;  %v1562_v53 = vpop.f32.mrf.mxu0  ;;  %v4842_v44 = vpop.permute.xlu1 %2968  ;;  %v2864_v34 = vmul.f32 %v2816_v48, %v2816_v48  ;;  %v2997_v35 = vmul.f32 %v4702_v2, %v4757_v58 }
 0x177   :  { %v1703_v45 = vpop.f32.mrf.mxu1 }
 0x178   :  { %v3329_v56 = vpack.c.bf16 %v4809_v63, %v4807_v25  ;;  %v1564_v60 = vpop.f32.mrf.mxu0  ;;  %v4816_v10 = vadd.f32 %v1703_v45, %v1562_v53  ;;  %v3043_v45 = vmul.f32 %v2995_v47, %v2995_v47 }
 0x179   :  { %v1705_v62 = vpop.f32.mrf.mxu1 }
 0x17a   :  { %2300 = vst [vmem:[%s4964_s3 + $0x68] sm:$0xff] %v3329_v56  ;;  %v4818_v41 = vadd.f32 %v1705_v62, %v1564_v60  ;;  %v1568_v39 = vpop.f32.mrf.mxu0  ;;  %v2998_v56 = vmul.f32 %v4718_v20, %v4771_v55  ;;  %v2836_v60 = vadd.f32 %v2816_v48, %v2815_v0  ;;  %v2865_v62 = vmul.f32 %v2817_v8, %v2817_v8  ;;  %v4869_v48 = vpop.permute.xlu1 %2796 }
 0x17b   :  { %v1709_v21 = vpop.f32.mrf.mxu1  ;;  %v2866_v20 = vmul.f32 %v2818_v43, %v2818_v43 }
 0x17c   :  { %v3331_v4 = vpack.c.bf16 %v4818_v41, %v4816_v10  ;;  %v1570_v3 = vpop.f32.mrf.mxu0  ;;  %v4830_v37 = vadd.f32 %v1709_v21, %v1568_v39  ;;  %v2884_v39 = vadd.f32 %v2864_v34, %v2863_v51  ;;  %v3016_v21 = vadd.f32 %v2996_v36, %v2995_v47 }
 0x17d   :  { %v1711_v17 = vpop.f32.mrf.mxu1  ;;  %v2837_v0 = vadd.f32 %v2836_v60, %v2817_v8  ;;  %v3046_v47 = vmul.f32 %v2998_v56, %v2998_v56  ;;  %v2867_v34 = vmul.f32 %v2819_v27, %v2819_v27  ;;  %v2821_v8 = vmul.f32 %v2757_v54, %v4807_v25 }
 0x17e   :  { %2302 = vst [vmem:[%s4964_s3 + $0x78] sm:$0xff] %v3331_v4  ;;  %v4832_v19 = vadd.f32 %v1711_v17, %v1570_v3  ;;  %v1572_v33 = vpop.f32.mrf.mxu0  ;;  %v3045_v4 = vmul.f32 %v2997_v35, %v2997_v35  ;;  %v2999_v3 = vmul.f32 %v4715_v14, %v4785_v30  ;;  %v3017_v36 = vadd.f32 %v3016_v21, %v2997_v35 }
 0x17f   :  { %v1713_v49 = vpop.f32.mrf.mxu1  ;;  %v2820_v14 = vmul.f32 %v4660_v59, %v4794_v32  ;;  %v2838_v51 = vadd.f32 %v2837_v0, %v2818_v43  ;;  %v3001_v59 = vmul.f32 %v4724_v18, %v4809_v63  ;;  %v2765_v32 = vpop.permute.xlu0 %2764  ;;  %v2822_v18 = vmul.f32 %v4667_v29, %v4816_v10 }
 0x180   :  { %v3333_v46 = vpack.c.bf16 %v4832_v19, %v4830_v37  ;;  %v1574_v53 = vpop.f32.mrf.mxu0  ;;  %v4851_v61 = vadd.f32 %v1713_v49, %v1572_v33  ;;  %v3064_v49 = vadd.f32 %v3044_v5, %v3043_v45  ;;  %v3047_v45 = vmul.f32 %v2999_v3, %v2999_v3 }
 0x181   :  { %v1715_v57 = vpop.f32.mrf.mxu1  ;;  %v3018_v60 = vadd.f32 %v3017_v36, %v2998_v56  ;;  %v3002_v56 = vmul.f32 %v4739_v26, %v4818_v41  ;;  %v3049_v36 = vmul.f32 %v3001_v59, %v3001_v59 }
 0x182   :  { %2304 = vst [vmem:[%s4964_s3 + $0x88] sm:$0xff] %v3333_v46  ;;  %v4853_v11 = vadd.f32 %v1715_v57, %v1574_v53  ;;  %v1578_v2 = vpop.f32.mrf.mxu0  ;;  %v2885_v46 = vadd.f32 %v2884_v39, %v2865_v62  ;;  %v3000_v53 = vmul.f32 %v4729_v42, %v4796_v22  ;;  %v3065_v5 = vadd.f32 %v3064_v49, %v3045_v4  ;;  %v4891_v4 = vpop.permute.xlu1 %2800 }
 0x183   :  { %v1719_v58 = vpop.f32.mrf.mxu1  ;;  %v2839_v62 = vadd.f32 %v2838_v51, %v2819_v27  ;;  %v2869_v49 = vmul.f32 %v2821_v8, %v2821_v8 }
 0x184   :  { %v3335_v15 = vpack.c.bf16 %v4853_v11, %v4851_v61  ;;  %v1580_v17 = vpop.f32.mrf.mxu0  ;;  %v4865_v55 = vadd.f32 %v1719_v58, %v1578_v2  ;;  %v2886_v58 = vadd.f32 %v2885_v46, %v2866_v20  ;;  %v3066_v43 = vadd.f32 %v3065_v5, %v3046_v47 }
 0x185   :  { %v1721_v33 = vpop.f32.mrf.mxu1  ;;  %v3048_v21 = vmul.f32 %v3000_v53, %v3000_v53  ;;  %v2840_v0 = vadd.f32 %v2839_v62, %v2820_v14 }
 0x186   :  { %2306 = vst [vmem:[%s4964_s3 + $0x98] sm:$0xff] %v3335_v15  ;;  %v4867_v50 = vadd.f32 %v1721_v33, %v1580_v17  ;;  %v1582_v30 = vpop.f32.mrf.mxu0  ;;  %v2868_v15 = vmul.f32 %v2820_v14, %v2820_v14  ;;  %v2887_v39 = vadd.f32 %v2886_v58, %v2867_v34  ;;  %v3019_v17 = vadd.f32 %v3018_v60, %v2999_v3  ;;  %v2773_v14 = vpop.permute.xlu0 %2772 }
 0x187   :  { %v1723_v9 = vpop.f32.mrf.mxu1  ;;  %v3067_v33 = vadd.f32 %v3066_v43, %v3047_v45  ;;  %v3003_v3 = vmul.f32 %v4733_v52, %v4832_v19  ;;  %v2841_v41 = vadd.f32 %v2840_v0, %v2821_v8  ;;  %v3050_v45 = vmul.f32 %v3002_v56, %v3002_v56  ;;  %v4908_v8 = vpop.permute.xlu1 %2976 }
 0x188   :  { %v3337_v57 = vpack.c.bf16 %v4867_v50, %v4865_v55  ;;  %v1584_v35 = vpop.f32.mrf.mxu0  ;;  %v4883_v42 = vadd.f32 %v1723_v9, %v1582_v30  ;;  %v3020_v47 = vadd.f32 %v3019_v17, %v3000_v53  ;;  %v2888_v30 = vadd.f32 %v2887_v39, %v2868_v15 }
 0x189   :  { %v1725_v2 = vpop.f32.mrf.mxu1  ;;  %v2823_v9 = vmul.f32 %v2765_v32, %v4830_v37  ;;  %v3068_v26 = vadd.f32 %v3067_v33, %v3048_v21  ;;  %v3004_v53 = vmul.f32 %v4759_v1, %v4853_v11  ;;  %v2842_v60 = vadd.f32 %v2841_v41, %v2822_v18 }
 0x18a   :  { %2308 = vst [vmem:[%s4964_s3 + $0xa8] sm:$0xff] %v3337_v57  ;;  %v4885_v22 = vadd.f32 %v1725_v2, %v1584_v35  ;;  %v1588_v25 = vpop.f32.mrf.mxu0  ;;  %v2870_v57 = vmul.f32 %v2822_v18, %v2822_v18  ;;  %v2889_v51 = vadd.f32 %v2888_v30, %v2869_v49  ;;  %v2824_v35 = vmul.f32 %v4678_v28, %v4851_v61  ;;  %v2781_v49 = vpop.permute.xlu0 %2780 }
 0x18b   :  { %v1729_v54 = vpop.f32.mrf.mxu1  ;;  %v3021_v58 = vadd.f32 %v3020_v47, %v3001_v59  ;;  %v3069_v32 = vadd.f32 %v3068_v26, %v3049_v36  ;;  %v2871_v43 = vmul.f32 %v2823_v9, %v2823_v9  ;;  %v3051_v62 = vmul.f32 %v3003_v3, %v3003_v3 }
 0x18c   :  { %v3339_v63 = vpack.c.bf16 %v4885_v22, %v4883_v42  ;;  %v1590_v27 = vpop.f32.mrf.mxu0  ;;  %v1730_v29 = vadd.f32 %v1729_v54, %v1588_v25  ;;  %v2825_v28 = vmul.f32 %v2773_v14, %v4865_v55  ;;  %v2890_v1 = vadd.f32 %v2889_v51, %v2870_v57 }
 0x18d   :  { %v1731_v20 = vpop.f32.mrf.mxu1  ;;  %v3022_v11 = vadd.f32 %v3021_v58, %v3002_v56  ;;  %v3005_v59 = vmul.f32 %v4748_v13, %v4867_v50  ;;  %v3070_v54 = vadd.f32 %v3069_v32, %v3050_v45  ;;  %v2843_v39 = vadd.f32 %v2842_v60, %v2823_v9 }
 0x18e   :  { %2310 = vst [vmem:[%s4964_s3 + $0xb8] sm:$0xff] %v3339_v63  ;;  %v1732_v10 = vadd.f32 %v1731_v20, %v1590_v27  ;;  %v1592_v46 = vpop.f32.mrf.mxu0  ;;  %v2872_v21 = vmul.f32 %v2824_v35, %v2824_v35  ;;  %v3052_v63 = vmul.f32 %v3004_v53, %v3004_v53  ;;  %v2826_v18 = vmul.f32 %v4685_v16, %v4883_v42  ;;  %v4920_v16 = vpop.permute.xlu1 %2980 }
 0x18f   :  { %v1733_v34 = vpop.f32.mrf.mxu1  ;;  %v3006_v55 = vmul.f32 %v4767_v12, %v4885_v22  ;;  %v2891_v50 = vadd.f32 %v2890_v1, %v2871_v43  ;;  %v3023_v27 = vadd.f32 %v3022_v11, %v3003_v3  ;;  %v3071_v20 = vadd.f32 %v3070_v54, %v3051_v62  ;;  %v2793_v58 = vpop.permute.xlu0 %2792 }
 0x190   :  { %v3341_v5 = vpack.c.bf16 %v1732_v10, %v1730_v29  ;;  %v1594_v2 = vpop.f32.mrf.mxu0  ;;  %v1734_v52 = vadd.f32 %v1733_v34, %v1592_v46  ;;  %v2873_v0 = vmul.f32 %v2825_v28, %v2825_v28  ;;  %v2844_v30 = vadd.f32 %v2843_v39, %v2824_v35 }
 0x191   :  { %v1735_v37 = vpop.f32.mrf.mxu1  ;;  %v3053_v9 = vmul.f32 %v3005_v59, %v3005_v59  ;;  %v2827_v46 = vmul.f32 %v2781_v49, %v1730_v29  ;;  %v2892_v42 = vadd.f32 %v2891_v50, %v2872_v21  ;;  %v3024_v12 = vadd.f32 %v3023_v27, %v3004_v53 }
 0x192   :  { %2312 = vst [vmem:[%s4964_s3 + $0xc8] sm:$0xff] %v3341_v5  ;;  %v1736_v19 = vadd.f32 %v1735_v37, %v1594_v2  ;;  %v1598_v61 = vpop.f32.mrf.mxu0  ;;  %v3072_v22 = vadd.f32 %v3071_v20, %v3052_v63  ;;  %v3007_v26 = vmul.f32 %v4778_v31, %v1732_v10  ;;  %v2874_v14 = vmul.f32 %v2826_v18, %v2826_v18 }
 0x193   :  { %v1739_v15 = vpop.f32.mrf.mxu1  ;;  %v3054_v5 = vmul.f32 %v3006_v55, %v3006_v55  ;;  %v2845_v45 = vadd.f32 %v2844_v30, %v2825_v28  ;;  %v2893_v29 = vadd.f32 %v2892_v42, %v2873_v0  ;;  %v2828_v35 = vmul.f32 %v4787_v7, %v1734_v52  ;;  %v2805_v0 = vpop.permute.xlu0 %2804 }
 0x194   :  { %v3343_v25 = vpack.c.bf16 %v1736_v19, %v1734_v52  ;;  %v1600_v17 = vpop.f32.mrf.mxu0  ;;  %v1740_v56 = vadd.f32 %v1739_v15, %v1598_v61  ;;  %v3008_v2 = vmul.f32 %v4820_v6, %v1736_v19  ;;  %v3025_v31 = vadd.f32 %v3024_v12, %v3005_v59  ;;  %v4932_v6 = vpop.permute.xlu1 %2808 }
 0x195   :  { %v1741_v33 = vpop.f32.mrf.mxu1  ;;  %v3073_v10 = vadd.f32 %v3072_v22, %v3053_v9  ;;  %v2875_v32 = vmul.f32 %v2827_v46, %v2827_v46  ;;  %v2846_v43 = vadd.f32 %v2845_v45, %v2826_v18  ;;  %v3055_v62 = vmul.f32 %v3007_v26, %v3007_v26 }
 0x196   :  { %2314 = vst [vmem:[%s4964_s3 + $0xd8] sm:$0xff] %v3343_v25  ;;  %v1742_v13 = vadd.f32 %v1741_v33, %v1600_v17  ;;  %v1602_v36 = vpop.f32.mrf.mxu0  ;;  %v2829_v61 = vmul.f32 %v4802_v24, %v1740_v56  ;;  %v2894_v28 = vadd.f32 %v2893_v29, %v2874_v14  ;;  %v3026_v25 = vadd.f32 %v3025_v31, %v3006_v55 }
 0x197   :  { %v1743_v47 = vpop.f32.mrf.mxu1  ;;  %v3074_v54 = vadd.f32 %v3073_v10, %v3054_v5  ;;  %v2847_v52 = vadd.f32 %v2846_v43, %v2827_v46  ;;  %v2876_v19 = vmul.f32 %v2828_v35, %v2828_v35  ;;  %v3056_v59 = vmul.f32 %v3008_v2, %v3008_v2 }
 0x198   :  { %v3345_v34 = vpack.c.bf16 %v1742_v13, %v1740_v56  ;;  %v1604_v41 = vpop.f32.mrf.mxu0  ;;  %v1744_v3 = vadd.f32 %v1743_v47, %v1602_v36  ;;  %v2895_v24 = vadd.f32 %v2894_v28, %v2875_v32  ;;  %v3027_v17 = vadd.f32 %v3026_v25, %v3007_v26 }
 0x199   :  { %v1745_v57 = vpop.f32.mrf.mxu1  ;;  %v3009_v33 = vmul.f32 %v4842_v44, %v1742_v13  ;;  %v3075_v18 = vadd.f32 %v3074_v54, %v3055_v62  ;;  %v2877_v55 = vmul.f32 %v2829_v61, %v2829_v61  ;;  %v2848_v36 = vadd.f32 %v2847_v52, %v2828_v35 }
 0x19a   :  { %2316 = vst [vmem:[%s4964_s3 + $0xe8] sm:$0xff] %v3345_v34  ;;  %v1746_v51 = vadd.f32 %v1745_v57, %v1604_v41  ;;  %v1608_v53 = vpop.f32.mrf.mxu0  ;;  %v2830_v39 = vmul.f32 %v2793_v58, %v1744_v3  ;;  %v3028_v47 = vadd.f32 %v3027_v17, %v3008_v2  ;;  %v2896_v46 = vadd.f32 %v2895_v24, %v2876_v19  ;;  %v2813_v57 = vpop.permute.xlu1 %2812 }
 0x19b   :  { %v1749_v37 = vpop.f32.mrf.mxu1  ;;  %v3076_v44 = vadd.f32 %v3075_v18, %v3056_v59  ;;  %v2849_v12 = vadd.f32 %v2848_v36, %v2829_v61  ;;  %v3057_v22 = vmul.f32 %v3009_v33, %v3009_v33 }
 0x19c   :  { %v3347_v60 = vpack.c.bf16 %v1746_v51, %v1744_v3  ;;  %v1750_v15 = vadd.f32 %v1749_v37, %v1608_v53  ;;  %v1610_v1 = vpop.f32.mrf.mxu0  ;;  %v3010_v30 = vmul.f32 %v4798_v23, %v1746_v51  ;;  %v2878_v13 = vmul.f32 %v2830_v39, %v2830_v39  ;;  %v2985_v53 = vpop.permute.xlu0 %2984 }
 0x19d   :  { %v1751_v11 = vpop.f32.mrf.mxu1  ;;  %v2897_v14 = vadd.f32 %v2896_v46, %v2877_v55  ;;  %v3029_v5 = vadd.f32 %v3028_v47, %v3009_v33  ;;  %v2850_v29 = vadd.f32 %v2849_v12, %v2830_v39 }
 0x19e   :  { %2318 = vst [vmem:[%s4964_s3 + $0xf8] sm:$0xff] %v3347_v60  ;;  %v1752_v7 = vadd.f32 %v1751_v11, %v1610_v1  ;;  %v1612_v21 = vpop.f32.mrf.mxu0  ;;  %v2831_v56 = vmul.f32 %v4869_v48, %v1750_v15  ;;  %v3058_v35 = vmul.f32 %v3010_v30, %v3010_v30  ;;  %v3077_v60 = vadd.f32 %v3076_v44, %v3057_v22  ;;  %v2989_v61 = vpop.permute.xlu1 %2988 }
 0x19f   :  { %v1753_v63 = vpop.f32.mrf.mxu1  ;;  %v2898_v37 = vadd.f32 %v2897_v14, %v2878_v13  ;;  %v3030_v43 = vadd.f32 %v3029_v5, %v3010_v30 }
 0x1a0   :  { %v3349_v49 = vpack.c.bf16 %v1752_v7, %v1750_v15  ;;  %v1754_v50 = vadd.f32 %v1753_v63, %v1612_v21  ;;  %v1614_v27 = vpop.f32.mrf.mxu0  ;;  %v2879_v23 = vmul.f32 %v2831_v56, %v2831_v56  ;;  %v3011_v3 = vmul.f32 %v4908_v8, %v1752_v7 }
 0x1a1   :  { %v1755_v20 = vpop.f32.mrf.mxu1  ;;  %v2851_v8 = vadd.f32 %v2850_v29, %v2831_v56  ;;  %v3078_v7 = vadd.f32 %v3077_v60, %v3058_v35 }
 0x1a2   :  { %2320 = vst [vmem:[%s4964_s3 + $0x108] sm:$0xff] %v3349_v49  ;;  %v1756_v9 = vadd.f32 %v1755_v20, %v1614_v27  ;;  %v2832_v34 = vmul.f32 %v4891_v4, %v1754_v50  ;;  %v1618_v42 = vpop.f32.mrf.mxu0  ;;  %v2899_v15 = vadd.f32 %v2898_v37, %v2879_v23  ;;  %v3059_v1 = vmul.f32 %v3011_v3, %v3011_v3 }
 0x1a3   :  { %v1759_v48 = vpop.f32.mrf.mxu1  ;;  %v3031_v59 = vadd.f32 %v3030_v43, %v3011_v3 }
 0x1a4   :  { %v3351_v26 = vpack.c.bf16 %v1756_v9, %v1754_v50  ;;  %v1760_v41 = vadd.f32 %v1759_v48, %v1618_v42  ;;  %v1620_v51 = vpop.f32.mrf.mxu0  ;;  %v2880_v58 = vmul.f32 %v2832_v34, %v2832_v34  ;;  %v3012_v31 = vmul.f32 %v4920_v16, %v1756_v9 }
 0x1a5   :  { %v1761_v45 = vpop.f32.mrf.mxu1  ;;  %v2852_v52 = vadd.f32 %v2851_v8, %v2832_v34  ;;  %v3079_v56 = vadd.f32 %v3078_v7, %v3059_v1 }
 0x1a6   :  { %2322 = vst [vmem:[%s4964_s3 + $0x118] sm:$0xff] %v3351_v26  ;;  %v2833_v4 = vmul.f32 %v2805_v0, %v1760_v41  ;;  %v1762_v2 = vadd.f32 %v1761_v45, %v1620_v51  ;;  %v1622_v10 = vpop.f32.mrf.mxu0  ;;  %v2900_v39 = vadd.f32 %v2899_v15, %v2880_v58  ;;  %v3060_v21 = vmul.f32 %v3012_v31, %v3012_v31  ;;  %v2993_v26 = vpop.permute.xlu0 %2992 }
 0x1a7   :  { %v1763_v32 = vpop.f32.mrf.mxu1  ;;  %v3032_v50 = vadd.f32 %v3031_v59, %v3012_v31 }
 0x1a8   :  { %v3353_v62 = vpack.c.bf16 %v1762_v2, %v1760_v41  ;;  %v3013_v11 = vmul.f32 %v2985_v53, %v1762_v2  ;;  %v1764_v28 = vadd.f32 %v1763_v32, %v1622_v10  ;;  %v1624_v25 = vpop.f32.mrf.mxu0  ;;  %v2881_v19 = vmul.f32 %v2833_v4, %v2833_v4 }
 0x1a9   :  { %v1765_v54 = vpop.f32.mrf.mxu1  ;;  %v2853_v33 = vadd.f32 %v2852_v52, %v2833_v4  ;;  %v3080_v44 = vadd.f32 %v3079_v56, %v3060_v21 }
 0x1aa   :  { %2324 = vst [vmem:[%s4964_s3 + $0x128] sm:$0xff] %v3353_v62  ;;  %v1766_v16 = vadd.f32 %v1765_v54, %v1624_v25  ;;  %v2834_v63 = vmul.f32 %v4932_v6, %v1764_v28  ;;  %v1628_v24 = vpop.f32.mrf.mxu0  ;;  %v3061_v27 = vmul.f32 %v3013_v11, %v3013_v11  ;;  %v2901_v47 = vadd.f32 %v2900_v39, %v2881_v19 }
 0x1ab   :  { %v1769_v17 = vpop.f32.mrf.mxu1  ;;  %v3033_v46 = vadd.f32 %v3032_v50, %v3013_v11 }
 0x1ac   :  { %v3355_v49 = vpack.c.bf16 %v1766_v16, %v1764_v28  ;;  %v3014_v18 = vmul.f32 %v2989_v61, %v1766_v16  ;;  %v1770_v55 = vadd.f32 %v1769_v17, %v1628_v24  ;;  %v2882_v20 = vmul.f32 %v2834_v63, %v2834_v63  ;;  %v1630_v0 = vpop.f32.mrf.mxu0 }
 0x1ad   :  { %v1771_v36 = vpop.f32.mrf.mxu1  ;;  %v2854_v30 = vadd.f32 %v2853_v33, %v2834_v63  ;;  %v3081_v14 = vadd.f32 %v3080_v44, %v3061_v27 }
 0x1ae   :  { %2326 = vst [vmem:[%s4964_s3 + $0x138] sm:$0xff] %v3355_v49  ;;  %v2835_v9 = vmul.f32 %v2813_v57, %v1770_v55  ;;  %v1772_v6 = vadd.f32 %v1771_v36, %v1630_v0  ;;  %v3062_v13 = vmul.f32 %v3014_v18, %v3014_v18  ;;  %v1632_v34 = vpop.f32.mrf.mxu0  ;;  %v2902_v48 = vadd.f32 %v2901_v47, %v2882_v20 }
 0x1af   :  { %v1773_v42 = vpop.f32.mrf.mxu1  ;;  %v3034_v5 = vadd.f32 %v3033_v46, %v3014_v18 }
 0x1b0   :  { %v2855_v12 = vadd.f32 %v2854_v30, %v2835_v9  ;;  %v2883_v22 = vmul.f32 %v2835_v9, %v2835_v9  ;;  %v3357_v41 = vpack.c.bf16 %v1772_v6, %v1770_v55  ;;  %v3015_v23 = vmul.f32 %v2993_v26, %v1772_v6  ;;  %v1633_v3 = vpop.f32.mrf.mxu0 }
 0x1b1   :  { %v1774_v51 = vpop.f32.mrf.mxu1  ;;  %v3082_v57 = vadd.f32 %v3081_v14, %v3062_v13 }
 0x1b2   :  { %v2856_v45 = vrot.slane %v2855_v12, 4  ;;  %v2903_v29 = vadd.f32 %v2902_v48, %v2883_v22  ;;  %2328 = vst [vmem:[%s4964_s3 + $0x148] sm:$0xff] %v3357_v41  ;;  %v3035_v35 = vadd.f32 %v3034_v5, %v3015_v23  ;;  %v3063_v4 = vmul.f32 %v3015_v23, %v3015_v23 }
 0x1b4   :  { %v2857_v2 = vadd.f32 %v2856_v45, %v2855_v12  ;;  %v2904_v53 = vrot.slane %v2903_v29, 4  ;;  %v3036_v37 = vrot.slane %v3035_v35, 4  ;;  %v3083_v58 = vadd.f32 %v3082_v57, %v3063_v4 }
 0x1b6   :  { %v2858_v31 = vrot.slane %v2857_v2, 2  ;;  %v2905_v10 = vadd.f32 %v2904_v53, %v2903_v29  ;;  %v3037_v32 = vadd.f32 %v3036_v37, %v3035_v35  ;;  %v3084_v60 = vrot.slane %v3083_v58, 4 }
 0x1b8   :  { %v2859_v43 = vadd.f32 %v2858_v31, %v2857_v2  ;;  %v2906_v8 = vrot.slane %v2905_v10, 2  ;;  %v3038_v62 = vrot.slane %v3037_v32, 2  ;;  %v3085_v61 = vadd.f32 %v3084_v60, %v3083_v58 }
 0x1ba   :  { %v2860_v15 = vrot.slane %v2859_v43, 1  ;;  %v2907_v1 = vadd.f32 %v2906_v8, %v2905_v10  ;;  %v3039_v11 = vadd.f32 %v3038_v62, %v3037_v32  ;;  %v3086_v28 = vrot.slane %v3085_v61, 2 }
 0x1bc   :  { %v2861_v25 = vadd.f32 %v2860_v15, %v2859_v43  ;;  %v2908_v54 = vrot.slane %v2907_v1, 1  ;;  %v3040_v7 = vrot.slane %v3039_v11, 1  ;;  %v3087_v52 = vadd.f32 %v3086_v28, %v3085_v61 }
 0x1be   :  { %v2909_v19 = vadd.f32 %v2908_v54, %v2907_v1  ;;  %v2862_v16 = vadd.f32 %v2861_v25, %v4761_v38  ;;  %v3041_v59 = vadd.f32 %v3040_v7, %v3039_v11  ;;  %v3088_v39 = vrot.slane %v3087_v52, 1 }
 0x1c0   :  { %v2910_v21 = vadd.f32 %v2909_v19, %v4765_v40  ;;  %v3089_v63 = vadd.f32 %v3088_v39, %v3087_v52  ;;  %v3042_v24 = vadd.f32 %v3041_v59, %v2862_v16 }
 0x1c2   :  { %v3090_v17 = vadd.f32 %v3089_v63, %v2910_v21 }
 0x1c4   :  { %v3092_v33 = vsel %vm3091_vm0, %v3042_v24, %v3090_v17 }
 0x1c5   :  { %3093 = vst [vmem:[%s4965_s4] sm:$0x3] %v3092_v33 }

// kernel: unet_block_innermost_forward.5
= control target key start
LH: loop header
LB: loop body
LE: loop exit
PB: predicated region body
PF: predicated region fallthrough
CT: control target
= control target key end

     0   :  { %s1773_s3 = inlined_call_operand.vmem [shape: f32[512,128], index: 3, kind: input, shape index: {}]   ;;  %s1774_s5 = inlined_call_operand.vmem [shape: f32[512,256], index: 5, kind: output, shape index: {}]   ;;  %s1775_s0 = inlined_call_operand.vmem [shape: f32[2,128], index: 0, kind: input, shape index: {}]   ;;  %s1776_s4 = inlined_call_operand.vmem [shape: bf16[512,128], index: 4, kind: input, shape index: {}]   ;;  %s1777_s1 = inlined_call_operand.vmem [shape: f32[1,128], index: 1, kind: input, shape index: {}]   ;;  %s1778_s2 = inlined_call_operand.vmem [shape: f32[1,128], index: 2, kind: input, shape index: {}]  }
   0x1   :  { %v34_v0 = vld [vmem:[%s1773_s3] sm:$0xff]  ;;  %v35_v1 = vld [vmem:[%s1773_s3 + $0x8] sm:$0xff]  ;;  %v36_v2 = vld [vmem:[%s1773_s3 + $0x10] sm:$0xff] }
   0x2   :  { %98 = vst [vmem:[%s1774_s5] sm:$0xff] %v34_v0  ;;  %99 = vst [vmem:[%s1774_s5 + $0x10] sm:$0xff] %v35_v1  ;;  %v37_v3 = vld [vmem:[%s1773_s3 + $0x18] sm:$0xff]  ;;  %v38_v4 = vld [vmem:[%s1773_s3 + $0x20] sm:$0xff] }
   0x3   :  { %100 = vst [vmem:[%s1774_s5 + $0x20] sm:$0xff] %v36_v2  ;;  %v39_v5 = vld [vmem:[%s1773_s3 + $0x28] sm:$0xff]  ;;  %101 = vst [vmem:[%s1774_s5 + $0x30] sm:$0xff] %v37_v3  ;;  %v40_v6 = vld [vmem:[%s1773_s3 + $0x30] sm:$0xff] }
   0x4   :  { %102 = vst [vmem:[%s1774_s5 + $0x40] sm:$0xff] %v38_v4  ;;  %103 = vst [vmem:[%s1774_s5 + $0x50] sm:$0xff] %v39_v5  ;;  %v41_v7 = vld [vmem:[%s1773_s3 + $0x38] sm:$0xff]  ;;  %v42_v8 = vld [vmem:[%s1773_s3 + $0x40] sm:$0xff]  ;;  %v291_v5 = vlaneseq }
   0x5   :  { %104 = vst [vmem:[%s1774_s5 + $0x60] sm:$0xff] %v40_v6  ;;  %105 = vst [vmem:[%s1774_s5 + $0x70] sm:$0xff] %v41_v7  ;;  %v43_v9 = vld [vmem:[%s1773_s3 + $0x48] sm:$0xff]  ;;  %v44_v10 = vld [vmem:[%s1773_s3 + $0x50] sm:$0xff] }
   0x6   :  { %106 = vst [vmem:[%s1774_s5 + $0x80] sm:$0xff] %v42_v8  ;;  %v45_v11 = vld [vmem:[%s1773_s3 + $0x58] sm:$0xff]  ;;  %107 = vst [vmem:[%s1774_s5 + $0x90] sm:$0xff] %v43_v9  ;;  %v46_v12 = vld [vmem:[%s1773_s3 + $0x60] sm:$0xff]  ;;  %v1083_v8 = vshrl.u32 %v291_v5, 7 }
   0x7   :  { %108 = vst [vmem:[%s1774_s5 + $0xa0] sm:$0xff] %v44_v10  ;;  %109 = vst [vmem:[%s1774_s5 + $0xb0] sm:$0xff] %v45_v11  ;;  %v47_v13 = vld [vmem:[%s1773_s3 + $0x68] sm:$0xff]  ;;  %v48_v14 = vld [vmem:[%s1773_s3 + $0x70] sm:$0xff] }
   0x8   :  { %110 = vst [vmem:[%s1774_s5 + $0xc0] sm:$0xff] %v46_v12  ;;  %111 = vst [vmem:[%s1774_s5 + $0xd0] sm:$0xff] %v47_v13  ;;  %v49_v15 = vld [vmem:[%s1773_s3 + $0x78] sm:$0xff]  ;;  %v50_v16 = vld [vmem:[%s1773_s3 + $0x80] sm:$0xff] }
   0x9   :  { %112 = vst [vmem:[%s1774_s5 + $0xe0] sm:$0xff] %v48_v14  ;;  %v51_v17 = vld [vmem:[%s1773_s3 + $0x88] sm:$0xff]  ;;  %113 = vst [vmem:[%s1774_s5 + $0xf0] sm:$0xff] %v49_v15  ;;  %v52_v18 = vld [vmem:[%s1773_s3 + $0x90] sm:$0xff] }
   0xa   :  { %114 = vst [vmem:[%s1774_s5 + $0x100] sm:$0xff] %v50_v16  ;;  %115 = vst [vmem:[%s1774_s5 + $0x110] sm:$0xff] %v51_v17  ;;  %v53_v19 = vld [vmem:[%s1773_s3 + $0x98] sm:$0xff]  ;;  %v54_v20 = vld [vmem:[%s1773_s3 + $0xa0] sm:$0xff]  ;;  %v293_v17 = vsub.s32 0, %v1083_v8 }
   0xb   :  { %116 = vst [vmem:[%s1774_s5 + $0x120] sm:$0xff] %v52_v18  ;;  %117 = vst [vmem:[%s1774_s5 + $0x130] sm:$0xff] %v53_v19  ;;  %v55_v21 = vld [vmem:[%s1773_s3 + $0xa8] sm:$0xff]  ;;  %v56_v22 = vld [vmem:[%s1773_s3 + $0xb0] sm:$0xff] }
   0xc   :  { %118 = vst [vmem:[%s1774_s5 + $0x140] sm:$0xff] %v54_v20  ;;  %v57_v23 = vld [vmem:[%s1773_s3 + $0xb8] sm:$0xff]  ;;  %119 = vst [vmem:[%s1774_s5 + $0x150] sm:$0xff] %v55_v21  ;;  %v58_v24 = vld [vmem:[%s1773_s3 + $0xc0] sm:$0xff] }
   0xd   :  { %120 = vst [vmem:[%s1774_s5 + $0x160] sm:$0xff] %v56_v22  ;;  %121 = vst [vmem:[%s1774_s5 + $0x170] sm:$0xff] %v57_v23  ;;  %v59_v25 = vld [vmem:[%s1773_s3 + $0xc8] sm:$0xff]  ;;  %v60_v26 = vld [vmem:[%s1773_s3 + $0xd0] sm:$0xff] }
   0xe   :  { %122 = vst [vmem:[%s1774_s5 + $0x180] sm:$0xff] %v58_v24  ;;  %123 = vst [vmem:[%s1774_s5 + $0x190] sm:$0xff] %v59_v25  ;;  %v61_v27 = vld [vmem:[%s1773_s3 + $0xd8] sm:$0xff]  ;;  %v62_v28 = vld [vmem:[%s1773_s3 + $0xe0] sm:$0xff] }
   0xf   :  { %124 = vst [vmem:[%s1774_s5 + $0x1a0] sm:$0xff] %v60_v26  ;;  %v63_v29 = vld [vmem:[%s1773_s3 + $0xe8] sm:$0xff]  ;;  %125 = vst [vmem:[%s1774_s5 + $0x1b0] sm:$0xff] %v61_v27  ;;  %v64_v30 = vld [vmem:[%s1773_s3 + $0xf0] sm:$0xff] }
  0x10   :  { %126 = vst [vmem:[%s1774_s5 + $0x1c0] sm:$0xff] %v62_v28  ;;  %127 = vst [vmem:[%s1774_s5 + $0x1d0] sm:$0xff] %v63_v29  ;;  %v65_v31 = vld [vmem:[%s1773_s3 + $0xf8] sm:$0xff]  ;;  %v66_v32 = vld [vmem:[%s1773_s3 + $0x100] sm:$0xff] }
  0x11   :  { %128 = vst [vmem:[%s1774_s5 + $0x1e0] sm:$0xff] %v64_v30  ;;  %129 = vst [vmem:[%s1774_s5 + $0x1f0] sm:$0xff] %v65_v31  ;;  %v67_v33 = vld [vmem:[%s1773_s3 + $0x108] sm:$0xff]  ;;  %v68_v34 = vld [vmem:[%s1773_s3 + $0x110] sm:$0xff] }
  0x12   :  { %130 = vst [vmem:[%s1774_s5 + $0x200] sm:$0xff] %v66_v32  ;;  %v69_v35 = vld [vmem:[%s1773_s3 + $0x118] sm:$0xff]  ;;  %131 = vst [vmem:[%s1774_s5 + $0x210] sm:$0xff] %v67_v33  ;;  %v70_v36 = vld [vmem:[%s1773_s3 + $0x120] sm:$0xff] }
  0x13   :  { %132 = vst [vmem:[%s1774_s5 + $0x220] sm:$0xff] %v68_v34  ;;  %133 = vst [vmem:[%s1774_s5 + $0x230] sm:$0xff] %v69_v35  ;;  %v71_v37 = vld [vmem:[%s1773_s3 + $0x128] sm:$0xff]  ;;  %v72_v38 = vld [vmem:[%s1773_s3 + $0x130] sm:$0xff] }
  0x14   :  { %134 = vst [vmem:[%s1774_s5 + $0x240] sm:$0xff] %v70_v36  ;;  %135 = vst [vmem:[%s1774_s5 + $0x250] sm:$0xff] %v71_v37  ;;  %v73_v39 = vld [vmem:[%s1773_s3 + $0x138] sm:$0xff]  ;;  %v74_v40 = vld [vmem:[%s1773_s3 + $0x140] sm:$0xff] }
  0x15   :  { %136 = vst [vmem:[%s1774_s5 + $0x260] sm:$0xff] %v72_v38  ;;  %v75_v41 = vld [vmem:[%s1773_s3 + $0x148] sm:$0xff]  ;;  %137 = vst [vmem:[%s1774_s5 + $0x270] sm:$0xff] %v73_v39  ;;  %v76_v42 = vld [vmem:[%s1773_s3 + $0x150] sm:$0xff] }
  0x16   :  { %138 = vst [vmem:[%s1774_s5 + $0x280] sm:$0xff] %v74_v40  ;;  %139 = vst [vmem:[%s1774_s5 + $0x290] sm:$0xff] %v75_v41  ;;  %v77_v43 = vld [vmem:[%s1773_s3 + $0x158] sm:$0xff]  ;;  %v78_v44 = vld [vmem:[%s1773_s3 + $0x160] sm:$0xff] }
  0x17   :  { %140 = vst [vmem:[%s1774_s5 + $0x2a0] sm:$0xff] %v76_v42  ;;  %141 = vst [vmem:[%s1774_s5 + $0x2b0] sm:$0xff] %v77_v43  ;;  %v79_v45 = vld [vmem:[%s1773_s3 + $0x168] sm:$0xff]  ;;  %v80_v46 = vld [vmem:[%s1773_s3 + $0x170] sm:$0xff] }
  0x18   :  { %142 = vst [vmem:[%s1774_s5 + $0x2c0] sm:$0xff] %v78_v44  ;;  %v81_v47 = vld [vmem:[%s1773_s3 + $0x178] sm:$0xff]  ;;  %143 = vst [vmem:[%s1774_s5 + $0x2d0] sm:$0xff] %v79_v45  ;;  %v82_v48 = vld [vmem:[%s1773_s3 + $0x180] sm:$0xff] }
  0x19   :  { %144 = vst [vmem:[%s1774_s5 + $0x2e0] sm:$0xff] %v80_v46  ;;  %145 = vst [vmem:[%s1774_s5 + $0x2f0] sm:$0xff] %v81_v47  ;;  %v83_v49 = vld [vmem:[%s1773_s3 + $0x188] sm:$0xff]  ;;  %v84_v50 = vld [vmem:[%s1773_s3 + $0x190] sm:$0xff] }
  0x1a   :  { %146 = vst [vmem:[%s1774_s5 + $0x300] sm:$0xff] %v82_v48  ;;  %147 = vst [vmem:[%s1774_s5 + $0x310] sm:$0xff] %v83_v49  ;;  %v85_v51 = vld [vmem:[%s1773_s3 + $0x198] sm:$0xff]  ;;  %v86_v52 = vld [vmem:[%s1773_s3 + $0x1a0] sm:$0xff] }
  0x1b   :  { %148 = vst [vmem:[%s1774_s5 + $0x320] sm:$0xff] %v84_v50  ;;  %v87_v53 = vld [vmem:[%s1773_s3 + $0x1a8] sm:$0xff]  ;;  %149 = vst [vmem:[%s1774_s5 + $0x330] sm:$0xff] %v85_v51  ;;  %v88_v54 = vld [vmem:[%s1773_s3 + $0x1b0] sm:$0xff] }
  0x1c   :  { %150 = vst [vmem:[%s1774_s5 + $0x340] sm:$0xff] %v86_v52  ;;  %151 = vst [vmem:[%s1774_s5 + $0x350] sm:$0xff] %v87_v53  ;;  %v89_v55 = vld [vmem:[%s1773_s3 + $0x1b8] sm:$0xff]  ;;  %v90_v56 = vld [vmem:[%s1773_s3 + $0x1c0] sm:$0xff] }
  0x1d   :  { %152 = vst [vmem:[%s1774_s5 + $0x360] sm:$0xff] %v88_v54  ;;  %153 = vst [vmem:[%s1774_s5 + $0x370] sm:$0xff] %v89_v55  ;;  %v91_v57 = vld [vmem:[%s1773_s3 + $0x1c8] sm:$0xff]  ;;  %v92_v58 = vld [vmem:[%s1773_s3 + $0x1d0] sm:$0xff] }
  0x1e   :  { %154 = vst [vmem:[%s1774_s5 + $0x380] sm:$0xff] %v90_v56  ;;  %v93_v59 = vld [vmem:[%s1773_s3 + $0x1d8] sm:$0xff]  ;;  %155 = vst [vmem:[%s1774_s5 + $0x390] sm:$0xff] %v91_v57  ;;  %v94_v60 = vld [vmem:[%s1773_s3 + $0x1e0] sm:$0xff] }
  0x1f   :  { %156 = vst [vmem:[%s1774_s5 + $0x3a0] sm:$0xff] %v92_v58  ;;  %157 = vst [vmem:[%s1774_s5 + $0x3b0] sm:$0xff] %v93_v59  ;;  %v95_v61 = vld [vmem:[%s1773_s3 + $0x1e8] sm:$0xff]  ;;  %v96_v62 = vld [vmem:[%s1773_s3 + $0x1f0] sm:$0xff] }
  0x20   :  { %158 = vst [vmem:[%s1774_s5 + $0x3c0] sm:$0xff] %v94_v60  ;;  %159 = vst [vmem:[%s1774_s5 + $0x3d0] sm:$0xff] %v95_v61  ;;  %v97_v63 = vld [vmem:[%s1773_s3 + $0x1f8] sm:$0xff]  ;;  %v20_v0 = vld [vmem:[%s1775_s0] sm:$0x1] }
  0x21   :  { %160 = vst [vmem:[%s1774_s5 + $0x3e0] sm:$0xff] %v96_v62  ;;  %v22_v1 = vld [vmem:[%s1775_s0 + $0x1] sm:$0x1]  ;;  %161 = vst [vmem:[%s1774_s5 + $0x3f0] sm:$0xff] %v97_v63  ;;  %v1079_v2 = vmul.f32 0.001953125, %v20_v0  ;;  %v1093_v11 = vld [vmem:[%s1776_s4 + $0x8] sm:$0xff]  }
  0x22   :  { %v23_v3 = vmul.f32 0.001953125, %v22_v1  ;;  %v1088_v10 = vld [vmem:[%s1776_s4] sm:$0xff]   ;;  %v1098_v12 = vld [vmem:[%s1776_s4 + $0x10] sm:$0xff]   ;;  %v1103_v13 = vld [vmem:[%s1776_s4 + $0x18] sm:$0xff]   ;;  %v504_v19 = vunpack.c.l.bf16 %v1093_v11  ;;  %v505_v22 = vunpack.c.h.bf16 %v1093_v11 }
  0x23   :  { %v24_v4 = vmul.f32 %v1079_v2, %v1079_v2  ;;  %v1108_v14 = vld [vmem:[%s1776_s4 + $0x20] sm:$0xff]   ;;  %v1113_v15 = vld [vmem:[%s1776_s4 + $0x28] sm:$0xff]   ;;  %v500_v16 = vunpack.c.l.bf16 %v1088_v10  ;;  %v501_v18 = vunpack.c.h.bf16 %v1088_v10  ;;  %v1122_v20 = vld [vmem:[%s1776_s4 + $0x30] sm:$0xff]   ;;  %v508_v23 = vunpack.c.l.bf16 %v1098_v12 }
  0x24   :  { %v1127_v21 = vld [vmem:[%s1776_s4 + $0x38] sm:$0xff]   ;;  %v509_v24 = vunpack.c.h.bf16 %v1098_v12  ;;  %v512_v25 = vunpack.c.l.bf16 %v1103_v13  ;;  %v1136_v26 = vld [vmem:[%s1776_s4 + $0x40] sm:$0xff]   ;;  %v1141_v27 = vld [vmem:[%s1776_s4 + $0x48] sm:$0xff]   ;;  %v513_v28 = vunpack.c.h.bf16 %v1103_v13  ;;  %v516_v29 = vunpack.c.l.bf16 %v1108_v14 }
  0x25   :  { %v25_v6 = vsub.f32 %v23_v3, %v24_v4  ;;  %v517_v30 = vunpack.c.h.bf16 %v1108_v14  ;;  %v520_v31 = vunpack.c.l.bf16 %v1113_v15  ;;  %v1150_v32 = vld [vmem:[%s1776_s4 + $0x50] sm:$0xff]   ;;  %v1155_v33 = vld [vmem:[%s1776_s4 + $0x58] sm:$0xff]   ;;  %v521_v34 = vunpack.c.h.bf16 %v1113_v15  ;;  %v1164_v38 = vld [vmem:[%s1776_s4 + $0x60] sm:$0xff]  }
  0x26   :  { %v524_v35 = vunpack.c.l.bf16 %v1122_v20  ;;  %v525_v36 = vunpack.c.h.bf16 %v1122_v20  ;;  %v528_v37 = vunpack.c.l.bf16 %v1127_v21  ;;  %v1169_v39 = vld [vmem:[%s1776_s4 + $0x68] sm:$0xff]   ;;  %v529_v40 = vunpack.c.h.bf16 %v1127_v21  ;;  %v1178_v44 = vld [vmem:[%s1776_s4 + $0x70] sm:$0xff]   ;;  %v1183_v45 = vld [vmem:[%s1776_s4 + $0x78] sm:$0xff]  }
  0x27   :  { %v26_v7 = vmax.f32 %v25_v6, 0.0  ;;  %v532_v41 = vunpack.c.l.bf16 %v1136_v26  ;;  %v1192_v50 = vld [vmem:[%s1776_s4 + $0x80] sm:$0xff]   ;;  %v1197_v51 = vld [vmem:[%s1776_s4 + $0x88] sm:$0xff]   ;;  %v1206_v56 = vld [vmem:[%s1776_s4 + $0x90] sm:$0xff]  }
  0x28   :  { %v1211_v57 = vld [vmem:[%s1776_s4 + $0x98] sm:$0xff]   ;;  %v1220_v62 = vld [vmem:[%s1776_s4 + $0xa0] sm:$0xff]   ;;  %v1225_v63 = vld [vmem:[%s1776_s4 + $0xa8] sm:$0xff]  }
  0x29   :  { %v28_v9 = vadd.f32 1e-05, %v26_v7  ;;  %v1234_v5 = vld [vmem:[%s1776_s4 + $0xb0] sm:$0xff]   ;;  %v1239_v6 = vld [vmem:[%s1776_s4 + $0xb8] sm:$0xff]   ;;  %v1248_v4 = vld [vmem:[%s1776_s4 + $0xc0] sm:$0xff]  }
  0x2a   :  { %v1253_v0 = vld [vmem:[%s1776_s4 + $0xc8] sm:$0xff]   ;;  %v27_v7 = vld [vmem:[%s1777_s1] sm:$0x1]  ;;  %v1265_v60 = vld [vmem:[%s1776_s4 + $0xd0] sm:$0xff]  }
  0x2b   :  { %657 = vrsqrt.f32 %v28_v9  ;;  %v1274_v1 = vld [vmem:[%s1776_s4 + $0xd8] sm:$0xff]   ;;  %v1279_v61 = vld [vmem:[%s1776_s4 + $0xe0] sm:$0xff]   ;;  %v1288_v54 = vld [vmem:[%s1776_s4 + $0xe8] sm:$0xff]  }
  0x2c   :  { %v1296_v59 = vld [vmem:[%s1776_s4 + $0xf0] sm:$0xff]   ;;  %v1301_v55 = vld [vmem:[%s1776_s4 + $0xf8] sm:$0xff]   ;;  %v613_v52 = vunpack.c.h.bf16 %v1279_v61  ;;  %v616_v47 = vunpack.c.l.bf16 %v1288_v54 }
  0x2d   :  { %v620_v43 = vunpack.c.l.bf16 %v1296_v59  ;;  %v624_v49 = vunpack.c.l.bf16 %v1301_v55  ;;  %v625_v48 = vunpack.c.h.bf16 %v1301_v55 }
  0x38   :  { %v658_v3 = vpop.eup %657 }
  0x39   :  { %v30_v53 = vmul.f32 %v658_v3, %v27_v7  ;;  %v31_v3 = vld [vmem:[%s1778_s2] sm:$0x1] }
  0x3b   :  { %v32_v58 = vmul.f32 %v30_v53, %v1079_v2  ;;  %v1313_v9 = vrot.slane %v30_v53, %v293_v17 }
  0x3d   :  { %v33_v42 = vsub.f32 %v31_v3, %v32_v58  ;;  %v296_v2 = vmul.f32 %v500_v16, %v1313_v9  ;;  %v297_v53 = vmul.f32 %v501_v18, %v1313_v9  ;;  %v298_v46 = vmul.f32 %v504_v19, %v1313_v9 }
  0x3e   :  { %v299_v7 = vmul.f32 %v505_v22, %v1313_v9  ;;  %v300_v58 = vmul.f32 %v508_v23, %v1313_v9  ;;  %v301_v16 = vmul.f32 %v509_v24, %v1313_v9  ;;  %v302_v10 = vmul.f32 %v512_v25, %v1313_v9 }
  0x3f   :  { %v1344_v18 = vrot.slane %v33_v42, %v293_v17  ;;  %v303_v11 = vmul.f32 %v513_v28, %v1313_v9  ;;  %v304_v19 = vmul.f32 %v516_v29, %v1313_v9  ;;  %v305_v12 = vmul.f32 %v517_v30, %v1313_v9 }
  0x40   :  { %v306_v22 = vmul.f32 %v520_v31, %v1313_v9  ;;  %v307_v8 = vmul.f32 %v521_v34, %v1313_v9  ;;  %v308_v13 = vmul.f32 %v524_v35, %v1313_v9  ;;  %v309_v17 = vmul.f32 %v525_v36, %v1313_v9 }
  0x41   :  { %v366_v23 = vadd.f32 %v1344_v18, %v296_v2  ;;  %v367_v14 = vadd.f32 %v1344_v18, %v297_v53  ;;  %v368_v24 = vadd.f32 %v1344_v18, %v298_v46  ;;  %v369_v25 = vadd.f32 %v1344_v18, %v299_v7 }
  0x42   :  { %v370_v28 = vadd.f32 %v1344_v18, %v300_v58  ;;  %v371_v15 = vadd.f32 %v1344_v18, %v301_v16  ;;  %v372_v29 = vadd.f32 %v1344_v18, %v302_v10  ;;  %v373_v30 = vadd.f32 %v1344_v18, %v303_v11 }
  0x43   :  { %430 = vst [vmem:[%s1774_s5 + $0x8] sm:$0xff] %v366_v23  ;;  %431 = vst [vmem:[%s1774_s5 + $0x18] sm:$0xff] %v367_v14  ;;  %v374_v20 = vadd.f32 %v1344_v18, %v304_v19  ;;  %v375_v31 = vadd.f32 %v1344_v18, %v305_v12  ;;  %v376_v34 = vadd.f32 %v1344_v18, %v306_v22  ;;  %v1780_v7 = vunpack.c.l.bf16 %v1141_v27 }
  0x44   :  { %432 = vst [vmem:[%s1774_s5 + $0x28] sm:$0xff] %v368_v24  ;;  %433 = vst [vmem:[%s1774_s5 + $0x38] sm:$0xff] %v369_v25  ;;  %v377_v35 = vadd.f32 %v1344_v18, %v307_v8  ;;  %v378_v36 = vadd.f32 %v1344_v18, %v308_v13  ;;  %v379_v42 = vadd.f32 %v1344_v18, %v309_v17  ;;  %v1781_v53 = vunpack.c.h.bf16 %v1141_v27 }
  0x45   :  { %434 = vst [vmem:[%s1774_s5 + $0x48] sm:$0xff] %v370_v28  ;;  %435 = vst [vmem:[%s1774_s5 + $0x58] sm:$0xff] %v371_v15  ;;  %v310_v46 = vmul.f32 %v528_v37, %v1313_v9  ;;  %v311_v3 = vmul.f32 %v529_v40, %v1313_v9  ;;  %v312_v21 = vmul.f32 %v532_v41, %v1313_v9  ;;  %v1779_v37 = vunpack.c.h.bf16 %v1136_v26 }
  0x46   :  { %436 = vst [vmem:[%s1774_s5 + $0x68] sm:$0xff] %v372_v29  ;;  %437 = vst [vmem:[%s1774_s5 + $0x78] sm:$0xff] %v373_v30  ;;  %v314_v2 = vmul.f32 %v1780_v7, %v1313_v9  ;;  %v315_v58 = vmul.f32 %v1781_v53, %v1313_v9  ;;  %v1782_v16 = vunpack.c.l.bf16 %v1150_v32  ;;  %v1783_v27 = vunpack.c.h.bf16 %v1150_v32 }
  0x47   :  { %438 = vst [vmem:[%s1774_s5 + $0x88] sm:$0xff] %v374_v20  ;;  %439 = vst [vmem:[%s1774_s5 + $0x98] sm:$0xff] %v375_v31  ;;  %v313_v40 = vmul.f32 %v1779_v37, %v1313_v9  ;;  %v380_v41 = vadd.f32 %v1344_v18, %v310_v46  ;;  %v381_v26 = vadd.f32 %v1344_v18, %v311_v3  ;;  %v1784_v17 = vunpack.c.l.bf16 %v1155_v33 }
  0x48   :  { %440 = vst [vmem:[%s1774_s5 + $0xa8] sm:$0xff] %v376_v34  ;;  %441 = vst [vmem:[%s1774_s5 + $0xb8] sm:$0xff] %v377_v35  ;;  %v316_v10 = vmul.f32 %v1782_v16, %v1313_v9  ;;  %v317_v11 = vmul.f32 %v1783_v27, %v1313_v9  ;;  %v382_v19 = vadd.f32 %v1344_v18, %v312_v21  ;;  %v1785_v14 = vunpack.c.h.bf16 %v1155_v33 }
  0x49   :  { %442 = vst [vmem:[%s1774_s5 + $0xc8] sm:$0xff] %v378_v36  ;;  %443 = vst [vmem:[%s1774_s5 + $0xd8] sm:$0xff] %v379_v42  ;;  %v383_v12 = vadd.f32 %v1344_v18, %v313_v40  ;;  %v384_v22 = vadd.f32 %v1344_v18, %v314_v2  ;;  %v385_v8 = vadd.f32 %v1344_v18, %v315_v58  ;;  %v1786_v33 = vunpack.c.l.bf16 %v1164_v38 }
  0x4a   :  { %444 = vst [vmem:[%s1774_s5 + $0xe8] sm:$0xff] %v380_v41  ;;  %445 = vst [vmem:[%s1774_s5 + $0xf8] sm:$0xff] %v381_v26  ;;  %v386_v13 = vadd.f32 %v1344_v18, %v316_v10  ;;  %v387_v32 = vadd.f32 %v1344_v18, %v317_v11  ;;  %v318_v23 = vmul.f32 %v1784_v17, %v1313_v9  ;;  %v1787_v28 = vunpack.c.h.bf16 %v1164_v38 }
  0x4b   :  { %v319_v24 = vmul.f32 %v1785_v14, %v1313_v9  ;;  %446 = vst [vmem:[%s1774_s5 + $0x108] sm:$0xff] %v382_v19  ;;  %447 = vst [vmem:[%s1774_s5 + $0x118] sm:$0xff] %v383_v12  ;;  %v320_v25 = vmul.f32 %v1786_v33, %v1313_v9  ;;  %v1788_v29 = vunpack.c.l.bf16 %v1169_v39  ;;  %v1789_v20 = vunpack.c.h.bf16 %v1169_v39 }
  0x4c   :  { %448 = vst [vmem:[%s1774_s5 + $0x128] sm:$0xff] %v384_v22  ;;  %449 = vst [vmem:[%s1774_s5 + $0x138] sm:$0xff] %v385_v8  ;;  %v321_v15 = vmul.f32 %v1787_v28, %v1313_v9  ;;  %v388_v34 = vadd.f32 %v1344_v18, %v318_v23  ;;  %v1790_v35 = vunpack.c.l.bf16 %v1178_v44  ;;  %v1791_v39 = vunpack.c.h.bf16 %v1178_v44 }
  0x4d   :  { %v322_v30 = vmul.f32 %v1788_v29, %v1313_v9  ;;  %v323_v31 = vmul.f32 %v1789_v20, %v1313_v9  ;;  %450 = vst [vmem:[%s1774_s5 + $0x148] sm:$0xff] %v386_v13  ;;  %451 = vst [vmem:[%s1774_s5 + $0x158] sm:$0xff] %v387_v32  ;;  %v389_v38 = vadd.f32 %v1344_v18, %v319_v24  ;;  %v1792_v7 = vunpack.c.l.bf16 %v1183_v45 }
  0x4e   :  { %v324_v36 = vmul.f32 %v1790_v35, %v1313_v9  ;;  %v325_v42 = vmul.f32 %v1791_v39, %v1313_v9  ;;  %v390_v46 = vadd.f32 %v1344_v18, %v320_v25  ;;  %v391_v3 = vadd.f32 %v1344_v18, %v321_v15  ;;  %452 = vst [vmem:[%s1774_s5 + $0x168] sm:$0xff] %v388_v34 }
  0x4f   :  { %v392_v21 = vadd.f32 %v1344_v18, %v322_v30  ;;  %v393_v37 = vadd.f32 %v1344_v18, %v323_v31  ;;  %453 = vst [vmem:[%s1774_s5 + $0x178] sm:$0xff] %v389_v38  ;;  %v326_v2 = vmul.f32 %v1792_v7, %v1313_v9  ;;  %v1793_v53 = vunpack.c.h.bf16 %v1183_v45 }
  0x50   :  { %v394_v40 = vadd.f32 %v1344_v18, %v324_v36  ;;  %v395_v44 = vadd.f32 %v1344_v18, %v325_v42  ;;  %454 = vst [vmem:[%s1774_s5 + $0x188] sm:$0xff] %v390_v46  ;;  %455 = vst [vmem:[%s1774_s5 + $0x198] sm:$0xff] %v391_v3  ;;  %v1794_v45 = vunpack.c.l.bf16 %v1192_v50  ;;  %v1795_v26 = vunpack.c.h.bf16 %v1192_v50 }
  0x51   :  { %v327_v58 = vmul.f32 %v1793_v53, %v1313_v9  ;;  %456 = vst [vmem:[%s1774_s5 + $0x1a8] sm:$0xff] %v392_v21  ;;  %457 = vst [vmem:[%s1774_s5 + $0x1b8] sm:$0xff] %v393_v37  ;;  %v1796_v10 = vunpack.c.l.bf16 %v1197_v51  ;;  %v1797_v11 = vunpack.c.h.bf16 %v1197_v51  ;;  %v396_v12 = vadd.f32 %v1344_v18, %v326_v2 }
  0x52   :  { %v328_v41 = vmul.f32 %v1794_v45, %v1313_v9  ;;  %v329_v16 = vmul.f32 %v1795_v26, %v1313_v9  ;;  %458 = vst [vmem:[%s1774_s5 + $0x1c8] sm:$0xff] %v394_v40  ;;  %459 = vst [vmem:[%s1774_s5 + $0x1d8] sm:$0xff] %v395_v44  ;;  %v1798_v22 = vunpack.c.l.bf16 %v1206_v56  ;;  %v1799_v51 = vunpack.c.h.bf16 %v1206_v56 }
  0x53   :  { %v330_v27 = vmul.f32 %v1796_v10, %v1313_v9  ;;  %v331_v19 = vmul.f32 %v1797_v11, %v1313_v9  ;;  %v397_v50 = vadd.f32 %v1344_v18, %v327_v58  ;;  %460 = vst [vmem:[%s1774_s5 + $0x1e8] sm:$0xff] %v396_v12  ;;  %v1800_v33 = vunpack.c.l.bf16 %v1211_v57 }
  0x54   :  { %v332_v8 = vmul.f32 %v1798_v22, %v1313_v9  ;;  %v333_v13 = vmul.f32 %v1799_v51, %v1313_v9  ;;  %v398_v32 = vadd.f32 %v1344_v18, %v328_v41  ;;  %v399_v17 = vadd.f32 %v1344_v18, %v329_v16 }
  0x55   :  { %v400_v23 = vadd.f32 %v1344_v18, %v330_v27  ;;  %v401_v14 = vadd.f32 %v1344_v18, %v331_v19  ;;  %461 = vst [vmem:[%s1774_s5 + $0x1f8] sm:$0xff] %v397_v50  ;;  %v334_v25 = vmul.f32 %v1800_v33, %v1313_v9  ;;  %v1801_v28 = vunpack.c.h.bf16 %v1211_v57 }
  0x56   :  { %v402_v24 = vadd.f32 %v1344_v18, %v332_v8  ;;  %v403_v56 = vadd.f32 %v1344_v18, %v333_v13  ;;  %462 = vst [vmem:[%s1774_s5 + $0x208] sm:$0xff] %v398_v32  ;;  %463 = vst [vmem:[%s1774_s5 + $0x218] sm:$0xff] %v399_v17  ;;  %v1802_v57 = vunpack.c.l.bf16 %v1220_v62  ;;  %v1803_v30 = vunpack.c.h.bf16 %v1220_v62 }
  0x57   :  { %v335_v15 = vmul.f32 %v1801_v28, %v1313_v9  ;;  %464 = vst [vmem:[%s1774_s5 + $0x228] sm:$0xff] %v400_v23  ;;  %465 = vst [vmem:[%s1774_s5 + $0x238] sm:$0xff] %v401_v14  ;;  %v1804_v31 = vunpack.c.l.bf16 %v1225_v63  ;;  %v1805_v38 = vunpack.c.h.bf16 %v1225_v63  ;;  %v404_v36 = vadd.f32 %v1344_v18, %v334_v25 }
  0x58   :  { %v336_v29 = vmul.f32 %v1802_v57, %v1313_v9  ;;  %v337_v20 = vmul.f32 %v1803_v30, %v1313_v9  ;;  %466 = vst [vmem:[%s1774_s5 + $0x248] sm:$0xff] %v402_v24  ;;  %467 = vst [vmem:[%s1774_s5 + $0x258] sm:$0xff] %v403_v56  ;;  %v1806_v39 = vunpack.c.l.bf16 %v1234_v5  ;;  %v1807_v63 = vunpack.c.h.bf16 %v1234_v5 }
  0x59   :  { %v338_v34 = vmul.f32 %v1804_v31, %v1313_v9  ;;  %v339_v35 = vmul.f32 %v1805_v38, %v1313_v9  ;;  %v405_v62 = vadd.f32 %v1344_v18, %v335_v15  ;;  %468 = vst [vmem:[%s1774_s5 + $0x268] sm:$0xff] %v404_v36  ;;  %v1808_v7 = vunpack.c.l.bf16 %v1239_v6 }
  0x5a   :  { %v340_v42 = vmul.f32 %v1806_v39, %v1313_v9  ;;  %v341_v46 = vmul.f32 %v1807_v63, %v1313_v9  ;;  %v406_v3 = vadd.f32 %v1344_v18, %v336_v29  ;;  %v407_v21 = vadd.f32 %v1344_v18, %v337_v20 }
  0x5b   :  { %v408_v37 = vadd.f32 %v1344_v18, %v338_v34  ;;  %v409_v40 = vadd.f32 %v1344_v18, %v339_v35  ;;  %469 = vst [vmem:[%s1774_s5 + $0x278] sm:$0xff] %v405_v62  ;;  %v342_v2 = vmul.f32 %v1808_v7, %v1313_v9  ;;  %v1809_v53 = vunpack.c.h.bf16 %v1239_v6 }
  0x5c   :  { %v410_v44 = vadd.f32 %v1344_v18, %v340_v42  ;;  %v411_v5 = vadd.f32 %v1344_v18, %v341_v46  ;;  %470 = vst [vmem:[%s1774_s5 + $0x288] sm:$0xff] %v406_v3  ;;  %471 = vst [vmem:[%s1774_s5 + $0x298] sm:$0xff] %v407_v21  ;;  %v1810_v6 = vunpack.c.l.bf16 %v1248_v4  ;;  %v1811_v41 = vunpack.c.h.bf16 %v1248_v4 }
  0x5d   :  { %v343_v58 = vmul.f32 %v1809_v53, %v1313_v9  ;;  %472 = vst [vmem:[%s1774_s5 + $0x2a8] sm:$0xff] %v408_v37  ;;  %473 = vst [vmem:[%s1774_s5 + $0x2b8] sm:$0xff] %v409_v40  ;;  %v1812_v16 = vunpack.c.l.bf16 %v1253_v0  ;;  %v1813_v27 = vunpack.c.h.bf16 %v1253_v0  ;;  %v412_v19 = vadd.f32 %v1344_v18, %v342_v2 }
  0x5e   :  { %v344_v45 = vmul.f32 %v1810_v6, %v1313_v9  ;;  %v345_v26 = vmul.f32 %v1811_v41, %v1313_v9  ;;  %474 = vst [vmem:[%s1774_s5 + $0x2c8] sm:$0xff] %v410_v44  ;;  %475 = vst [vmem:[%s1774_s5 + $0x2d8] sm:$0xff] %v411_v5  ;;  %v1814_v12 = vunpack.c.l.bf16 %v1265_v60  ;;  %v1815_v0 = vunpack.c.h.bf16 %v1265_v60 }
  0x5f   :  { %v346_v10 = vmul.f32 %v1812_v16, %v1313_v9  ;;  %v347_v11 = vmul.f32 %v1813_v27, %v1313_v9  ;;  %v413_v4 = vadd.f32 %v1344_v18, %v343_v58  ;;  %476 = vst [vmem:[%s1774_s5 + $0x2e8] sm:$0xff] %v412_v19  ;;  %v1816_v23 = vunpack.c.l.bf16 %v1274_v1 }
  0x60   :  { %v348_v50 = vmul.f32 %v1814_v12, %v1313_v9  ;;  %v349_v22 = vmul.f32 %v1815_v0, %v1313_v9  ;;  %v414_v8 = vadd.f32 %v1344_v18, %v344_v45  ;;  %v415_v51 = vadd.f32 %v1344_v18, %v345_v26 }
  0x61   :  { %v416_v13 = vadd.f32 %v1344_v18, %v346_v10  ;;  %v417_v32 = vadd.f32 %v1344_v18, %v347_v11  ;;  %477 = vst [vmem:[%s1774_s5 + $0x2f8] sm:$0xff] %v413_v4  ;;  %v350_v14 = vmul.f32 %v1816_v23, %v1313_v9  ;;  %v1817_v24 = vunpack.c.h.bf16 %v1274_v1 }
  0x62   :  { %v418_v17 = vadd.f32 %v1344_v18, %v348_v50  ;;  %v419_v60 = vadd.f32 %v1344_v18, %v349_v22  ;;  %478 = vst [vmem:[%s1774_s5 + $0x308] sm:$0xff] %v414_v8  ;;  %479 = vst [vmem:[%s1774_s5 + $0x318] sm:$0xff] %v415_v51  ;;  %v1818_v1 = vunpack.c.l.bf16 %v1279_v61  ;;  %v353_v25 = vmul.f32 %v613_v52, %v1313_v9 }
  0x63   :  { %v351_v56 = vmul.f32 %v1817_v24, %v1313_v9  ;;  %480 = vst [vmem:[%s1774_s5 + $0x328] sm:$0xff] %v416_v13  ;;  %481 = vst [vmem:[%s1774_s5 + $0x338] sm:$0xff] %v417_v32  ;;  %v354_v28 = vmul.f32 %v616_v47, %v1313_v9  ;;  %v1819_v15 = vunpack.c.h.bf16 %v1288_v54  ;;  %v420_v29 = vadd.f32 %v1344_v18, %v350_v14 }
  0x64   :  { %v352_v33 = vmul.f32 %v1818_v1, %v1313_v9  ;;  %482 = vst [vmem:[%s1774_s5 + $0x348] sm:$0xff] %v418_v17  ;;  %483 = vst [vmem:[%s1774_s5 + $0x358] sm:$0xff] %v419_v60  ;;  %v356_v47 = vmul.f32 %v620_v43, %v1313_v9  ;;  %v1820_v54 = vunpack.c.h.bf16 %v1296_v59  ;;  %v423_v20 = vadd.f32 %v1344_v18, %v353_v25 }
  0x65   :  { %v355_v57 = vmul.f32 %v1819_v15, %v1313_v9  ;;  %v421_v52 = vadd.f32 %v1344_v18, %v351_v56  ;;  %v424_v31 = vadd.f32 %v1344_v18, %v354_v28  ;;  %484 = vst [vmem:[%s1774_s5 + $0x368] sm:$0xff] %v420_v29  ;;  %v358_v38 = vmul.f32 %v624_v49, %v1313_v9 }
  0x66   :  { %v357_v61 = vmul.f32 %v1820_v54, %v1313_v9  ;;  %v422_v30 = vadd.f32 %v1344_v18, %v352_v33  ;;  %v426_v43 = vadd.f32 %v1344_v18, %v356_v47  ;;  %v359_v35 = vmul.f32 %v625_v48, %v1313_v9  ;;  %487 = vst [vmem:[%s1774_s5 + $0x398] sm:$0xff] %v423_v20 }
  0x67   :  { %v425_v34 = vadd.f32 %v1344_v18, %v355_v57  ;;  %485 = vst [vmem:[%s1774_s5 + $0x378] sm:$0xff] %v421_v52  ;;  %488 = vst [vmem:[%s1774_s5 + $0x3a8] sm:$0xff] %v424_v31  ;;  %v428_v48 = vadd.f32 %v1344_v18, %v358_v38 }
  0x68   :  { %v427_v59 = vadd.f32 %v1344_v18, %v357_v61  ;;  %486 = vst [vmem:[%s1774_s5 + $0x388] sm:$0xff] %v422_v30  ;;  %490 = vst [vmem:[%s1774_s5 + $0x3c8] sm:$0xff] %v426_v43  ;;  %v429_v49 = vadd.f32 %v1344_v18, %v359_v35 }
  0x69   :  { %489 = vst [vmem:[%s1774_s5 + $0x3b8] sm:$0xff] %v425_v34  ;;  %492 = vst [vmem:[%s1774_s5 + $0x3e8] sm:$0xff] %v428_v48 }
  0x6a   :  { %491 = vst [vmem:[%s1774_s5 + $0x3d8] sm:$0xff] %v427_v59  ;;  %493 = vst [vmem:[%s1774_s5 + $0x3f8] sm:$0xff] %v429_v49 }

</bundles_post_ra>
